<compile_context>
chip_gen: v6e
topology: v6e:2x2x1
jax: 0.10.0
libtpu: 0.0.40
codegen_flags: <defaults>
</compile_context>

<pallas_src>
import functools

import jax
import jax.numpy as jnp
from jax.experimental import pallas as pl
from jax.experimental.pallas import tpu as pltpu


def _round_up(x, m):
    return ((x + m - 1) // m) * m


# ---------------- Pallas matmul (+ bias, optional fused tanh) ----------------
def _matmul_bias_kernel(a_ref, b_ref, bias_ref, o_ref, *, activation):
    k = pl.program_id(2)

    @pl.when(k == 0)
    def _():
        o_ref[...] = jnp.zeros_like(o_ref)

    # bf16 x bf16 -> f32 accumulation, accumulated in-place in the resident
    # output block (constant (i, j) block index across the K axis).
    o_ref[...] += jnp.dot(a_ref[...], b_ref[...],
                          preferred_element_type=jnp.float32)

    @pl.when(k == pl.num_programs(2) - 1)
    def _():
        out = o_ref[...] + bias_ref[...]
        if activation == "tanh":
            out = jnp.tanh(out)
        o_ref[...] = out


def _choose_k_tile(K):
    """Largest tk <= 512 (multiple of 128) dividing round_up(K, 128)."""
    kp = _round_up(K, 128)
    m = kp // 128
    for d in (4, 3, 2, 1):
        if m % d == 0:
            return 128 * d, kp
    return 128, kp  # unreachable


def pallas_matmul_bias(a, b, bias, activation=None):
    """(M,K) @ (K,N) + bias[N], optional tanh — tiled MXU kernel, bf16 in."""
    M, K = a.shape
    K2, N = b.shape
    assert K == K2
    tm = 256 if M >= 256 else _round_up(M, 16)       # bf16 sublane-aligned
    tn = 256 if N >= 256 else _round_up(N, 128)      # lane-aligned
    tk, Kp = _choose_k_tile(K)
    Mp = _round_up(M, tm)
    Np = _round_up(N, tn)

    a_p = jnp.pad(a, ((0, Mp - M), (0, Kp - K))).astype(jnp.bfloat16)
    b_p = jnp.pad(b, ((0, Kp - K), (0, Np - N))).astype(jnp.bfloat16)
    bias_p = jnp.pad(bias.astype(jnp.float32), (0, Np - N)).reshape(1, Np)

    kernel = functools.partial(_matmul_bias_kernel, activation=activation)
    out = pl.pallas_call(
        kernel,
        out_shape=jax.ShapeDtypeStruct((Mp, Np), jnp.float32),
        grid_spec=pltpu.PrefetchScalarGridSpec(
            num_scalar_prefetch=0,
            grid=(Mp // tm, Np // tn, Kp // tk),
            in_specs=[
                pl.BlockSpec((tm, tk), lambda i, j, k: (i, k)),
                pl.BlockSpec((tk, tn), lambda i, j, k: (k, j)),
                pl.BlockSpec((1, tn), lambda i, j, k: (0, j)),
            ],
            out_specs=pl.BlockSpec((tm, tn), lambda i, j, k: (i, j)),
        ),
        compiler_params=pltpu.CompilerParams(
            dimension_semantics=("parallel", "parallel", "arbitrary"),
            vmem_limit_bytes=32 * 1024 * 1024),
    )(a_p, b_p, bias_p)
    return out[:M, :N]


# -------- Pallas InstanceNorm (affine=False) + ReLU / fused residual add ----
def _instnorm_kernel(*refs, eps, relu, has_residual):
    if has_residual:
        x_ref, r_ref, o_ref = refs
    else:
        x_ref, o_ref = refs
    x = x_ref[...].astype(jnp.float32)               # (1, H*W, ct)
    mean = jnp.mean(x, axis=1, keepdims=True)
    xc = x - mean
    var = jnp.mean(xc * xc, axis=1, keepdims=True)   # biased var (PyTorch)
    y = xc * jax.lax.rsqrt(var + eps)
    if relu:
        y = jnp.maximum(y, 0.0)
    if has_residual:
        y = y + r_ref[...]                           # fused residual add
    o_ref[...] = y


def pallas_instance_norm(x_nhwc, relu, residual=None, eps=1e-5):
    N, H, W, C = x_nhwc.shape
    HW = H * W
    x = x_nhwc.reshape(N, HW, C)
    ct = 128 if (C % 128 == 0) else C                # channel tile (lanes)
    idx = lambda n, c: (n, 0, c)
    in_specs = [pl.BlockSpec((1, HW, ct), idx)]
    inputs = [x]
    if residual is not None:
        in_specs.append(pl.BlockSpec((1, HW, ct), idx))
        inputs.append(residual.reshape(N, HW, C))
    kernel = functools.partial(_instnorm_kernel, eps=eps, relu=relu,
                               has_residual=residual is not None)
    out = pl.pallas_call(
        kernel,
        out_shape=jax.ShapeDtypeStruct((N, HW, C), jnp.float32),
        grid_spec=pltpu.PrefetchScalarGridSpec(
            num_scalar_prefetch=0,
            grid=(N, C // ct),
            in_specs=in_specs,
            out_specs=pl.BlockSpec((1, HW, ct), idx),
        ),
        compiler_params=pltpu.CompilerParams(
            dimension_semantics=("parallel", "parallel"),
            vmem_limit_bytes=32 * 1024 * 1024),
    )(*inputs)
    return out.reshape(N, H, W, C)


# ---------------- conv / conv-transpose glue (NHWC) --------------------------
# TODO(synk): fuse patch extraction into the Pallas matmul kernel (index_map
# over (n, ho, wo) tiles with in-VMEM halo reads) to avoid materializing the
# kH*kW-duplicated im2col matrix in HBM.
def _im2col(x_nhwc, k, stride, pad):
    N, H, W, C = x_nhwc.shape
    xp = jnp.pad(x_nhwc, ((0, 0), (pad, pad), (pad, pad), (0, 0)))
    Ho = (H + 2 * pad - k) // stride + 1
    Wo = (W + 2 * pad - k) // stride + 1
    cols = []
    for dh in range(k):
        for dw in range(k):
            cols.append(xp[:, dh:dh + stride * Ho:stride,
                            dw:dw + stride * Wo:stride, :])   # (N,Ho,Wo,C)
    patches = jnp.stack(cols, axis=3)                          # (N,Ho,Wo,kk,C)
    return patches.reshape(N * Ho * Wo, k * k * C), Ho, Wo


def conv2d_nhwc(x, weight, bias, stride, pad, activation=None):
    # x: (N,H,W,Cin); weight: (Cout, Cin, kH, kW) (PyTorch layout)
    N, H, W, C = x.shape
    O, _, kH, kW = weight.shape
    patches, Ho, Wo = _im2col(x, kH, stride, pad)
    w_mat = jnp.transpose(weight, (2, 3, 1, 0)).reshape(kH * kW * C, O)
    out = pallas_matmul_bias(patches, w_mat, bias, activation=activation)
    return out.reshape(N, Ho, Wo, O)


def conv_transpose2d_nhwc(x, weight, bias, stride, pad, output_padding):
    """Sub-pixel decomposition of ConvTranspose2d(k=3, s=2, p=1, op=1).

    out[2i+dr, 2j+dc] only touches x[i..i+1, j..j+1]; the 4 (dr,dc)
    sub-kernels are packed into one (4*Cin, 4*Cout) matrix so the whole layer
    is a single matmul on 2x2 patches of the un-stuffed input (no zeros).
    """
    N, H, W, Cin = x.shape
    Cin_w, Cout, kH, kW = weight.shape
    assert (stride, pad, output_padding, kH, kW) == (2, 1, 1, 3, 3)
    assert Cin_w == Cin

    xp = jnp.pad(x, ((0, 0), (0, 1), (0, 1), (0, 0)))           # right/bottom
    cols = []
    for dh in range(2):
        for dw in range(2):
            cols.append(xp[:, dh:dh + H, dw:dw + W, :])
    patches = jnp.stack(cols, axis=3).reshape(N * H * W, 4 * Cin)

    w = weight                                                   # (Cin,Cout,3,3)
    Wsub = jnp.zeros((2, 2, Cin, 2, 2, Cout), jnp.float32)       # (dh,dw,ci,dr,dc,co)
    Wsub = Wsub.at[0, 0, :, 0, 0, :].set(w[:, :, 1, 1])
    Wsub = Wsub.at[0, 0, :, 0, 1, :].set(w[:, :, 1, 2])
    Wsub = Wsub.at[0, 1, :, 0, 1, :].set(w[:, :, 1, 0])
    Wsub = Wsub.at[0, 0, :, 1, 0, :].set(w[:, :, 2, 1])
    Wsub = Wsub.at[1, 0, :, 1, 0, :].set(w[:, :, 0, 1])
    Wsub = Wsub.at[0, 0, :, 1, 1, :].set(w[:, :, 2, 2])
    Wsub = Wsub.at[0, 1, :, 1, 1, :].set(w[:, :, 2, 0])
    Wsub = Wsub.at[1, 0, :, 1, 1, :].set(w[:, :, 0, 2])
    Wsub = Wsub.at[1, 1, :, 1, 1, :].set(w[:, :, 0, 0])
    w_mat = Wsub.reshape(4 * Cin, 4 * Cout)
    bias_all = jnp.tile(bias, 4)

    out = pallas_matmul_bias(patches, w_mat, bias_all)           # (N*H*W, 4*Cout)
    out = out.reshape(N, H, W, 2, 2, Cout)
    out = jnp.transpose(out, (0, 1, 3, 2, 4, 5)).reshape(N, 2 * H, 2 * W, Cout)
    return out


# ---------------- Generator: parameters + forward ----------------------------
def init_generator_params(key, input_nc, output_nc, n_residual_blocks):
    keys = iter(jax.random.split(key, 128))

    def conv_p(out_c, in_c, k):
        w = jax.random.normal(next(keys), (out_c, in_c, k, k), jnp.float32) * 0.05
        b = jax.random.normal(next(keys), (out_c,), jnp.float32) * 0.01
        return w, b

    def convT_p(in_c, out_c, k):
        w = jax.random.normal(next(keys), (in_c, out_c, k, k), jnp.float32) * 0.05
        b = jax.random.normal(next(keys), (out_c,), jnp.float32) * 0.01
        return w, b

    params = {}
    params["c0"] = conv_p(64, input_nc, 7)
    in_f, out_f = 64, 128
    down = []
    for _ in range(2):
        down.append(conv_p(out_f, in_f, 3))
        in_f, out_f = out_f, out_f * 2
    params["down"] = down
    res = []
    for _ in range(n_residual_blocks):
        res.append((conv_p(in_f, in_f, 3), conv_p(in_f, in_f, 3)))
    params["res"] = res
    out_f = in_f // 2
    up = []
    for _ in range(2):
        up.append(convT_p(in_f, out_f, 3))
        in_f, out_f = out_f, out_f // 2
    params["up"] = up
    params["cout"] = conv_p(output_nc, 64, 7)
    return params


def generator_forward(params, x_nchw):
    h = jnp.transpose(x_nchw, (0, 2, 3, 1))          # NCHW -> NHWC (once)
    # initial 7x7 conv + IN + ReLU
    w, b = params["c0"]
    h = conv2d_nhwc(h, w, b, stride=1, pad=3)
    h = pallas_instance_norm(h, relu=True)
    # 2x downsampling
    for (w, b) in params["down"]:
        h = conv2d_nhwc(h, w, b, stride=2, pad=1)
        h = pallas_instance_norm(h, relu=True)
    # residual blocks (residual add fused into the second InstanceNorm)
    for ((w1, b1), (w2, b2)) in params["res"]:
        r = conv2d_nhwc(h, w1, b1, stride=1, pad=1)
        r = pallas_instance_norm(r, relu=True)
        r = conv2d_nhwc(r, w2, b2, stride=1, pad=1)
        h = pallas_instance_norm(r, relu=False, residual=h)
    # 2x upsampling (sub-pixel conv-transpose)
    for (w, b) in params["up"]:
        h = conv_transpose2d_nhwc(h, w, b, stride=2, pad=1, output_padding=1)
        h = pallas_instance_norm(h, relu=True)
    # output 7x7 conv + tanh (tanh fused into the Pallas matmul epilogue)
    w, b = params["cout"]
    h = conv2d_nhwc(h, w, b, stride=1, pad=3, activation="tanh")
    return jnp.transpose(h, (0, 3, 1, 2))            # NHWC -> NCHW (once)


if __name__ == "__main__":
    key = jax.random.PRNGKey(0)
    pkey, xkey = jax.random.split(key)
    input_nc, output_nc, n_res = 3, 3, 2   # n_residual_blocks kept small for demo
    params = init_generator_params(pkey, input_nc, output_nc, n_res)
    x = jax.random.normal(xkey, (2, input_nc, 16, 16), jnp.float32)

    out = jax.jit(generator_forward)(params, x)
    out = jax.block_until_ready(out)

    assert out.shape == (2, output_nc, 16, 16), out.shape
    assert bool(jnp.all(jnp.isfinite(out)))
    assert bool(jnp.all(jnp.abs(out) <= 1.0))   # tanh output range
    print("KERNEL_OK")
</pallas_src>

<mosaic_0001>
module attributes {stable_mosaic.version = 11 : i64} {
  func.func @_matmul_bias_kernel(%arg0: i32, %arg1: i32, %arg2: i32, %arg3: memref<256x256xbf16, #tpu.memory_space<vmem>>, %arg4: memref<256x128xbf16, #tpu.memory_space<vmem>>, %arg5: memref<1x128xf32, #tpu.memory_space<vmem>>, %arg6: memref<256x128xf32, #tpu.memory_space<vmem>>) attributes {dimension_semantics = [#tpu.dimension_semantics<parallel>, #tpu.dimension_semantics<parallel>, #tpu.dimension_semantics<arbitrary>], iteration_bounds = array<i64: 2, 1, 1>, scalar_prefetch = 0 : i64, scratch_operands = 0 : i64, tpu.core_type = #tpu.core_type<tc>, window_params = [{transform_indices = @transform_0, window_bounds = array<i64: 256, 256>}, {transform_indices = @transform_1, window_bounds = array<i64: 256, 128>}, {transform_indices = @transform_2, window_bounds = array<i64: 1, 128>}, {transform_indices = @transform_3, window_bounds = array<i64: 256, 128>}]} {
    %c0_i32 = arith.constant 0 : i32
    %0 = arith.cmpi eq, %arg2, %c0_i32 : i32
    %1 = arith.extui %0 : i1 to i32
    %c0_i32_0 = arith.constant 0 : i32
    %2 = arith.cmpi ne, %1, %c0_i32_0 : i32
    scf.if %2 {
      %cst_10 = arith.constant 0.000000e+00 : f32
      %12 = vector.broadcast %cst_10 : f32 to vector<256x128xf32>
      %c0_11 = arith.constant 0 : index
      %c0_12 = arith.constant 0 : index
      %13 = vector.load %arg6[%c0_11, %c0_12] : memref<256x128xf32, #tpu.memory_space<vmem>>, vector<256x128xf32>
      tpu.vector_store %arg6[%c0_11, %c0_12], %12 {strides = array<i32>} : memref<256x128xf32, #tpu.memory_space<vmem>>, vector<256x128xf32>,
    } else {
    }
    %c0 = arith.constant 0 : index
    %c0_1 = arith.constant 0 : index
    %3 = vector.load %arg6[%c0, %c0_1] : memref<256x128xf32, #tpu.memory_space<vmem>>, vector<256x128xf32>
    %c0_2 = arith.constant 0 : index
    %c0_3 = arith.constant 0 : index
    %4 = vector.load %arg3[%c0_2, %c0_3] : memref<256x256xbf16, #tpu.memory_space<vmem>>, vector<256x256xbf16>
    %c0_4 = arith.constant 0 : index
    %c0_5 = arith.constant 0 : index
    %5 = vector.load %arg4[%c0_4, %c0_5] : memref<256x128xbf16, #tpu.memory_space<vmem>>, vector<256x128xbf16>
    %cst = arith.constant dense<0.000000e+00> : vector<256x128xf32>
    %6 = tpu.matmul %4, %5, %cst {dimension_numbers = #tpu.dot_dimension_numbers<[1], [0], [0], [1], [0, 0, 1, 1], [], []>} : vector<256x256xbf16>, vector<256x128xbf16>, vector<256x128xf32> -> vector<256x128xf32>
    %7 = arith.addf %3, %6 : vector<256x128xf32>
    %c0_6 = arith.constant 0 : index
    %c0_7 = arith.constant 0 : index
    %8 = vector.load %arg6[%c0_6, %c0_7] : memref<256x128xf32, #tpu.memory_space<vmem>>, vector<256x128xf32>
    tpu.vector_store %arg6[%c0_6, %c0_7], %7 {strides = array<i32>} : memref<256x128xf32, #tpu.memory_space<vmem>>, vector<256x128xf32>,
    %c0_i32_8 = arith.constant 0 : i32
    %9 = arith.cmpi eq, %arg2, %c0_i32_8 : i32
    %10 = arith.extui %9 : i1 to i32
    %c0_i32_9 = arith.constant 0 : i32
    %11 = arith.cmpi ne, %10, %c0_i32_9 : i32
    scf.if %11 {
      %c0_10 = arith.constant 0 : index
      %c0_11 = arith.constant 0 : index
      %12 = vector.load %arg6[%c0_10, %c0_11] : memref<256x128xf32, #tpu.memory_space<vmem>>, vector<256x128xf32>
      %c0_12 = arith.constant 0 : index
      %c0_13 = arith.constant 0 : index
      %13 = vector.load %arg5[%c0_12, %c0_13] : memref<1x128xf32, #tpu.memory_space<vmem>>, vector<1x128xf32>
      %14 = vector.broadcast %13 : vector<1x128xf32> to vector<256x128xf32>
      %15 = arith.addf %12, %14 : vector<256x128xf32>
      %c0_14 = arith.constant 0 : index
      %c0_15 = arith.constant 0 : index
      %16 = vector.load %arg6[%c0_14, %c0_15] : memref<256x128xf32, #tpu.memory_space<vmem>>, vector<256x128xf32>
      tpu.vector_store %arg6[%c0_14, %c0_15], %15 {strides = array<i32>} : memref<256x128xf32, #tpu.memory_space<vmem>>, vector<256x128xf32>,
    } else {
    }
    return
  }
  func.func @transform_0(%arg0: i32, %arg1: i32, %arg2: i32) -> (i32, i32) {
    %c0_i32 = arith.constant 0 : i32
    return %arg0, %arg2 : i32, i32
  }
  func.func @transform_1(%arg0: i32, %arg1: i32, %arg2: i32) -> (i32, i32) {
    %c0_i32 = arith.constant 0 : i32
    return %arg2, %arg1 : i32, i32
  }
  func.func @transform_2(%arg0: i32, %arg1: i32, %arg2: i32) -> (i32, i32) {
    %c0_i32 = arith.constant 0 : i32
    %c0_i32_0 = arith.constant 0 : i32
    return %c0_i32, %arg1 : i32, i32
  }
  func.func @transform_3(%arg0: i32, %arg1: i32, %arg2: i32) -> (i32, i32) {
    %c0_i32 = arith.constant 0 : i32
    return %arg0, %arg1 : i32, i32
  }
}

module attributes {stable_mosaic.version = 11 : i64} {
  func.func @_instnorm_kernel(%arg0: i32, %arg1: i32, %arg2: memref<1x256x64xf32, #tpu.memory_space<vmem>>, %arg3: memref<1x256x64xf32, #tpu.memory_space<vmem>>) attributes {dimension_semantics = [#tpu.dimension_semantics<parallel>, #tpu.dimension_semantics<parallel>], iteration_bounds = array<i64: 2, 1>, scalar_prefetch = 0 : i64, scratch_operands = 0 : i64, tpu.core_type = #tpu.core_type<tc>, window_params = [{transform_indices = @transform_0, window_bounds = array<i64: 1, 256, 64>}, {transform_indices = @transform_1, window_bounds = array<i64: 1, 256, 64>}]} {
    %c0 = arith.constant 0 : index
    %c0_0 = arith.constant 0 : index
    %c0_1 = arith.constant 0 : index
    %0 = vector.load %arg2[%c0, %c0_0, %c0_1] : memref<1x256x64xf32, #tpu.memory_space<vmem>>, vector<1x256x64xf32>
    %cst = arith.constant dense<0.000000e+00> : vector<1x64xf32>
    %1 = vector.multi_reduction <add>, %0, %cst [1] : vector<1x256x64xf32> to vector<1x64xf32>
    %2 = vector.shape_cast %1 : vector<1x64xf32> to vector<1x1x64xf32>
    %cst_2 = arith.constant 2.560000e+02 : f32
    %3 = vector.broadcast %cst_2 : f32 to vector<1x1x64xf32>
    %4 = arith.divf %2, %3 : vector<1x1x64xf32>
    %5 = vector.broadcast %4 : vector<1x1x64xf32> to vector<1x256x64xf32>
    %6 = arith.subf %0, %5 : vector<1x256x64xf32>
    %7 = arith.mulf %6, %6 : vector<1x256x64xf32>
    %cst_3 = arith.constant dense<0.000000e+00> : vector<1x64xf32>
    %8 = vector.multi_reduction <add>, %7, %cst_3 [1] : vector<1x256x64xf32> to vector<1x64xf32>
    %9 = vector.shape_cast %8 : vector<1x64xf32> to vector<1x1x64xf32>
    %cst_4 = arith.constant 2.560000e+02 : f32
    %10 = vector.broadcast %cst_4 : f32 to vector<1x1x64xf32>
    %11 = arith.divf %9, %10 : vector<1x1x64xf32>
    %cst_5 = arith.constant 9.99999974E-6 : f32
    %12 = vector.broadcast %cst_5 : f32 to vector<1x1x64xf32>
    %13 = arith.addf %11, %12 : vector<1x1x64xf32>
    %14 = math.rsqrt %13 : vector<1x1x64xf32>
    %15 = vector.broadcast %14 : vector<1x1x64xf32> to vector<1x256x64xf32>
    %16 = arith.mulf %6, %15 : vector<1x256x64xf32>
    %cst_6 = arith.constant 0.000000e+00 : f32
    %17 = vector.broadcast %cst_6 : f32 to vector<1x256x64xf32>
    %18 = arith.maximumf %16, %17 : vector<1x256x64xf32>
    %c0_7 = arith.constant 0 : index
    %c0_8 = arith.constant 0 : index
    %c0_9 = arith.constant 0 : index
    %19 = vector.load %arg3[%c0_7, %c0_8, %c0_9] : memref<1x256x64xf32, #tpu.memory_space<vmem>>, vector<1x256x64xf32>
    tpu.vector_store %arg3[%c0_7, %c0_8, %c0_9], %18 {strides = array<i32>} : memref<1x256x64xf32, #tpu.memory_space<vmem>>, vector<1x256x64xf32>,
    return
  }
  func.func @transform_0(%arg0: i32, %arg1: i32) -> (i32, i32, i32) {
    %c0_i32 = arith.constant 0 : i32
    %c0_i32_0 = arith.constant 0 : i32
    return %arg0, %c0_i32, %arg1 : i32, i32, i32
  }
  func.func @transform_1(%arg0: i32, %arg1: i32) -> (i32, i32, i32) {
    %c0_i32 = arith.constant 0 : i32
    %c0_i32_0 = arith.constant 0 : i32
    return %arg0, %c0_i32, %arg1 : i32, i32, i32
  }
}

module attributes {stable_mosaic.version = 11 : i64} {
  func.func @_matmul_bias_kernel(%arg0: i32, %arg1: i32, %arg2: i32, %arg3: memref<128x128xbf16, #tpu.memory_space<vmem>>, %arg4: memref<128x128xbf16, #tpu.memory_space<vmem>>, %arg5: memref<1x128xf32, #tpu.memory_space<vmem>>, %arg6: memref<128x128xf32, #tpu.memory_space<vmem>>) attributes {dimension_semantics = [#tpu.dimension_semantics<parallel>, #tpu.dimension_semantics<parallel>, #tpu.dimension_semantics<arbitrary>], iteration_bounds = array<i64: 1, 1, 5>, scalar_prefetch = 0 : i64, scratch_operands = 0 : i64, tpu.core_type = #tpu.core_type<tc>, window_params = [{transform_indices = @transform_0, window_bounds = array<i64: 128, 128>}, {transform_indices = @transform_1, window_bounds = array<i64: 128, 128>}, {transform_indices = @transform_2, window_bounds = array<i64: 1, 128>}, {transform_indices = @transform_3, window_bounds = array<i64: 128, 128>}]} {
    %c0_i32 = arith.constant 0 : i32
    %0 = arith.cmpi eq, %arg2, %c0_i32 : i32
    %1 = arith.extui %0 : i1 to i32
    %c0_i32_0 = arith.constant 0 : i32
    %2 = arith.cmpi ne, %1, %c0_i32_0 : i32
    scf.if %2 {
      %cst_9 = arith.constant 0.000000e+00 : f32
      %12 = vector.broadcast %cst_9 : f32 to vector<128x128xf32>
      %c0_10 = arith.constant 0 : index
      %c0_11 = arith.constant 0 : index
      %13 = vector.load %arg6[%c0_10, %c0_11] : memref<128x128xf32, #tpu.memory_space<vmem>>, vector<128x128xf32>
      tpu.vector_store %arg6[%c0_10, %c0_11], %12 {strides = array<i32>} : memref<128x128xf32, #tpu.memory_space<vmem>>, vector<128x128xf32>,
    } else {
    }
    %c0 = arith.constant 0 : index
    %c0_1 = arith.constant 0 : index
    %3 = vector.load %arg6[%c0, %c0_1] : memref<128x128xf32, #tpu.memory_space<vmem>>, vector<128x128xf32>
    %c0_2 = arith.constant 0 : index
    %c0_3 = arith.constant 0 : index
    %4 = vector.load %arg3[%c0_2, %c0_3] : memref<128x128xbf16, #tpu.memory_space<vmem>>, vector<128x128xbf16>
    %c0_4 = arith.constant 0 : index
    %c0_5 = arith.constant 0 : index
    %5 = vector.load %arg4[%c0_4, %c0_5] : memref<128x128xbf16, #tpu.memory_space<vmem>>, vector<128x128xbf16>
    %cst = arith.constant dense<0.000000e+00> : vector<128x128xf32>
    %6 = tpu.matmul %4, %5, %cst {dimension_numbers = #tpu.dot_dimension_numbers<[1], [0], [0], [1], [0, 0, 1, 1], [], []>} : vector<128x128xbf16>, vector<128x128xbf16>, vector<128x128xf32> -> vector<128x128xf32>
    %7 = arith.addf %3, %6 : vector<128x128xf32>
    %c0_6 = arith.constant 0 : index
    %c0_7 = arith.constant 0 : index
    %8 = vector.load %arg6[%c0_6, %c0_7] : memref<128x128xf32, #tpu.memory_space<vmem>>, vector<128x128xf32>
    tpu.vector_store %arg6[%c0_6, %c0_7], %7 {strides = array<i32>} : memref<128x128xf32, #tpu.memory_space<vmem>>, vector<128x128xf32>,
    %c4_i32 = arith.constant 4 : i32
    %9 = arith.cmpi eq, %arg2, %c4_i32 : i32
    %10 = arith.extui %9 : i1 to i32
    %c0_i32_8 = arith.constant 0 : i32
    %11 = arith.cmpi ne, %10, %c0_i32_8 : i32
    scf.if %11 {
      %c0_9 = arith.constant 0 : index
      %c0_10 = arith.constant 0 : index
      %12 = vector.load %arg6[%c0_9, %c0_10] : memref<128x128xf32, #tpu.memory_space<vmem>>, vector<128x128xf32>
      %c0_11 = arith.constant 0 : index
      %c0_12 = arith.constant 0 : index
      %13 = vector.load %arg5[%c0_11, %c0_12] : memref<1x128xf32, #tpu.memory_space<vmem>>, vector<1x128xf32>
      %14 = vector.broadcast %13 : vector<1x128xf32> to vector<128x128xf32>
      %15 = arith.addf %12, %14 : vector<128x128xf32>
      %c0_13 = arith.constant 0 : index
      %c0_14 = arith.constant 0 : index
      %16 = vector.load %arg6[%c0_13, %c0_14] : memref<128x128xf32, #tpu.memory_space<vmem>>, vector<128x128xf32>
      tpu.vector_store %arg6[%c0_13, %c0_14], %15 {strides = array<i32>} : memref<128x128xf32, #tpu.memory_space<vmem>>, vector<128x128xf32>,
    } else {
    }
    return
  }
  func.func @transform_0(%arg0: i32, %arg1: i32, %arg2: i32) -> (i32, i32) {
    %c0_i32 = arith.constant 0 : i32
    return %arg0, %arg2 : i32, i32
  }
  func.func @transform_1(%arg0: i32, %arg1: i32, %arg2: i32) -> (i32, i32) {
    %c0_i32 = arith.constant 0 : i32
    return %arg2, %arg1 : i32, i32
  }
  func.func @transform_2(%arg0: i32, %arg1: i32, %arg2: i32) -> (i32, i32) {
    %c0_i32 = arith.constant 0 : i32
    %c0_i32_0 = arith.constant 0 : i32
    return %c0_i32, %arg1 : i32, i32
  }
  func.func @transform_3(%arg0: i32, %arg1: i32, %arg2: i32) -> (i32, i32) {
    %c0_i32 = arith.constant 0 : i32
    return %arg0, %arg1 : i32, i32
  }
}

module attributes {stable_mosaic.version = 11 : i64} {
  func.func @_instnorm_kernel(%arg0: i32, %arg1: i32, %arg2: memref<1x64x128xf32, #tpu.memory_space<vmem>>, %arg3: memref<1x64x128xf32, #tpu.memory_space<vmem>>) attributes {dimension_semantics = [#tpu.dimension_semantics<parallel>, #tpu.dimension_semantics<parallel>], iteration_bounds = array<i64: 2, 1>, scalar_prefetch = 0 : i64, scratch_operands = 0 : i64, tpu.core_type = #tpu.core_type<tc>, window_params = [{transform_indices = @transform_0, window_bounds = array<i64: 1, 64, 128>}, {transform_indices = @transform_1, window_bounds = array<i64: 1, 64, 128>}]} {
    %c0 = arith.constant 0 : index
    %c0_0 = arith.constant 0 : index
    %c0_1 = arith.constant 0 : index
    %0 = vector.load %arg2[%c0, %c0_0, %c0_1] : memref<1x64x128xf32, #tpu.memory_space<vmem>>, vector<1x64x128xf32>
    %cst = arith.constant dense<0.000000e+00> : vector<1x128xf32>
    %1 = vector.multi_reduction <add>, %0, %cst [1] : vector<1x64x128xf32> to vector<1x128xf32>
    %2 = vector.shape_cast %1 : vector<1x128xf32> to vector<1x1x128xf32>
    %cst_2 = arith.constant 6.400000e+01 : f32
    %3 = vector.broadcast %cst_2 : f32 to vector<1x1x128xf32>
    %4 = arith.divf %2, %3 : vector<1x1x128xf32>
    %5 = vector.broadcast %4 : vector<1x1x128xf32> to vector<1x64x128xf32>
    %6 = arith.subf %0, %5 : vector<1x64x128xf32>
    %7 = arith.mulf %6, %6 : vector<1x64x128xf32>
    %cst_3 = arith.constant dense<0.000000e+00> : vector<1x128xf32>
    %8 = vector.multi_reduction <add>, %7, %cst_3 [1] : vector<1x64x128xf32> to vector<1x128xf32>
    %9 = vector.shape_cast %8 : vector<1x128xf32> to vector<1x1x128xf32>
    %cst_4 = arith.constant 6.400000e+01 : f32
    %10 = vector.broadcast %cst_4 : f32 to vector<1x1x128xf32>
    %11 = arith.divf %9, %10 : vector<1x1x128xf32>
    %cst_5 = arith.constant 9.99999974E-6 : f32
    %12 = vector.broadcast %cst_5 : f32 to vector<1x1x128xf32>
    %13 = arith.addf %11, %12 : vector<1x1x128xf32>
    %14 = math.rsqrt %13 : vector<1x1x128xf32>
    %15 = vector.broadcast %14 : vector<1x1x128xf32> to vector<1x64x128xf32>
    %16 = arith.mulf %6, %15 : vector<1x64x128xf32>
    %cst_6 = arith.constant 0.000000e+00 : f32
    %17 = vector.broadcast %cst_6 : f32 to vector<1x64x128xf32>
    %18 = arith.maximumf %16, %17 : vector<1x64x128xf32>
    %c0_7 = arith.constant 0 : index
    %c0_8 = arith.constant 0 : index
    %c0_9 = arith.constant 0 : index
    %19 = vector.load %arg3[%c0_7, %c0_8, %c0_9] : memref<1x64x128xf32, #tpu.memory_space<vmem>>, vector<1x64x128xf32>
    tpu.vector_store %arg3[%c0_7, %c0_8, %c0_9], %18 {strides = array<i32>} : memref<1x64x128xf32, #tpu.memory_space<vmem>>, vector<1x64x128xf32>,
    return
  }
  func.func @transform_0(%arg0: i32, %arg1: i32) -> (i32, i32, i32) {
    %c0_i32 = arith.constant 0 : i32
    %c0_i32_0 = arith.constant 0 : i32
    return %arg0, %c0_i32, %arg1 : i32, i32, i32
  }
  func.func @transform_1(%arg0: i32, %arg1: i32) -> (i32, i32, i32) {
    %c0_i32 = arith.constant 0 : i32
    %c0_i32_0 = arith.constant 0 : i32
    return %arg0, %c0_i32, %arg1 : i32, i32, i32
  }
}

module attributes {stable_mosaic.version = 11 : i64} {
  func.func @_matmul_bias_kernel(%arg0: i32, %arg1: i32, %arg2: i32, %arg3: memref<32x384xbf16, #tpu.memory_space<vmem>>, %arg4: memref<384x256xbf16, #tpu.memory_space<vmem>>, %arg5: memref<1x256xf32, #tpu.memory_space<vmem>>, %arg6: memref<32x256xf32, #tpu.memory_space<vmem>>) attributes {dimension_semantics = [#tpu.dimension_semantics<parallel>, #tpu.dimension_semantics<parallel>, #tpu.dimension_semantics<arbitrary>], iteration_bounds = array<i64: 1, 1, 3>, scalar_prefetch = 0 : i64, scratch_operands = 0 : i64, tpu.core_type = #tpu.core_type<tc>, window_params = [{transform_indices = @transform_0, window_bounds = array<i64: 32, 384>}, {transform_indices = @transform_1, window_bounds = array<i64: 384, 256>}, {transform_indices = @transform_2, window_bounds = array<i64: 1, 256>}, {transform_indices = @transform_3, window_bounds = array<i64: 32, 256>}]} {
    %c0_i32 = arith.constant 0 : i32
    %0 = arith.cmpi eq, %arg2, %c0_i32 : i32
    %1 = arith.extui %0 : i1 to i32
    %c0_i32_0 = arith.constant 0 : i32
    %2 = arith.cmpi ne, %1, %c0_i32_0 : i32
    scf.if %2 {
      %cst_9 = arith.constant 0.000000e+00 : f32
      %12 = vector.broadcast %cst_9 : f32 to vector<32x256xf32>
      %c0_10 = arith.constant 0 : index
      %c0_11 = arith.constant 0 : index
      %13 = vector.load %arg6[%c0_10, %c0_11] : memref<32x256xf32, #tpu.memory_space<vmem>>, vector<32x256xf32>
      tpu.vector_store %arg6[%c0_10, %c0_11], %12 {strides = array<i32>} : memref<32x256xf32, #tpu.memory_space<vmem>>, vector<32x256xf32>,
    } else {
    }
    %c0 = arith.constant 0 : index
    %c0_1 = arith.constant 0 : index
    %3 = vector.load %arg6[%c0, %c0_1] : memref<32x256xf32, #tpu.memory_space<vmem>>, vector<32x256xf32>
    %c0_2 = arith.constant 0 : index
    %c0_3 = arith.constant 0 : index
    %4 = vector.load %arg3[%c0_2, %c0_3] : memref<32x384xbf16, #tpu.memory_space<vmem>>, vector<32x384xbf16>
    %c0_4 = arith.constant 0 : index
    %c0_5 = arith.constant 0 : index
    %5 = vector.load %arg4[%c0_4, %c0_5] : memref<384x256xbf16, #tpu.memory_space<vmem>>, vector<384x256xbf16>
    %cst = arith.constant dense<0.000000e+00> : vector<32x256xf32>
    %6 = tpu.matmul %4, %5, %cst {dimension_numbers = #tpu.dot_dimension_numbers<[1], [0], [0], [1], [0, 0, 1, 1], [], []>} : vector<32x384xbf16>, vector<384x256xbf16>, vector<32x256xf32> -> vector<32x256xf32>
    %7 = arith.addf %3, %6 : vector<32x256xf32>
    %c0_6 = arith.constant 0 : index
    %c0_7 = arith.constant 0 : index
    %8 = vector.load %arg6[%c0_6, %c0_7] : memref<32x256xf32, #tpu.memory_space<vmem>>, vector<32x256xf32>
    tpu.vector_store %arg6[%c0_6, %c0_7], %7 {strides = array<i32>} : memref<32x256xf32, #tpu.memory_space<vmem>>, vector<32x256xf32>,
    %c2_i32 = arith.constant 2 : i32
    %9 = arith.cmpi eq, %arg2, %c2_i32 : i32
    %10 = arith.extui %9 : i1 to i32
    %c0_i32_8 = arith.constant 0 : i32
    %11 = arith.cmpi ne, %10, %c0_i32_8 : i32
    scf.if %11 {
      %c0_9 = arith.constant 0 : index
      %c0_10 = arith.constant 0 : index
      %12 = vector.load %arg6[%c0_9, %c0_10] : memref<32x256xf32, #tpu.memory_space<vmem>>, vector<32x256xf32>
      %c0_11 = arith.constant 0 : index
      %c0_12 = arith.constant 0 : index
      %13 = vector.load %arg5[%c0_11, %c0_12] : memref<1x256xf32, #tpu.memory_space<vmem>>, vector<1x256xf32>
      %14 = vector.broadcast %13 : vector<1x256xf32> to vector<32x256xf32>
      %15 = arith.addf %12, %14 : vector<32x256xf32>
      %c0_13 = arith.constant 0 : index
      %c0_14 = arith.constant 0 : index
      %16 = vector.load %arg6[%c0_13, %c0_14] : memref<32x256xf32, #tpu.memory_space<vmem>>, vector<32x256xf32>
      tpu.vector_store %arg6[%c0_13, %c0_14], %15 {strides = array<i32>} : memref<32x256xf32, #tpu.memory_space<vmem>>, vector<32x256xf32>,
    } else {
    }
    return
  }
  func.func @transform_0(%arg0: i32, %arg1: i32, %arg2: i32) -> (i32, i32) {
    %c0_i32 = arith.constant 0 : i32
    return %arg0, %arg2 : i32, i32
  }
  func.func @transform_1(%arg0: i32, %arg1: i32, %arg2: i32) -> (i32, i32) {
    %c0_i32 = arith.constant 0 : i32
    return %arg2, %arg1 : i32, i32
  }
  func.func @transform_2(%arg0: i32, %arg1: i32, %arg2: i32) -> (i32, i32) {
    %c0_i32 = arith.constant 0 : i32
    %c0_i32_0 = arith.constant 0 : i32
    return %c0_i32, %arg1 : i32, i32
  }
  func.func @transform_3(%arg0: i32, %arg1: i32, %arg2: i32) -> (i32, i32) {
    %c0_i32 = arith.constant 0 : i32
    return %arg0, %arg1 : i32, i32
  }
}

module attributes {stable_mosaic.version = 11 : i64} {
  func.func @_instnorm_kernel(%arg0: i32, %arg1: i32, %arg2: memref<1x16x128xf32, #tpu.memory_space<vmem>>, %arg3: memref<1x16x128xf32, #tpu.memory_space<vmem>>) attributes {dimension_semantics = [#tpu.dimension_semantics<parallel>, #tpu.dimension_semantics<parallel>], iteration_bounds = array<i64: 2, 2>, scalar_prefetch = 0 : i64, scratch_operands = 0 : i64, tpu.core_type = #tpu.core_type<tc>, window_params = [{transform_indices = @transform_0, window_bounds = array<i64: 1, 16, 128>}, {transform_indices = @transform_1, window_bounds = array<i64: 1, 16, 128>}]} {
    %c0 = arith.constant 0 : index
    %c0_0 = arith.constant 0 : index
    %c0_1 = arith.constant 0 : index
    %0 = vector.load %arg2[%c0, %c0_0, %c0_1] : memref<1x16x128xf32, #tpu.memory_space<vmem>>, vector<1x16x128xf32>
    %cst = arith.constant dense<0.000000e+00> : vector<1x128xf32>
    %1 = vector.multi_reduction <add>, %0, %cst [1] : vector<1x16x128xf32> to vector<1x128xf32>
    %2 = vector.shape_cast %1 : vector<1x128xf32> to vector<1x1x128xf32>
    %cst_2 = arith.constant 1.600000e+01 : f32
    %3 = vector.broadcast %cst_2 : f32 to vector<1x1x128xf32>
    %4 = arith.divf %2, %3 : vector<1x1x128xf32>
    %5 = vector.broadcast %4 : vector<1x1x128xf32> to vector<1x16x128xf32>
    %6 = arith.subf %0, %5 : vector<1x16x128xf32>
    %7 = arith.mulf %6, %6 : vector<1x16x128xf32>
    %cst_3 = arith.constant dense<0.000000e+00> : vector<1x128xf32>
    %8 = vector.multi_reduction <add>, %7, %cst_3 [1] : vector<1x16x128xf32> to vector<1x128xf32>
    %9 = vector.shape_cast %8 : vector<1x128xf32> to vector<1x1x128xf32>
    %cst_4 = arith.constant 1.600000e+01 : f32
    %10 = vector.broadcast %cst_4 : f32 to vector<1x1x128xf32>
    %11 = arith.divf %9, %10 : vector<1x1x128xf32>
    %cst_5 = arith.constant 9.99999974E-6 : f32
    %12 = vector.broadcast %cst_5 : f32 to vector<1x1x128xf32>
    %13 = arith.addf %11, %12 : vector<1x1x128xf32>
    %14 = math.rsqrt %13 : vector<1x1x128xf32>
    %15 = vector.broadcast %14 : vector<1x1x128xf32> to vector<1x16x128xf32>
    %16 = arith.mulf %6, %15 : vector<1x16x128xf32>
    %cst_6 = arith.constant 0.000000e+00 : f32
    %17 = vector.broadcast %cst_6 : f32 to vector<1x16x128xf32>
    %18 = arith.maximumf %16, %17 : vector<1x16x128xf32>
    %c0_7 = arith.constant 0 : index
    %c0_8 = arith.constant 0 : index
    %c0_9 = arith.constant 0 : index
    %19 = vector.load %arg3[%c0_7, %c0_8, %c0_9] : memref<1x16x128xf32, #tpu.memory_space<vmem>>, vector<1x16x128xf32>
    tpu.vector_store %arg3[%c0_7, %c0_8, %c0_9], %18 {strides = array<i32>} : memref<1x16x128xf32, #tpu.memory_space<vmem>>, vector<1x16x128xf32>,
    return
  }
  func.func @transform_0(%arg0: i32, %arg1: i32) -> (i32, i32, i32) {
    %c0_i32 = arith.constant 0 : i32
    %c0_i32_0 = arith.constant 0 : i32
    return %arg0, %c0_i32, %arg1 : i32, i32, i32
  }
  func.func @transform_1(%arg0: i32, %arg1: i32) -> (i32, i32, i32) {
    %c0_i32 = arith.constant 0 : i32
    %c0_i32_0 = arith.constant 0 : i32
    return %arg0, %c0_i32, %arg1 : i32, i32, i32
  }
}

module attributes {stable_mosaic.version = 11 : i64} {
  func.func @_matmul_bias_kernel(%arg0: i32, %arg1: i32, %arg2: i32, %arg3: memref<32x384xbf16, #tpu.memory_space<vmem>>, %arg4: memref<384x256xbf16, #tpu.memory_space<vmem>>, %arg5: memref<1x256xf32, #tpu.memory_space<vmem>>, %arg6: memref<32x256xf32, #tpu.memory_space<vmem>>) attributes {dimension_semantics = [#tpu.dimension_semantics<parallel>, #tpu.dimension_semantics<parallel>, #tpu.dimension_semantics<arbitrary>], iteration_bounds = array<i64: 1, 1, 6>, scalar_prefetch = 0 : i64, scratch_operands = 0 : i64, tpu.core_type = #tpu.core_type<tc>, window_params = [{transform_indices = @transform_0, window_bounds = array<i64: 32, 384>}, {transform_indices = @transform_1, window_bounds = array<i64: 384, 256>}, {transform_indices = @transform_2, window_bounds = array<i64: 1, 256>}, {transform_indices = @transform_3, window_bounds = array<i64: 32, 256>}]} {
    %c0_i32 = arith.constant 0 : i32
    %0 = arith.cmpi eq, %arg2, %c0_i32 : i32
    %1 = arith.extui %0 : i1 to i32
    %c0_i32_0 = arith.constant 0 : i32
    %2 = arith.cmpi ne, %1, %c0_i32_0 : i32
    scf.if %2 {
      %cst_9 = arith.constant 0.000000e+00 : f32
      %12 = vector.broadcast %cst_9 : f32 to vector<32x256xf32>
      %c0_10 = arith.constant 0 : index
      %c0_11 = arith.constant 0 : index
      %13 = vector.load %arg6[%c0_10, %c0_11] : memref<32x256xf32, #tpu.memory_space<vmem>>, vector<32x256xf32>
      tpu.vector_store %arg6[%c0_10, %c0_11], %12 {strides = array<i32>} : memref<32x256xf32, #tpu.memory_space<vmem>>, vector<32x256xf32>,
    } else {
    }
    %c0 = arith.constant 0 : index
    %c0_1 = arith.constant 0 : index
    %3 = vector.load %arg6[%c0, %c0_1] : memref<32x256xf32, #tpu.memory_space<vmem>>, vector<32x256xf32>
    %c0_2 = arith.constant 0 : index
    %c0_3 = arith.constant 0 : index
    %4 = vector.load %arg3[%c0_2, %c0_3] : memref<32x384xbf16, #tpu.memory_space<vmem>>, vector<32x384xbf16>
    %c0_4 = arith.constant 0 : index
    %c0_5 = arith.constant 0 : index
    %5 = vector.load %arg4[%c0_4, %c0_5] : memref<384x256xbf16, #tpu.memory_space<vmem>>, vector<384x256xbf16>
    %cst = arith.constant dense<0.000000e+00> : vector<32x256xf32>
    %6 = tpu.matmul %4, %5, %cst {dimension_numbers = #tpu.dot_dimension_numbers<[1], [0], [0], [1], [0, 0, 1, 1], [], []>} : vector<32x384xbf16>, vector<384x256xbf16>, vector<32x256xf32> -> vector<32x256xf32>
    %7 = arith.addf %3, %6 : vector<32x256xf32>
    %c0_6 = arith.constant 0 : index
    %c0_7 = arith.constant 0 : index
    %8 = vector.load %arg6[%c0_6, %c0_7] : memref<32x256xf32, #tpu.memory_space<vmem>>, vector<32x256xf32>
    tpu.vector_store %arg6[%c0_6, %c0_7], %7 {strides = array<i32>} : memref<32x256xf32, #tpu.memory_space<vmem>>, vector<32x256xf32>,
    %c5_i32 = arith.constant 5 : i32
    %9 = arith.cmpi eq, %arg2, %c5_i32 : i32
    %10 = arith.extui %9 : i1 to i32
    %c0_i32_8 = arith.constant 0 : i32
    %11 = arith.cmpi ne, %10, %c0_i32_8 : i32
    scf.if %11 {
      %c0_9 = arith.constant 0 : index
      %c0_10 = arith.constant 0 : index
      %12 = vector.load %arg6[%c0_9, %c0_10] : memref<32x256xf32, #tpu.memory_space<vmem>>, vector<32x256xf32>
      %c0_11 = arith.constant 0 : index
      %c0_12 = arith.constant 0 : index
      %13 = vector.load %arg5[%c0_11, %c0_12] : memref<1x256xf32, #tpu.memory_space<vmem>>, vector<1x256xf32>
      %14 = vector.broadcast %13 : vector<1x256xf32> to vector<32x256xf32>
      %15 = arith.addf %12, %14 : vector<32x256xf32>
      %c0_13 = arith.constant 0 : index
      %c0_14 = arith.constant 0 : index
      %16 = vector.load %arg6[%c0_13, %c0_14] : memref<32x256xf32, #tpu.memory_space<vmem>>, vector<32x256xf32>
      tpu.vector_store %arg6[%c0_13, %c0_14], %15 {strides = array<i32>} : memref<32x256xf32, #tpu.memory_space<vmem>>, vector<32x256xf32>,
    } else {
    }
    return
  }
  func.func @transform_0(%arg0: i32, %arg1: i32, %arg2: i32) -> (i32, i32) {
    %c0_i32 = arith.constant 0 : i32
    return %arg0, %arg2 : i32, i32
  }
  func.func @transform_1(%arg0: i32, %arg1: i32, %arg2: i32) -> (i32, i32) {
    %c0_i32 = arith.constant 0 : i32
    return %arg2, %arg1 : i32, i32
  }
  func.func @transform_2(%arg0: i32, %arg1: i32, %arg2: i32) -> (i32, i32) {
    %c0_i32 = arith.constant 0 : i32
    %c0_i32_0 = arith.constant 0 : i32
    return %c0_i32, %arg1 : i32, i32
  }
  func.func @transform_3(%arg0: i32, %arg1: i32, %arg2: i32) -> (i32, i32) {
    %c0_i32 = arith.constant 0 : i32
    return %arg0, %arg1 : i32, i32
  }
}

module attributes {stable_mosaic.version = 11 : i64} {
  func.func @_instnorm_kernel(%arg0: i32, %arg1: i32, %arg2: memref<1x16x128xf32, #tpu.memory_space<vmem>>, %arg3: memref<1x16x128xf32, #tpu.memory_space<vmem>>, %arg4: memref<1x16x128xf32, #tpu.memory_space<vmem>>) attributes {dimension_semantics = [#tpu.dimension_semantics<parallel>, #tpu.dimension_semantics<parallel>], iteration_bounds = array<i64: 2, 2>, scalar_prefetch = 0 : i64, scratch_operands = 0 : i64, tpu.core_type = #tpu.core_type<tc>, window_params = [{transform_indices = @transform_0, window_bounds = array<i64: 1, 16, 128>}, {transform_indices = @transform_1, window_bounds = array<i64: 1, 16, 128>}, {transform_indices = @transform_2, window_bounds = array<i64: 1, 16, 128>}]} {
    %c0 = arith.constant 0 : index
    %c0_0 = arith.constant 0 : index
    %c0_1 = arith.constant 0 : index
    %0 = vector.load %arg2[%c0, %c0_0, %c0_1] : memref<1x16x128xf32, #tpu.memory_space<vmem>>, vector<1x16x128xf32>
    %cst = arith.constant dense<0.000000e+00> : vector<1x128xf32>
    %1 = vector.multi_reduction <add>, %0, %cst [1] : vector<1x16x128xf32> to vector<1x128xf32>
    %2 = vector.shape_cast %1 : vector<1x128xf32> to vector<1x1x128xf32>
    %cst_2 = arith.constant 1.600000e+01 : f32
    %3 = vector.broadcast %cst_2 : f32 to vector<1x1x128xf32>
    %4 = arith.divf %2, %3 : vector<1x1x128xf32>
    %5 = vector.broadcast %4 : vector<1x1x128xf32> to vector<1x16x128xf32>
    %6 = arith.subf %0, %5 : vector<1x16x128xf32>
    %7 = arith.mulf %6, %6 : vector<1x16x128xf32>
    %cst_3 = arith.constant dense<0.000000e+00> : vector<1x128xf32>
    %8 = vector.multi_reduction <add>, %7, %cst_3 [1] : vector<1x16x128xf32> to vector<1x128xf32>
    %9 = vector.shape_cast %8 : vector<1x128xf32> to vector<1x1x128xf32>
    %cst_4 = arith.constant 1.600000e+01 : f32
    %10 = vector.broadcast %cst_4 : f32 to vector<1x1x128xf32>
    %11 = arith.divf %9, %10 : vector<1x1x128xf32>
    %cst_5 = arith.constant 9.99999974E-6 : f32
    %12 = vector.broadcast %cst_5 : f32 to vector<1x1x128xf32>
    %13 = arith.addf %11, %12 : vector<1x1x128xf32>
    %14 = math.rsqrt %13 : vector<1x1x128xf32>
    %15 = vector.broadcast %14 : vector<1x1x128xf32> to vector<1x16x128xf32>
    %16 = arith.mulf %6, %15 : vector<1x16x128xf32>
    %c0_6 = arith.constant 0 : index
    %c0_7 = arith.constant 0 : index
    %c0_8 = arith.constant 0 : index
    %17 = vector.load %arg3[%c0_6, %c0_7, %c0_8] : memref<1x16x128xf32, #tpu.memory_space<vmem>>, vector<1x16x128xf32>
    %18 = arith.addf %16, %17 : vector<1x16x128xf32>
    %c0_9 = arith.constant 0 : index
    %c0_10 = arith.constant 0 : index
    %c0_11 = arith.constant 0 : index
    %19 = vector.load %arg4[%c0_9, %c0_10, %c0_11] : memref<1x16x128xf32, #tpu.memory_space<vmem>>, vector<1x16x128xf32>
    tpu.vector_store %arg4[%c0_9, %c0_10, %c0_11], %18 {strides = array<i32>} : memref<1x16x128xf32, #tpu.memory_space<vmem>>, vector<1x16x128xf32>,
    return
  }
  func.func @transform_0(%arg0: i32, %arg1: i32) -> (i32, i32, i32) {
    %c0_i32 = arith.constant 0 : i32
    %c0_i32_0 = arith.constant 0 : i32
    return %arg0, %c0_i32, %arg1 : i32, i32, i32
  }
  func.func @transform_1(%arg0: i32, %arg1: i32) -> (i32, i32, i32) {
    %c0_i32 = arith.constant 0 : i32
    %c0_i32_0 = arith.constant 0 : i32
    return %arg0, %c0_i32, %arg1 : i32, i32, i32
  }
  func.func @transform_2(%arg0: i32, %arg1: i32) -> (i32, i32, i32) {
    %c0_i32 = arith.constant 0 : i32
    %c0_i32_0 = arith.constant 0 : i32
    return %arg0, %c0_i32, %arg1 : i32, i32, i32
  }
}

module attributes {stable_mosaic.version = 11 : i64} {
  func.func @_matmul_bias_kernel(%arg0: i32, %arg1: i32, %arg2: i32, %arg3: memref<32x512xbf16, #tpu.memory_space<vmem>>, %arg4: memref<512x256xbf16, #tpu.memory_space<vmem>>, %arg5: memref<1x256xf32, #tpu.memory_space<vmem>>, %arg6: memref<32x256xf32, #tpu.memory_space<vmem>>) attributes {dimension_semantics = [#tpu.dimension_semantics<parallel>, #tpu.dimension_semantics<parallel>, #tpu.dimension_semantics<arbitrary>], iteration_bounds = array<i64: 1, 2, 2>, scalar_prefetch = 0 : i64, scratch_operands = 0 : i64, tpu.core_type = #tpu.core_type<tc>, window_params = [{transform_indices = @transform_0, window_bounds = array<i64: 32, 512>}, {transform_indices = @transform_1, window_bounds = array<i64: 512, 256>}, {transform_indices = @transform_2, window_bounds = array<i64: 1, 256>}, {transform_indices = @transform_3, window_bounds = array<i64: 32, 256>}]} {
    %c0_i32 = arith.constant 0 : i32
    %0 = arith.cmpi eq, %arg2, %c0_i32 : i32
    %1 = arith.extui %0 : i1 to i32
    %c0_i32_0 = arith.constant 0 : i32
    %2 = arith.cmpi ne, %1, %c0_i32_0 : i32
    scf.if %2 {
      %cst_9 = arith.constant 0.000000e+00 : f32
      %12 = vector.broadcast %cst_9 : f32 to vector<32x256xf32>
      %c0_10 = arith.constant 0 : index
      %c0_11 = arith.constant 0 : index
      %13 = vector.load %arg6[%c0_10, %c0_11] : memref<32x256xf32, #tpu.memory_space<vmem>>, vector<32x256xf32>
      tpu.vector_store %arg6[%c0_10, %c0_11], %12 {strides = array<i32>} : memref<32x256xf32, #tpu.memory_space<vmem>>, vector<32x256xf32>,
    } else {
    }
    %c0 = arith.constant 0 : index
    %c0_1 = arith.constant 0 : index
    %3 = vector.load %arg6[%c0, %c0_1] : memref<32x256xf32, #tpu.memory_space<vmem>>, vector<32x256xf32>
    %c0_2 = arith.constant 0 : index
    %c0_3 = arith.constant 0 : index
    %4 = vector.load %arg3[%c0_2, %c0_3] : memref<32x512xbf16, #tpu.memory_space<vmem>>, vector<32x512xbf16>
    %c0_4 = arith.constant 0 : index
    %c0_5 = arith.constant 0 : index
    %5 = vector.load %arg4[%c0_4, %c0_5] : memref<512x256xbf16, #tpu.memory_space<vmem>>, vector<512x256xbf16>
    %cst = arith.constant dense<0.000000e+00> : vector<32x256xf32>
    %6 = tpu.matmul %4, %5, %cst {dimension_numbers = #tpu.dot_dimension_numbers<[1], [0], [0], [1], [0, 0, 1, 1], [], []>} : vector<32x512xbf16>, vector<512x256xbf16>, vector<32x256xf32> -> vector<32x256xf32>
    %7 = arith.addf %3, %6 : vector<32x256xf32>
    %c0_6 = arith.constant 0 : index
    %c0_7 = arith.constant 0 : index
    %8 = vector.load %arg6[%c0_6, %c0_7] : memref<32x256xf32, #tpu.memory_space<vmem>>, vector<32x256xf32>
    tpu.vector_store %arg6[%c0_6, %c0_7], %7 {strides = array<i32>} : memref<32x256xf32, #tpu.memory_space<vmem>>, vector<32x256xf32>,
    %c1_i32 = arith.constant 1 : i32
    %9 = arith.cmpi eq, %arg2, %c1_i32 : i32
    %10 = arith.extui %9 : i1 to i32
    %c0_i32_8 = arith.constant 0 : i32
    %11 = arith.cmpi ne, %10, %c0_i32_8 : i32
    scf.if %11 {
      %c0_9 = arith.constant 0 : index
      %c0_10 = arith.constant 0 : index
      %12 = vector.load %arg6[%c0_9, %c0_10] : memref<32x256xf32, #tpu.memory_space<vmem>>, vector<32x256xf32>
      %c0_11 = arith.constant 0 : index
      %c0_12 = arith.constant 0 : index
      %13 = vector.load %arg5[%c0_11, %c0_12] : memref<1x256xf32, #tpu.memory_space<vmem>>, vector<1x256xf32>
      %14 = vector.broadcast %13 : vector<1x256xf32> to vector<32x256xf32>
      %15 = arith.addf %12, %14 : vector<32x256xf32>
      %c0_13 = arith.constant 0 : index
      %c0_14 = arith.constant 0 : index
      %16 = vector.load %arg6[%c0_13, %c0_14] : memref<32x256xf32, #tpu.memory_space<vmem>>, vector<32x256xf32>
      tpu.vector_store %arg6[%c0_13, %c0_14], %15 {strides = array<i32>} : memref<32x256xf32, #tpu.memory_space<vmem>>, vector<32x256xf32>,
    } else {
    }
    return
  }
  func.func @transform_0(%arg0: i32, %arg1: i32, %arg2: i32) -> (i32, i32) {
    %c0_i32 = arith.constant 0 : i32
    return %arg0, %arg2 : i32, i32
  }
  func.func @transform_1(%arg0: i32, %arg1: i32, %arg2: i32) -> (i32, i32) {
    %c0_i32 = arith.constant 0 : i32
    return %arg2, %arg1 : i32, i32
  }
  func.func @transform_2(%arg0: i32, %arg1: i32, %arg2: i32) -> (i32, i32) {
    %c0_i32 = arith.constant 0 : i32
    %c0_i32_0 = arith.constant 0 : i32
    return %c0_i32, %arg1 : i32, i32
  }
  func.func @transform_3(%arg0: i32, %arg1: i32, %arg2: i32) -> (i32, i32) {
    %c0_i32 = arith.constant 0 : i32
    return %arg0, %arg1 : i32, i32
  }
}

module attributes {stable_mosaic.version = 11 : i64} {
  func.func @_matmul_bias_kernel(%arg0: i32, %arg1: i32, %arg2: i32, %arg3: memref<128x512xbf16, #tpu.memory_space<vmem>>, %arg4: memref<512x256xbf16, #tpu.memory_space<vmem>>, %arg5: memref<1x256xf32, #tpu.memory_space<vmem>>, %arg6: memref<128x256xf32, #tpu.memory_space<vmem>>) attributes {dimension_semantics = [#tpu.dimension_semantics<parallel>, #tpu.dimension_semantics<parallel>, #tpu.dimension_semantics<arbitrary>], iteration_bounds = array<i64: 1, 1, 1>, scalar_prefetch = 0 : i64, scratch_operands = 0 : i64, tpu.core_type = #tpu.core_type<tc>, window_params = [{transform_indices = @transform_0, window_bounds = array<i64: 128, 512>}, {transform_indices = @transform_1, window_bounds = array<i64: 512, 256>}, {transform_indices = @transform_2, window_bounds = array<i64: 1, 256>}, {transform_indices = @transform_3, window_bounds = array<i64: 128, 256>}]} {
    %c0_i32 = arith.constant 0 : i32
    %0 = arith.cmpi eq, %arg2, %c0_i32 : i32
    %1 = arith.extui %0 : i1 to i32
    %c0_i32_0 = arith.constant 0 : i32
    %2 = arith.cmpi ne, %1, %c0_i32_0 : i32
    scf.if %2 {
      %cst_10 = arith.constant 0.000000e+00 : f32
      %12 = vector.broadcast %cst_10 : f32 to vector<128x256xf32>
      %c0_11 = arith.constant 0 : index
      %c0_12 = arith.constant 0 : index
      %13 = vector.load %arg6[%c0_11, %c0_12] : memref<128x256xf32, #tpu.memory_space<vmem>>, vector<128x256xf32>
      tpu.vector_store %arg6[%c0_11, %c0_12], %12 {strides = array<i32>} : memref<128x256xf32, #tpu.memory_space<vmem>>, vector<128x256xf32>,
    } else {
    }
    %c0 = arith.constant 0 : index
    %c0_1 = arith.constant 0 : index
    %3 = vector.load %arg6[%c0, %c0_1] : memref<128x256xf32, #tpu.memory_space<vmem>>, vector<128x256xf32>
    %c0_2 = arith.constant 0 : index
    %c0_3 = arith.constant 0 : index
    %4 = vector.load %arg3[%c0_2, %c0_3] : memref<128x512xbf16, #tpu.memory_space<vmem>>, vector<128x512xbf16>
    %c0_4 = arith.constant 0 : index
    %c0_5 = arith.constant 0 : index
    %5 = vector.load %arg4[%c0_4, %c0_5] : memref<512x256xbf16, #tpu.memory_space<vmem>>, vector<512x256xbf16>
    %cst = arith.constant dense<0.000000e+00> : vector<128x256xf32>
    %6 = tpu.matmul %4, %5, %cst {dimension_numbers = #tpu.dot_dimension_numbers<[1], [0], [0], [1], [0, 0, 1, 1], [], []>} : vector<128x512xbf16>, vector<512x256xbf16>, vector<128x256xf32> -> vector<128x256xf32>
    %7 = arith.addf %3, %6 : vector<128x256xf32>
    %c0_6 = arith.constant 0 : index
    %c0_7 = arith.constant 0 : index
    %8 = vector.load %arg6[%c0_6, %c0_7] : memref<128x256xf32, #tpu.memory_space<vmem>>, vector<128x256xf32>
    tpu.vector_store %arg6[%c0_6, %c0_7], %7 {strides = array<i32>} : memref<128x256xf32, #tpu.memory_space<vmem>>, vector<128x256xf32>,
    %c0_i32_8 = arith.constant 0 : i32
    %9 = arith.cmpi eq, %arg2, %c0_i32_8 : i32
    %10 = arith.extui %9 : i1 to i32
    %c0_i32_9 = arith.constant 0 : i32
    %11 = arith.cmpi ne, %10, %c0_i32_9 : i32
    scf.if %11 {
      %c0_10 = arith.constant 0 : index
      %c0_11 = arith.constant 0 : index
      %12 = vector.load %arg6[%c0_10, %c0_11] : memref<128x256xf32, #tpu.memory_space<vmem>>, vector<128x256xf32>
      %c0_12 = arith.constant 0 : index
      %c0_13 = arith.constant 0 : index
      %13 = vector.load %arg5[%c0_12, %c0_13] : memref<1x256xf32, #tpu.memory_space<vmem>>, vector<1x256xf32>
      %14 = vector.broadcast %13 : vector<1x256xf32> to vector<128x256xf32>
      %15 = arith.addf %12, %14 : vector<128x256xf32>
      %c0_14 = arith.constant 0 : index
      %c0_15 = arith.constant 0 : index
      %16 = vector.load %arg6[%c0_14, %c0_15] : memref<128x256xf32, #tpu.memory_space<vmem>>, vector<128x256xf32>
      tpu.vector_store %arg6[%c0_14, %c0_15], %15 {strides = array<i32>} : memref<128x256xf32, #tpu.memory_space<vmem>>, vector<128x256xf32>,
    } else {
    }
    return
  }
  func.func @transform_0(%arg0: i32, %arg1: i32, %arg2: i32) -> (i32, i32) {
    %c0_i32 = arith.constant 0 : i32
    return %arg0, %arg2 : i32, i32
  }
  func.func @transform_1(%arg0: i32, %arg1: i32, %arg2: i32) -> (i32, i32) {
    %c0_i32 = arith.constant 0 : i32
    return %arg2, %arg1 : i32, i32
  }
  func.func @transform_2(%arg0: i32, %arg1: i32, %arg2: i32) -> (i32, i32) {
    %c0_i32 = arith.constant 0 : i32
    %c0_i32_0 = arith.constant 0 : i32
    return %c0_i32, %arg1 : i32, i32
  }
  func.func @transform_3(%arg0: i32, %arg1: i32, %arg2: i32) -> (i32, i32) {
    %c0_i32 = arith.constant 0 : i32
    return %arg0, %arg1 : i32, i32
  }
}

module attributes {stable_mosaic.version = 11 : i64} {
  func.func @_matmul_bias_kernel(%arg0: i32, %arg1: i32, %arg2: i32, %arg3: memref<256x128xbf16, #tpu.memory_space<vmem>>, %arg4: memref<128x128xbf16, #tpu.memory_space<vmem>>, %arg5: memref<1x128xf32, #tpu.memory_space<vmem>>, %arg6: memref<256x128xf32, #tpu.memory_space<vmem>>) attributes {dimension_semantics = [#tpu.dimension_semantics<parallel>, #tpu.dimension_semantics<parallel>, #tpu.dimension_semantics<arbitrary>], iteration_bounds = array<i64: 2, 1, 25>, scalar_prefetch = 0 : i64, scratch_operands = 0 : i64, tpu.core_type = #tpu.core_type<tc>, window_params = [{transform_indices = @transform_0, window_bounds = array<i64: 256, 128>}, {transform_indices = @transform_1, window_bounds = array<i64: 128, 128>}, {transform_indices = @transform_2, window_bounds = array<i64: 1, 128>}, {transform_indices = @transform_3, window_bounds = array<i64: 256, 128>}]} {
    %c0_i32 = arith.constant 0 : i32
    %0 = arith.cmpi eq, %arg2, %c0_i32 : i32
    %1 = arith.extui %0 : i1 to i32
    %c0_i32_0 = arith.constant 0 : i32
    %2 = arith.cmpi ne, %1, %c0_i32_0 : i32
    scf.if %2 {
      %cst_9 = arith.constant 0.000000e+00 : f32
      %12 = vector.broadcast %cst_9 : f32 to vector<256x128xf32>
      %c0_10 = arith.constant 0 : index
      %c0_11 = arith.constant 0 : index
      %13 = vector.load %arg6[%c0_10, %c0_11] : memref<256x128xf32, #tpu.memory_space<vmem>>, vector<256x128xf32>
      tpu.vector_store %arg6[%c0_10, %c0_11], %12 {strides = array<i32>} : memref<256x128xf32, #tpu.memory_space<vmem>>, vector<256x128xf32>,
    } else {
    }
    %c0 = arith.constant 0 : index
    %c0_1 = arith.constant 0 : index
    %3 = vector.load %arg6[%c0, %c0_1] : memref<256x128xf32, #tpu.memory_space<vmem>>, vector<256x128xf32>
    %c0_2 = arith.constant 0 : index
    %c0_3 = arith.constant 0 : index
    %4 = vector.load %arg3[%c0_2, %c0_3] : memref<256x128xbf16, #tpu.memory_space<vmem>>, vector<256x128xbf16>
    %c0_4 = arith.constant 0 : index
    %c0_5 = arith.constant 0 : index
    %5 = vector.load %arg4[%c0_4, %c0_5] : memref<128x128xbf16, #tpu.memory_space<vmem>>, vector<128x128xbf16>
    %cst = arith.constant dense<0.000000e+00> : vector<256x128xf32>
    %6 = tpu.matmul %4, %5, %cst {dimension_numbers = #tpu.dot_dimension_numbers<[1], [0], [0], [1], [0, 0, 1, 1], [], []>} : vector<256x128xbf16>, vector<128x128xbf16>, vector<256x128xf32> -> vector<256x128xf32>
    %7 = arith.addf %3, %6 : vector<256x128xf32>
    %c0_6 = arith.constant 0 : index
    %c0_7 = arith.constant 0 : index
    %8 = vector.load %arg6[%c0_6, %c0_7] : memref<256x128xf32, #tpu.memory_space<vmem>>, vector<256x128xf32>
    tpu.vector_store %arg6[%c0_6, %c0_7], %7 {strides = array<i32>} : memref<256x128xf32, #tpu.memory_space<vmem>>, vector<256x128xf32>,
    %c24_i32 = arith.constant 24 : i32
    %9 = arith.cmpi eq, %arg2, %c24_i32 : i32
    %10 = arith.extui %9 : i1 to i32
    %c0_i32_8 = arith.constant 0 : i32
    %11 = arith.cmpi ne, %10, %c0_i32_8 : i32
    scf.if %11 {
      %c0_9 = arith.constant 0 : index
      %c0_10 = arith.constant 0 : index
      %12 = vector.load %arg6[%c0_9, %c0_10] : memref<256x128xf32, #tpu.memory_space<vmem>>, vector<256x128xf32>
      %c0_11 = arith.constant 0 : index
      %c0_12 = arith.constant 0 : index
      %13 = vector.load %arg5[%c0_11, %c0_12] : memref<1x128xf32, #tpu.memory_space<vmem>>, vector<1x128xf32>
      %14 = vector.broadcast %13 : vector<1x128xf32> to vector<256x128xf32>
      %15 = arith.addf %12, %14 : vector<256x128xf32>
      %16 = math.tanh %15 : vector<256x128xf32>
      %c0_13 = arith.constant 0 : index
      %c0_14 = arith.constant 0 : index
      %17 = vector.load %arg6[%c0_13, %c0_14] : memref<256x128xf32, #tpu.memory_space<vmem>>, vector<256x128xf32>
      tpu.vector_store %arg6[%c0_13, %c0_14], %16 {strides = array<i32>} : memref<256x128xf32, #tpu.memory_space<vmem>>, vector<256x128xf32>,
    } else {
    }
    return
  }
  func.func @transform_0(%arg0: i32, %arg1: i32, %arg2: i32) -> (i32, i32) {
    %c0_i32 = arith.constant 0 : i32
    return %arg0, %arg2 : i32, i32
  }
  func.func @transform_1(%arg0: i32, %arg1: i32, %arg2: i32) -> (i32, i32) {
    %c0_i32 = arith.constant 0 : i32
    return %arg2, %arg1 : i32, i32
  }
  func.func @transform_2(%arg0: i32, %arg1: i32, %arg2: i32) -> (i32, i32) {
    %c0_i32 = arith.constant 0 : i32
    %c0_i32_0 = arith.constant 0 : i32
    return %c0_i32, %arg1 : i32, i32
  }
  func.func @transform_3(%arg0: i32, %arg1: i32, %arg2: i32) -> (i32, i32) {
    %c0_i32 = arith.constant 0 : i32
    return %arg0, %arg1 : i32, i32
  }
}

</mosaic_0001>

<bundles_post_ra>
// kernel: generator_forward.20
= control target key start
LH: loop header
LB: loop body
LE: loop exit
PB: predicated region body
PF: predicated region fallthrough
CT: control target
= control target key end

     0   :  { %s640_s6 = smov 0   ;;  %s642_s7 = smov 0   ;;  %s1200_s0 = inlined_call_operand.vmem [shape: f32[2,256,64], index: 0, kind: input, shape index: {}]   ;;  %s1201_s1 = inlined_call_operand.vmem [shape: f32[2,256,64], index: 1, kind: output, shape index: {}]  }
   0x1   :  { %s644_s8 = smov 0  }
   0x2 LB: > { %s23_s9 = sadd.s32 1, %s624_s7  ;;  %p571_p0 = scmp.ge.s32.totalorder %s628_s8, 1  ;;  %s628_s8 = sphi %s644_s8, %s11_s8   ;;  %s624_s7 = sphi %s642_s7, %s1203_s7   ;;  %s620_s6 = sphi %s640_s6, %s1202_s6  }
   0x3   : > { %p25_p1 = scmp.ge.s32.totalorder %s23_s9, 2  ;;  %p106_p2 = scmp.lt.s32.totalorder %s628_s8, 3 }
   0x5   : > { %s1205_s9 = smov (%p25_p1, %s23_s9), 0  ;;  %p107_p3 = pnand %p571_p0, %p106_p2 }
   0x6   : > { %p132_p4 = scmp.lt.s32.totalorder (!%p107_p3), %s620_s6, 1 }
   0x7   : > { %110 = sbr.rel (%p107_p3) target bundleno = 211 (0xd3), region = 24 }
   0xc   : > { %s1207_s6 = smov (!%p132_p4, %s620_s6), 1  ;;  %vm180_vm0 = vcmask 523264  }
   0xd   : > { %s578_s10 = sshll.u32 %s1207_s6, 8 }
   0xe   : > { %s666_s13 = scalar_lea.vmem %s1200_s0, %s578_s10  ;;  %s1069_s16 = scalar_lea.vmem %s1201_s1, %s578_s10 }
   0xf   : > { %v669_v0 = vld [vmem:[%s666_s13] sm:$0xff]  ;;  %v672_v1 = vld [vmem:[%s666_s13 + $0x8] sm:$0xff]  ;;  %v675_v2 = vld [vmem:[%s666_s13 + $0x10] sm:$0xff] }
  0x10   : > { %v678_v3 = vld [vmem:[%s666_s13 + $0x18] sm:$0xff]  ;;  %v181_v4 = vsel %vm180_vm0, %v669_v0, 0.0  ;;  %v182_v5 = vsel %vm180_vm0, %v672_v1, 0.0  ;;  %v184_v6 = vsel %vm180_vm0, %v675_v2, 0.0  ;;  %v687_v7 = vld [vmem:[%s666_s13 + $0x20] sm:$0xff]  ;;  %v692_v10 = vld [vmem:[%s666_s13 + $0x28] sm:$0xff] }
  0x11   : > { %v183_v8 = vadd.f32 %v182_v5, %v181_v4  ;;  %v186_v9 = vsel %vm180_vm0, %v678_v3, 0.0  ;;  %v188_v12 = vsel %vm180_vm0, %v687_v7, 0.0  ;;  %v697_v13 = vld [vmem:[%s666_s13 + $0x30] sm:$0xff]  ;;  %v190_v15 = vsel %vm180_vm0, %v692_v10, 0.0  ;;  %v702_v16 = vld [vmem:[%s666_s13 + $0x38] sm:$0xff]  ;;  %v707_v19 = vld [vmem:[%s666_s13 + $0x40] sm:$0xff] }
  0x12   : > { %v192_v18 = vsel %vm180_vm0, %v697_v13, 0.0  ;;  %v194_v21 = vsel %vm180_vm0, %v702_v16, 0.0  ;;  %v712_v22 = vld [vmem:[%s666_s13 + $0x48] sm:$0xff]  ;;  %v196_v24 = vsel %vm180_vm0, %v707_v19, 0.0  ;;  %v717_v25 = vld [vmem:[%s666_s13 + $0x50] sm:$0xff]  ;;  %v722_v28 = vld [vmem:[%s666_s13 + $0x58] sm:$0xff] }
  0x13   : > { %v185_v11 = vadd.f32 %v184_v6, %v183_v8  ;;  %v198_v27 = vsel %vm180_vm0, %v712_v22, 0.0  ;;  %v200_v30 = vsel %vm180_vm0, %v717_v25, 0.0  ;;  %v727_v31 = vld [vmem:[%s666_s13 + $0x60] sm:$0xff]  ;;  %v202_v33 = vsel %vm180_vm0, %v722_v28, 0.0  ;;  %v732_v34 = vld [vmem:[%s666_s13 + $0x68] sm:$0xff]  ;;  %v737_v37 = vld [vmem:[%s666_s13 + $0x70] sm:$0xff] }
  0x14   : > { %v204_v36 = vsel %vm180_vm0, %v727_v31, 0.0  ;;  %v206_v39 = vsel %vm180_vm0, %v732_v34, 0.0  ;;  %v742_v40 = vld [vmem:[%s666_s13 + $0x78] sm:$0xff]  ;;  %v208_v42 = vsel %vm180_vm0, %v737_v37, 0.0  ;;  %v747_v43 = vld [vmem:[%s666_s13 + $0x80] sm:$0xff]  ;;  %v752_v46 = vld [vmem:[%s666_s13 + $0x88] sm:$0xff] }
  0x15   : > { %v187_v14 = vadd.f32 %v186_v9, %v185_v11  ;;  %v210_v45 = vsel %vm180_vm0, %v742_v40, 0.0  ;;  %v212_v48 = vsel %vm180_vm0, %v747_v43, 0.0  ;;  %v757_v49 = vld [vmem:[%s666_s13 + $0x90] sm:$0xff]  ;;  %v214_v51 = vsel %vm180_vm0, %v752_v46, 0.0  ;;  %v762_v52 = vld [vmem:[%s666_s13 + $0x98] sm:$0xff]  ;;  %v767_v55 = vld [vmem:[%s666_s13 + $0xa0] sm:$0xff] }
  0x16   : > { %v216_v54 = vsel %vm180_vm0, %v757_v49, 0.0  ;;  %v218_v57 = vsel %vm180_vm0, %v762_v52, 0.0  ;;  %v772_v58 = vld [vmem:[%s666_s13 + $0xa8] sm:$0xff]  ;;  %v220_v60 = vsel %vm180_vm0, %v767_v55, 0.0  ;;  %v777_v61 = vld [vmem:[%s666_s13 + $0xb0] sm:$0xff]  ;;  %v782_v4 = vld [vmem:[%s666_s13 + $0xb8] sm:$0xff] }
  0x17   : > { %v189_v17 = vadd.f32 %v188_v12, %v187_v14  ;;  %v222_v63 = vsel %vm180_vm0, %v772_v58, 0.0  ;;  %v224_v6 = vsel %vm180_vm0, %v777_v61, 0.0  ;;  %v787_v8 = vld [vmem:[%s666_s13 + $0xc0] sm:$0xff]  ;;  %v226_v11 = vsel %vm180_vm0, %v782_v4, 0.0  ;;  %v792_v12 = vld [vmem:[%s666_s13 + $0xc8] sm:$0xff] }
  0x19   : > { %v191_v20 = vadd.f32 %v190_v15, %v189_v17  ;;  %v228_v15 = vsel %vm180_vm0, %v787_v8, 0.0  ;;  %v797_v17 = vld [vmem:[%s666_s13 + $0xd0] sm:$0xff] }
  0x1b   : > { %v193_v23 = vadd.f32 %v192_v18, %v191_v20  ;;  %v230_v20 = vsel %vm180_vm0, %v792_v12, 0.0 }
  0x1d   : > { %v195_v26 = vadd.f32 %v194_v21, %v193_v23  ;;  %v802_v21 = vld [vmem:[%s666_s13 + $0xd8] sm:$0xff] }
  0x1f   : > { %v197_v29 = vadd.f32 %v196_v24, %v195_v26  ;;  %v232_v24 = vsel %vm180_vm0, %v797_v17, 0.0  ;;  %v807_v26 = vld [vmem:[%s666_s13 + $0xe0] sm:$0xff] }
  0x21   : > { %v199_v32 = vadd.f32 %v198_v27, %v197_v29  ;;  %v234_v29 = vsel %vm180_vm0, %v802_v21, 0.0 }
  0x23   : > { %v201_v35 = vadd.f32 %v200_v30, %v199_v32  ;;  %v812_v30 = vld [vmem:[%s666_s13 + $0xe8] sm:$0xff] }
  0x25   : > { %v203_v38 = vadd.f32 %v202_v33, %v201_v35  ;;  %v236_v33 = vsel %vm180_vm0, %v807_v26, 0.0  ;;  %v817_v35 = vld [vmem:[%s666_s13 + $0xf0] sm:$0xff] }
  0x27   : > { %v205_v41 = vadd.f32 %v204_v36, %v203_v38  ;;  %v238_v38 = vsel %vm180_vm0, %v812_v30, 0.0 }
  0x29   : > { %v207_v44 = vadd.f32 %v206_v39, %v205_v41  ;;  %v822_v39 = vld [vmem:[%s666_s13 + $0xf8] sm:$0xff] }
  0x2b   : > { %v209_v47 = vadd.f32 %v208_v42, %v207_v44  ;;  %v240_v42 = vsel %vm180_vm0, %v817_v35, 0.0 }
  0x2d   : > { %v211_v50 = vadd.f32 %v210_v45, %v209_v47  ;;  %v242_v45 = vsel %vm180_vm0, %v822_v39, 0.0 }
  0x2f   : > { %v213_v53 = vadd.f32 %v212_v48, %v211_v50 }
  0x31   : > { %v215_v56 = vadd.f32 %v214_v51, %v213_v53 }
  0x33   : > { %v217_v59 = vadd.f32 %v216_v54, %v215_v56 }
  0x35   : > { %v219_v62 = vadd.f32 %v218_v57, %v217_v59 }
  0x37   : > { %v221_v5 = vadd.f32 %v220_v60, %v219_v62 }
  0x39   : > { %v223_v9 = vadd.f32 %v222_v63, %v221_v5 }
  0x3b   : > { %v225_v14 = vadd.f32 %v224_v6, %v223_v9 }
  0x3d   : > { %v227_v18 = vadd.f32 %v226_v11, %v225_v14 }
  0x3f   : > { %v229_v23 = vadd.f32 %v228_v15, %v227_v18 }
  0x41   : > { %v231_v27 = vadd.f32 %v230_v20, %v229_v23 }
  0x43   : > { %v233_v32 = vadd.f32 %v232_v24, %v231_v27 }
  0x45   : > { %v235_v36 = vadd.f32 %v234_v29, %v233_v32 }
  0x47   : > { %v237_v41 = vadd.f32 %v236_v33, %v235_v36 }
  0x49   : > { %v239_v44 = vadd.f32 %v238_v38, %v237_v41 }
  0x4b   : > { %v241_v47 = vadd.f32 %v240_v42, %v239_v44 }
  0x4d   : > { %v243_v48 = vadd.f32 %v242_v45, %v241_v47 }
  0x4f   : > { %v244_v50 = vrot.slane %v243_v48, 4 }
  0x51   : > { %v245_v51 = vadd.f32 %v244_v50, %v243_v48 }
  0x53   : > { %v246_v53 = vrot.slane %v245_v51, 2 }
  0x55   : > { %v247_v54 = vadd.f32 %v246_v53, %v245_v51 }
  0x57   : > { %v248_v56 = vrot.slane %v247_v54, 1 }
  0x59   : > { %v249_v57 = vadd.f32 %v248_v56, %v247_v54 }
  0x5b   : > { %v828_v59 = vmul.f32 0.00390625, %v249_v57 }
  0x5d   : > { %v832_v60 = vsub.f32 %v669_v0, %v828_v59  ;;  %v836_v62 = vsub.f32 %v672_v1, %v828_v59  ;;  %v840_v63 = vsub.f32 %v675_v2, %v828_v59  ;;  %v844_v5 = vsub.f32 %v678_v3, %v828_v59 }
  0x5e   : > { %v848_v6 = vsub.f32 %v687_v7, %v828_v59  ;;  %v858_v2 = vsub.f32 %v692_v10, %v828_v59  ;;  %v864_v7 = vsub.f32 %v697_v13, %v828_v59  ;;  %v873_v10 = vsub.f32 %v702_v16, %v828_v59 }
  0x5f   : > { %v284_v0 = vmul.f32 %v832_v60, %v832_v60  ;;  %v285_v9 = vmul.f32 %v836_v62, %v836_v62  ;;  %v286_v1 = vmul.f32 %v840_v63, %v840_v63  ;;  %v287_v3 = vmul.f32 %v844_v5, %v844_v5 }
  0x60   : > { %v288_v11 = vmul.f32 %v848_v6, %v848_v6  ;;  %v289_v23 = vmul.f32 %v858_v2, %v858_v2  ;;  %v880_v27 = vsub.f32 %v707_v19, %v828_v59  ;;  %v290_v29 = vmul.f32 %v864_v7, %v864_v7 }
  0x61   : > { %v316_v14 = vsel %vm180_vm0, %v284_v0, 0.0  ;;  %v317_v15 = vsel %vm180_vm0, %v285_v9, 0.0  ;;  %v319_v18 = vsel %vm180_vm0, %v286_v1, 0.0  ;;  %v321_v13 = vsel %vm180_vm0, %v287_v3, 0.0 }
  0x62   : > { %v318_v20 = vadd.f32 %v317_v15, %v316_v14  ;;  %v323_v32 = vsel %vm180_vm0, %v288_v11, 0.0  ;;  %v887_v16 = vsub.f32 %v712_v22, %v828_v59  ;;  %v291_v36 = vmul.f32 %v873_v10, %v873_v10 }
  0x63   : > { %v325_v38 = vsel %vm180_vm0, %v289_v23, 0.0  ;;  %v894_v19 = vsub.f32 %v717_v25, %v828_v59  ;;  %v292_v42 = vmul.f32 %v880_v27, %v880_v27  ;;  %v327_v44 = vsel %vm180_vm0, %v290_v29, 0.0 }
  0x64   : > { %v320_v24 = vadd.f32 %v319_v18, %v318_v20  ;;  %v901_v22 = vsub.f32 %v722_v28, %v828_v59  ;;  %v293_v47 = vmul.f32 %v887_v16, %v887_v16  ;;  %v329_v48 = vsel %vm180_vm0, %v291_v36, 0.0 }
  0x65   : > { %v908_v25 = vsub.f32 %v727_v31, %v828_v59  ;;  %v294_v51 = vmul.f32 %v894_v19, %v894_v19  ;;  %v331_v53 = vsel %vm180_vm0, %v292_v42, 0.0  ;;  %v915_v28 = vsub.f32 %v732_v34, %v828_v59 }
  0x66   : > { %v322_v33 = vadd.f32 %v321_v13, %v320_v24  ;;  %v295_v56 = vmul.f32 %v901_v22, %v901_v22  ;;  %v333_v57 = vsel %vm180_vm0, %v293_v47, 0.0  ;;  %v922_v31 = vsub.f32 %v737_v37, %v828_v59 }
  0x67   : > { %v296_v9 = vmul.f32 %v908_v25, %v908_v25  ;;  %v335_v1 = vsel %vm180_vm0, %v294_v51, 0.0  ;;  %v929_v34 = vsub.f32 %v742_v40, %v828_v59  ;;  %v297_v11 = vmul.f32 %v915_v28, %v915_v28 }
  0x68   : > { %v324_v41 = vadd.f32 %v323_v32, %v322_v33  ;;  %v337_v14 = vsel %vm180_vm0, %v295_v56, 0.0  ;;  %v936_v37 = vsub.f32 %v747_v43, %v828_v59  ;;  %v298_v18 = vmul.f32 %v922_v31, %v922_v31 }
  0x69   : > { %v339_v20 = vsel %vm180_vm0, %v296_v9, 0.0  ;;  %v943_v40 = vsub.f32 %v752_v46, %v828_v59  ;;  %v299_v13 = vmul.f32 %v929_v34, %v929_v34  ;;  %v341_v24 = vsel %vm180_vm0, %v297_v11, 0.0 }
  0x6a   : > { %v326_v45 = vadd.f32 %v325_v38, %v324_v41  ;;  %v950_v43 = vsub.f32 %v757_v49, %v828_v59  ;;  %v300_v32 = vmul.f32 %v936_v37, %v936_v37  ;;  %v343_v33 = vsel %vm180_vm0, %v298_v18, 0.0 }
  0x6b   : > { %v957_v46 = vsub.f32 %v762_v52, %v828_v59  ;;  %v301_v38 = vmul.f32 %v943_v40, %v943_v40  ;;  %v345_v41 = vsel %vm180_vm0, %v299_v13, 0.0  ;;  %v964_v49 = vsub.f32 %v767_v55, %v828_v59 }
  0x6c   : > { %v328_v50 = vadd.f32 %v327_v44, %v326_v45  ;;  %v302_v44 = vmul.f32 %v950_v43, %v950_v43  ;;  %v347_v45 = vsel %vm180_vm0, %v300_v32, 0.0  ;;  %v971_v52 = vsub.f32 %v772_v58, %v828_v59 }
  0x6d   : > { %v978_v55 = vsub.f32 %v777_v61, %v828_v59  ;;  %v985_v58 = vsub.f32 %v782_v4, %v828_v59  ;;  %v992_v61 = vsub.f32 %v787_v8, %v828_v59  ;;  %v999_v4 = vsub.f32 %v792_v12, %v828_v59 }
  0x6e   : > { %v330_v54 = vadd.f32 %v329_v48, %v328_v50  ;;  %v303_v48 = vmul.f32 %v957_v46, %v957_v46  ;;  %v349_v50 = vsel %vm180_vm0, %v301_v38, 0.0  ;;  %v1006_v8 = vsub.f32 %v797_v17, %v828_v59 }
  0x6f   : > { %v1013_v12 = vsub.f32 %v802_v21, %v828_v59  ;;  %v1020_v17 = vsub.f32 %v807_v26, %v828_v59  ;;  %v1027_v21 = vsub.f32 %v812_v30, %v828_v59  ;;  %v1034_v26 = vsub.f32 %v817_v35, %v828_v59 }
  0x70   : > { %v332_v0 = vadd.f32 %v331_v53, %v330_v54  ;;  %v304_v53 = vmul.f32 %v964_v49, %v964_v49  ;;  %v351_v54 = vsel %vm180_vm0, %v302_v44, 0.0  ;;  %v1041_v30 = vsub.f32 %v822_v39, %v828_v59 }
  0x71   : > { %v314_v35 = vmul.f32 %v1034_v26, %v1034_v26 }
  0x72   : > { %v334_v3 = vadd.f32 %v333_v57, %v332_v0  ;;  %v305_v57 = vmul.f32 %v971_v52, %v971_v52  ;;  %v353_v0 = vsel %vm180_vm0, %v303_v48, 0.0 }
  0x73   : > { %v375_v39 = vsel %vm180_vm0, %v314_v35, 0.0 }
  0x74   : > { %v336_v15 = vadd.f32 %v335_v1, %v334_v3  ;;  %v306_v1 = vmul.f32 %v978_v55, %v978_v55  ;;  %v355_v3 = vsel %vm180_vm0, %v304_v53, 0.0 }
  0x76   : > { %v338_v23 = vadd.f32 %v337_v14, %v336_v15  ;;  %v307_v14 = vmul.f32 %v985_v58, %v985_v58  ;;  %v357_v15 = vsel %vm180_vm0, %v305_v57, 0.0  ;;  %v315_v57 = vmul.f32 %v1041_v30, %v1041_v30 }
  0x78   : > { %v340_v29 = vadd.f32 %v339_v20, %v338_v23  ;;  %v308_v20 = vmul.f32 %v992_v61, %v992_v61  ;;  %v359_v23 = vsel %vm180_vm0, %v306_v1, 0.0  ;;  %v377_v1 = vsel %vm180_vm0, %v315_v57, 0.0 }
  0x7a   : > { %v342_v36 = vadd.f32 %v341_v24, %v340_v29  ;;  %v309_v24 = vmul.f32 %v999_v4, %v999_v4  ;;  %v361_v29 = vsel %vm180_vm0, %v307_v14, 0.0 }
  0x7c   : > { %v344_v42 = vadd.f32 %v343_v33, %v342_v36  ;;  %v310_v33 = vmul.f32 %v1006_v8, %v1006_v8  ;;  %v363_v36 = vsel %vm180_vm0, %v308_v20, 0.0 }
  0x7e   : > { %v346_v47 = vadd.f32 %v345_v41, %v344_v42  ;;  %v311_v41 = vmul.f32 %v1013_v12, %v1013_v12  ;;  %v365_v42 = vsel %vm180_vm0, %v309_v24, 0.0 }
  0x80   : > { %v348_v51 = vadd.f32 %v347_v45, %v346_v47  ;;  %v312_v45 = vmul.f32 %v1020_v17, %v1020_v17  ;;  %v367_v47 = vsel %vm180_vm0, %v310_v33, 0.0 }
  0x82   : > { %v350_v56 = vadd.f32 %v349_v50, %v348_v51  ;;  %v313_v50 = vmul.f32 %v1027_v21, %v1027_v21  ;;  %v369_v51 = vsel %vm180_vm0, %v311_v41, 0.0 }
  0x84   : > { %v352_v9 = vadd.f32 %v351_v54, %v350_v56  ;;  %v371_v54 = vsel %vm180_vm0, %v312_v45, 0.0 }
  0x86   : > { %v354_v11 = vadd.f32 %v353_v0, %v352_v9  ;;  %v373_v0 = vsel %vm180_vm0, %v313_v50, 0.0 }
  0x88   : > { %v356_v18 = vadd.f32 %v355_v3, %v354_v11 }
  0x8a   : > { %v358_v13 = vadd.f32 %v357_v15, %v356_v18 }
  0x8c   : > { %v360_v32 = vadd.f32 %v359_v23, %v358_v13 }
  0x8e   : > { %v362_v38 = vadd.f32 %v361_v29, %v360_v32 }
  0x90   : > { %v364_v44 = vadd.f32 %v363_v36, %v362_v38 }
  0x92   : > { %v366_v48 = vadd.f32 %v365_v42, %v364_v44 }
  0x94   : > { %v368_v53 = vadd.f32 %v367_v47, %v366_v48 }
  0x96   : > { %v370_v56 = vadd.f32 %v369_v51, %v368_v53 }
  0x98   : > { %v372_v9 = vadd.f32 %v371_v54, %v370_v56 }
  0x9a   : > { %v374_v59 = vadd.f32 %v373_v0, %v372_v9 }
  0x9c   : > { %v376_v3 = vadd.f32 %v375_v39, %v374_v59 }
  0x9e   : > { %v378_v11 = vadd.f32 %v377_v1, %v376_v3 }
  0xa0   : > { %v379_v14 = vrot.slane %v378_v11, 4 }
  0xa2   : > { %v380_v15 = vadd.f32 %v379_v14, %v378_v11 }
  0xa4   : > { %v381_v18 = vrot.slane %v380_v15, 2 }
  0xa6   : > { %v382_v20 = vadd.f32 %v381_v18, %v380_v15 }
  0xa8   : > { %v383_v23 = vrot.slane %v382_v20, 1 }
  0xaa   : > { %v384_v13 = vadd.f32 %v383_v23, %v382_v20 }
  0xac   : > { %v385_v24 = vmul.f32 0.00390625, %v384_v13 }
  0xae   : > { %v386_v29 = vadd.f32 1e-05, %v385_v24 }
  0xb0   : > { %604 = vrsqrt.f32 %v386_v29 }
  0xbd   : > { %v1054_v32 = vpop.eup %604 }
  0xbe   : > { %v388_v33 = vmul.f32 %v1054_v32, %v832_v60  ;;  %v389_v36 = vmul.f32 %v1054_v32, %v836_v62  ;;  %v390_v38 = vmul.f32 %v1054_v32, %v840_v63  ;;  %v391_v41 = vmul.f32 %v1054_v32, %v844_v5 }
  0xbf   : > { %v392_v60 = vmul.f32 %v1054_v32, %v848_v6  ;;  %v393_v62 = vmul.f32 %v1054_v32, %v858_v2  ;;  %v394_v63 = vmul.f32 %v1054_v32, %v864_v7  ;;  %v395_v5 = vmul.f32 %v1054_v32, %v873_v10 }
  0xc0   : > { %v420_v42 = vmax.f32 %v388_v33, 0.0  ;;  %v421_v44 = vmax.f32 %v389_v36, 0.0  ;;  %v422_v45 = vmax.f32 %v390_v38, 0.0  ;;  %v423_v47 = vmax.f32 %v391_v41, 0.0 }
  0xc1   : > { %v424_v48 = vmax.f32 %v392_v60, 0.0  ;;  %v425_v50 = vmax.f32 %v393_v62, 0.0  ;;  %v426_v6 = vmax.f32 %v394_v63, 0.0  ;;  %v427_v51 = vmax.f32 %v395_v5, 0.0 }
  0xc2   : > { %452 = vst.msk [vmem:[%s1069_s16] sm:$0xff] %vm180_vm0, %v420_v42  ;;  %453 = vst.msk [vmem:[%s1069_s16 + $0x8] sm:$0xff] %vm180_vm0, %v421_v44  ;;  %v396_v2 = vmul.f32 %v1054_v32, %v880_v27  ;;  %v397_v7 = vmul.f32 %v1054_v32, %v887_v16  ;;  %v398_v10 = vmul.f32 %v1054_v32, %v894_v19 }
  0xc3   : > { %454 = vst.msk [vmem:[%s1069_s16 + $0x10] sm:$0xff] %vm180_vm0, %v422_v45  ;;  %455 = vst.msk [vmem:[%s1069_s16 + $0x18] sm:$0xff] %vm180_vm0, %v423_v47  ;;  %v399_v53 = vmul.f32 %v1054_v32, %v901_v22  ;;  %v400_v27 = vmul.f32 %v1054_v32, %v908_v25  ;;  %v401_v16 = vmul.f32 %v1054_v32, %v915_v28 }
  0xc4   : > { %456 = vst.msk [vmem:[%s1069_s16 + $0x20] sm:$0xff] %vm180_vm0, %v424_v48  ;;  %457 = vst.msk [vmem:[%s1069_s16 + $0x28] sm:$0xff] %vm180_vm0, %v425_v50  ;;  %v402_v19 = vmul.f32 %v1054_v32, %v922_v31  ;;  %v403_v22 = vmul.f32 %v1054_v32, %v929_v34  ;;  %v428_v35 = vmax.f32 %v396_v2, 0.0  ;;  %v429_v54 = vmax.f32 %v397_v7, 0.0 }
  0xc5   : > { %458 = vst.msk [vmem:[%s1069_s16 + $0x30] sm:$0xff] %vm180_vm0, %v426_v6  ;;  %459 = vst.msk [vmem:[%s1069_s16 + $0x38] sm:$0xff] %vm180_vm0, %v427_v51  ;;  %v430_v56 = vmax.f32 %v398_v10, 0.0  ;;  %v431_v57 = vmax.f32 %v399_v53, 0.0  ;;  %v432_v0 = vmax.f32 %v400_v27, 0.0  ;;  %v433_v9 = vmax.f32 %v401_v16, 0.0 }
  0xc6   : > { %v434_v25 = vmax.f32 %v402_v19, 0.0  ;;  %v435_v39 = vmax.f32 %v403_v22, 0.0  ;;  %460 = vst.msk [vmem:[%s1069_s16 + $0x40] sm:$0xff] %vm180_vm0, %v428_v35  ;;  %461 = vst.msk [vmem:[%s1069_s16 + $0x48] sm:$0xff] %vm180_vm0, %v429_v54  ;;  %v404_v28 = vmul.f32 %v1054_v32, %v936_v37  ;;  %v405_v31 = vmul.f32 %v1054_v32, %v943_v40 }
  0xc7   : > { %462 = vst.msk [vmem:[%s1069_s16 + $0x50] sm:$0xff] %vm180_vm0, %v430_v56  ;;  %463 = vst.msk [vmem:[%s1069_s16 + $0x58] sm:$0xff] %vm180_vm0, %v431_v57  ;;  %v406_v34 = vmul.f32 %v1054_v32, %v950_v43  ;;  %v407_v59 = vmul.f32 %v1054_v32, %v957_v46  ;;  %v408_v37 = vmul.f32 %v1054_v32, %v964_v49 }
  0xc8   : > { %464 = vst.msk [vmem:[%s1069_s16 + $0x60] sm:$0xff] %vm180_vm0, %v432_v0  ;;  %465 = vst.msk [vmem:[%s1069_s16 + $0x68] sm:$0xff] %vm180_vm0, %v433_v9  ;;  %v409_v40 = vmul.f32 %v1054_v32, %v971_v52  ;;  %v410_v43 = vmul.f32 %v1054_v32, %v978_v55  ;;  %v411_v46 = vmul.f32 %v1054_v32, %v985_v58  ;;  %v436_v1 = vmax.f32 %v404_v28, 0.0 }
  0xc9   : > { %466 = vst.msk [vmem:[%s1069_s16 + $0x70] sm:$0xff] %vm180_vm0, %v434_v25  ;;  %467 = vst.msk [vmem:[%s1069_s16 + $0x78] sm:$0xff] %vm180_vm0, %v435_v39  ;;  %v437_v3 = vmax.f32 %v405_v31, 0.0  ;;  %v438_v11 = vmax.f32 %v406_v34, 0.0  ;;  %v439_v14 = vmax.f32 %v407_v59, 0.0  ;;  %v440_v15 = vmax.f32 %v408_v37, 0.0 }
  0xca   : > { %v441_v18 = vmax.f32 %v409_v40, 0.0  ;;  %v442_v49 = vmax.f32 %v410_v43, 0.0  ;;  %v443_v20 = vmax.f32 %v411_v46, 0.0  ;;  %468 = vst.msk [vmem:[%s1069_s16 + $0x80] sm:$0xff] %vm180_vm0, %v436_v1  ;;  %v412_v52 = vmul.f32 %v1054_v32, %v992_v61 }
  0xcb   : > { %469 = vst.msk [vmem:[%s1069_s16 + $0x88] sm:$0xff] %vm180_vm0, %v437_v3  ;;  %470 = vst.msk [vmem:[%s1069_s16 + $0x90] sm:$0xff] %vm180_vm0, %v438_v11  ;;  %v413_v55 = vmul.f32 %v1054_v32, %v999_v4  ;;  %v414_v58 = vmul.f32 %v1054_v32, %v1006_v8  ;;  %v415_v23 = vmul.f32 %v1054_v32, %v1013_v12 }
  0xcc   : > { %471 = vst.msk [vmem:[%s1069_s16 + $0x98] sm:$0xff] %vm180_vm0, %v439_v14  ;;  %472 = vst.msk [vmem:[%s1069_s16 + $0xa0] sm:$0xff] %vm180_vm0, %v440_v15  ;;  %v416_v61 = vmul.f32 %v1054_v32, %v1020_v17  ;;  %v417_v4 = vmul.f32 %v1054_v32, %v1027_v21  ;;  %v418_v8 = vmul.f32 %v1054_v32, %v1034_v26  ;;  %v444_v13 = vmax.f32 %v412_v52, 0.0 }
  0xcd   : > { %473 = vst.msk [vmem:[%s1069_s16 + $0xa8] sm:$0xff] %vm180_vm0, %v441_v18  ;;  %474 = vst.msk [vmem:[%s1069_s16 + $0xb0] sm:$0xff] %vm180_vm0, %v442_v49  ;;  %v419_v12 = vmul.f32 %v1054_v32, %v1041_v30  ;;  %v445_v24 = vmax.f32 %v413_v55, 0.0  ;;  %v446_v29 = vmax.f32 %v414_v58, 0.0  ;;  %v447_v33 = vmax.f32 %v415_v23, 0.0 }
  0xce   : > { %475 = vst.msk [vmem:[%s1069_s16 + $0xb8] sm:$0xff] %vm180_vm0, %v443_v20  ;;  %v448_v36 = vmax.f32 %v416_v61, 0.0  ;;  %v449_v38 = vmax.f32 %v417_v4, 0.0  ;;  %v450_v17 = vmax.f32 %v418_v8, 0.0  ;;  %476 = vst.msk [vmem:[%s1069_s16 + $0xc0] sm:$0xff] %vm180_vm0, %v444_v13 }
  0xcf   : > { %v451_v41 = vmax.f32 %v419_v12, 0.0  ;;  %477 = vst.msk [vmem:[%s1069_s16 + $0xc8] sm:$0xff] %vm180_vm0, %v445_v24  ;;  %478 = vst.msk [vmem:[%s1069_s16 + $0xd0] sm:$0xff] %vm180_vm0, %v446_v29 }
  0xd0   : > { %479 = vst.msk [vmem:[%s1069_s16 + $0xd8] sm:$0xff] %vm180_vm0, %v447_v33  ;;  %480 = vst.msk [vmem:[%s1069_s16 + $0xe0] sm:$0xff] %vm180_vm0, %v448_v36 }
  0xd1   : > { %481 = vst.msk [vmem:[%s1069_s16 + $0xe8] sm:$0xff] %vm180_vm0, %v449_v38  ;;  %482 = vst.msk [vmem:[%s1069_s16 + $0xf0] sm:$0xff] %vm180_vm0, %v450_v17 }
  0xd2   : > { %483 = vst.msk [vmem:[%s1069_s16 + $0xf8] sm:$0xff] %vm180_vm0, %v451_v41 }
  0xd3 PF: > { %s11_s8 = sadd.s32 1, %s628_s8   ;;  %s1202_s6 = smov %s624_s7 }
  0xd4   : > { %p8_p5 = scmp.ge.s32.totalorder %s11_s8, 4   ;;  %s1203_s7 = smov %s1205_s9 }
  0xd6   :  { %10 = sbr.rel (!%p8_p5) target bundleno = 2 (0x2), region = 54 }

// kernel: generator_forward.19
= control target key start
LH: loop header
LB: loop body
LE: loop exit
PB: predicated region body
PF: predicated region fallthrough
CT: control target
= control target key end

     0   :  { %s1426_s12 = smov 0   ;;  %s1428_s13 = smov 0   ;;  %s1619_s0 = inlined_call_operand.vmem [shape: bf16[512,256], index: 0, kind: input, shape index: {}]   ;;  %s1620_s1 = inlined_call_operand.vmem [shape: bf16[256,128], index: 1, kind: input, shape index: {}]   ;;  %s1621_s2 = inlined_call_operand.vmem [shape: f32[1,128], index: 2, kind: input, shape index: {}]   ;;  %s1622_s3 = inlined_call_operand.vmem [shape: f32[512,128], index: 3, kind: output, shape index: {}]  }
   0x1   :  { %s1430_s14 = smov 0  }
   0x2 LB: > { %s32_s15 = sadd.s32 1, %s1400_s13  ;;  %p1107_p0 = scmp.ge.s32.totalorder %s1404_s14, 1  ;;  %s1404_s14 = sphi %s1430_s14, %s13_s14   ;;  %s1400_s13 = sphi %s1428_s13, %s1624_s13   ;;  %s1396_s12 = sphi %s1426_s12, %s1623_s12  }
   0x3   : > { %p34_p1 = scmp.ge.s32.totalorder %s32_s15, 2  ;;  %p191_p2 = scmp.lt.s32.totalorder %s1404_s14, 3 }
   0x5   : > { %s1626_s15 = smov (%p34_p1, %s32_s15), 0  ;;  %p192_p3 = pnand %p1107_p0, %p191_p2 }
   0x6   : > { %s1108_s18 = sshll.u32 (!%p192_p3), %s1396_s12, 5 }
   0x7   : > { %195 = sbr.rel (%p192_p3) target bundleno = 305 (0x131), region = 32  ;;  %p236_p4 = scmp.lt.s32.totalorder (!%p192_p3), %s1108_s18, 63 }
   0xc   : > { %v1318_v0 = vld [vmem:[%s1620_s1 + $0x78] sm:$0xff]   ;;  %v1320_v2 = vld [vmem:[%s1620_s1 + $0x70] sm:$0xff]   ;;  %v1322_v4 = vld [vmem:[%s1620_s1 + $0x68] sm:$0xff]   ;;  %s1628_s18 = smov (!%p236_p4, %s1108_s18), 63 }
   0xd   : > { %v1319_v1 = vld [vmem:[%s1620_s1 + $0x38] sm:$0xff]   ;;  %1165 = vmatprep.subr.bf16.mxu0 %v1318_v0  ;;  %1277 = vmatprep.subr.bf16.mxu1 %v1318_v0  ;;  %v1321_v3 = vld [vmem:[%s1620_s1 + $0x30] sm:$0xff]   ;;  %v1323_v5 = vld [vmem:[%s1620_s1 + $0x28] sm:$0xff]   ;;  %s1164_s6 = sshll.u32 %s1628_s18, 3 }
   0xe   : > { %1166 = vmatpush3.bf16.msra.mxu0 %v1319_v1  ;;  %1285 = vmatpush3.bf16.msra.mxu1 %v1319_v1  ;;  %v1324_v6 = vld [vmem:[%s1620_s1 + $0x60] sm:$0xff]   ;;  %v1326_v8 = vld [vmem:[%s1620_s1 + $0x58] sm:$0xff]   ;;  %s1479_s11 = scalar_lea.vmem %s1619_s0, %s1164_s6  ;;  %v1328_v10 = vld [vmem:[%s1620_s1 + $0x50] sm:$0xff]   ;;  %s1544_s8 = scalar_lea.vmem %s1622_s3, %s1164_s6 }
   0xf   : > { %1167 = vmatprep.subr.bf16.mxu0 %v1320_v2  ;;  %1278 = vmatprep.subr.bf16.mxu1 %v1320_v2  ;;  %v1325_v7 = vld [vmem:[%s1620_s1 + $0x20] sm:$0xff]   ;;  %v1327_v9 = vld [vmem:[%s1620_s1 + $0x18] sm:$0xff]   ;;  %v1329_v13 = vld [vmem:[%s1620_s1 + $0x10] sm:$0xff]  }
  0x10   : > { %v1336_v11 = vld [vmem:[%s1479_s11 + $0x4] ss:$8 sps:$4 sm:$0xff]   ;;  %v1334_v18 = vld [vmem:[%s1479_s11] ss:$8 sps:$4 sm:$0xff]   ;;  %v1340_v20 = vld [vmem:[%s1479_s11 + $0x14] ss:$8 sps:$4 sm:$0xff]  }
  0x11   : > { %v1339_v12 = vld [vmem:[%s1479_s11 + $0x84] ss:$8 sps:$4 sm:$0xff]   ;;  %688 = vmatprep.mubr.bf16.mxu0 %v1336_v11  ;;  %v1337_v19 = vld [vmem:[%s1479_s11 + $0x80] ss:$8 sps:$4 sm:$0xff]   ;;  %v1342_v21 = vld [vmem:[%s1479_s11 + $0x94] ss:$8 sps:$4 sm:$0xff]  }
  0x12   : > { %1168 = vmatpush3.bf16.msra.mxu0 %v1321_v3  ;;  %1286 = vmatpush3.bf16.msra.mxu1 %v1321_v3  ;;  %v1330_v14 = vld [vmem:[%s1620_s1 + $0x48] sm:$0xff]   ;;  %v1332_v16 = vld [vmem:[%s1620_s1 + $0x40] sm:$0xff]   ;;  %v1344_v22 = vld [vmem:[%s1479_s11 + $0x10] ss:$8 sps:$4 sm:$0xff]  }
  0x13   : > { %1169 = vmatprep.subr.bf16.mxu0 %v1322_v4  ;;  %1279 = vmatprep.subr.bf16.mxu1 %v1322_v4  ;;  %v1331_v15 = vld [vmem:[%s1620_s1 + $0x8] sm:$0xff]   ;;  %v1333_v17 = vld [vmem:[%s1620_s1] sm:$0xff]   ;;  %v1345_v23 = vld [vmem:[%s1479_s11 + $0x90] ss:$8 sps:$4 sm:$0xff]  }
  0x14   : > { %752 = vmatprep.mubr.bf16.mxu1 %v1339_v12  ;;  %v1346_v24 = vld [vmem:[%s1479_s11 + $0x24] ss:$8 sps:$4 sm:$0xff]   ;;  %v1350_v26 = vld [vmem:[%s1479_s11 + $0x20] ss:$8 sps:$4 sm:$0xff]   ;;  %v1352_v28 = vld [vmem:[%s1479_s11 + $0x34] ss:$8 sps:$4 sm:$0xff]  }
  0x15   : > { %v1348_v25 = vld [vmem:[%s1479_s11 + $0xa4] ss:$8 sps:$4 sm:$0xff]   ;;  %v1351_v27 = vld [vmem:[%s1479_s11 + $0xa0] ss:$8 sps:$4 sm:$0xff]   ;;  %v1354_v29 = vld [vmem:[%s1479_s11 + $0xb4] ss:$8 sps:$4 sm:$0xff]  }
  0x16   : > { %1170 = vmatpush3.bf16.msra.mxu0 %v1323_v5  ;;  %1287 = vmatpush3.bf16.msra.mxu1 %v1323_v5  ;;  %v1356_v30 = vld [vmem:[%s1479_s11 + $0x30] ss:$8 sps:$4 sm:$0xff]   ;;  %v1358_v32 = vld [vmem:[%s1479_s11 + $0x44] ss:$8 sps:$4 sm:$0xff]   ;;  %v1362_v34 = vld [vmem:[%s1479_s11 + $0x40] ss:$8 sps:$4 sm:$0xff]  }
  0x17   : > { %1171 = vmatprep.subr.bf16.mxu0 %v1324_v6  ;;  %1280 = vmatprep.subr.bf16.mxu1 %v1324_v6  ;;  %v1357_v31 = vld [vmem:[%s1479_s11 + $0xb0] ss:$8 sps:$4 sm:$0xff]   ;;  %v1360_v33 = vld [vmem:[%s1479_s11 + $0xc4] ss:$8 sps:$4 sm:$0xff]   ;;  %v1363_v35 = vld [vmem:[%s1479_s11 + $0xc0] ss:$8 sps:$4 sm:$0xff]  }
  0x18   : > { %v1364_v36 = vld [vmem:[%s1479_s11 + $0x54] ss:$8 sps:$4 sm:$0xff]   ;;  %v1368_v38 = vld [vmem:[%s1479_s11 + $0x50] ss:$8 sps:$4 sm:$0xff]   ;;  %v1370_v40 = vld [vmem:[%s1479_s11 + $0x64] ss:$8 sps:$4 sm:$0xff]  }
  0x19   : > { %v1366_v37 = vld [vmem:[%s1479_s11 + $0xd4] ss:$8 sps:$4 sm:$0xff]   ;;  %v1369_v39 = vld [vmem:[%s1479_s11 + $0xd0] ss:$8 sps:$4 sm:$0xff]   ;;  %v1372_v41 = vld [vmem:[%s1479_s11 + $0xe4] ss:$8 sps:$4 sm:$0xff]  }
  0x1a   : > { %1172 = vmatpush3.bf16.msra.mxu0 %v1325_v7  ;;  %1288 = vmatpush3.bf16.msra.mxu1 %v1325_v7  ;;  %v1374_v42 = vld [vmem:[%s1479_s11 + $0x60] ss:$8 sps:$4 sm:$0xff]   ;;  %v1376_v44 = vld [vmem:[%s1479_s11 + $0x74] ss:$8 sps:$4 sm:$0xff]   ;;  %v1380_v46 = vld [vmem:[%s1479_s11 + $0x70] ss:$8 sps:$4 sm:$0xff]  }
  0x1b   : > { %1173 = vmatprep.subr.bf16.mxu0 %v1326_v8  ;;  %1281 = vmatprep.subr.bf16.mxu1 %v1326_v8  ;;  %v1375_v43 = vld [vmem:[%s1479_s11 + $0xe0] ss:$8 sps:$4 sm:$0xff]   ;;  %v1378_v45 = vld [vmem:[%s1479_s11 + $0xf4] ss:$8 sps:$4 sm:$0xff]   ;;  %v1381_v47 = vld [vmem:[%s1479_s11 + $0xf0] ss:$8 sps:$4 sm:$0xff]  }
  0x1c   : > { %v1537_v54 = vld [vmem:[%s1621_s2] ss:$0 sm:$0xff] }
  0x1e   : > { %1174 = vmatpush3.bf16.msra.mxu0 %v1327_v9  ;;  %1289 = vmatpush3.bf16.msra.mxu1 %v1327_v9 }
  0x1f   : > { %1175 = vmatprep.subr.bf16.mxu0 %v1328_v10  ;;  %1282 = vmatprep.subr.bf16.mxu1 %v1328_v10 }
  0x22   : > { %1176 = vmatpush3.bf16.msra.mxu0 %v1329_v13  ;;  %1290 = vmatpush3.bf16.msra.mxu1 %v1329_v13 }
  0x23   : > { %1177 = vmatprep.subr.bf16.mxu0 %v1330_v14  ;;  %1283 = vmatprep.subr.bf16.mxu1 %v1330_v14 }
  0x26   : > { %1178 = vmatpush3.bf16.msra.mxu0 %v1331_v15  ;;  %1291 = vmatpush3.bf16.msra.mxu1 %v1331_v15 }
  0x27   : > { %1179 = vmatprep.subr.bf16.mxu0 %v1332_v16  ;;  %1284 = vmatprep.subr.bf16.mxu1 %v1332_v16 }
  0x2a   : > { %1180 = vmatpush3.bf16.msra.mxu0 %v1333_v17  ;;  %1292 = vmatpush3.bf16.msra.mxu1 %v1333_v17 }
  0x2d   : > { %689 = vmatmul.mubr.bf16.vlgmr.msra.gmra.mxu0 %v1334_v18  ;;  %753 = vmatmul.mubr.bf16.vlgmr.msra.gmra.mxu1 %v1337_v19 }
  0x2e   : > { %696 = vmatprep.mubr.bf16.mxu0 %v1340_v20  ;;  %760 = vmatprep.mubr.bf16.mxu1 %v1342_v21 }
  0x35   : > { %697 = vmatmul.mubr.bf16.gmra.mxu0 %v1344_v22  ;;  %761 = vmatmul.mubr.bf16.gmra.mxu1 %v1345_v23 }
  0x36   : > { %704 = vmatprep.mubr.bf16.mxu0 %v1346_v24  ;;  %768 = vmatprep.mubr.bf16.mxu1 %v1348_v25 }
  0x3d   : > { %705 = vmatmul.mubr.bf16.gmra.mxu0 %v1350_v26  ;;  %769 = vmatmul.mubr.bf16.gmra.mxu1 %v1351_v27 }
  0x3e   : > { %712 = vmatprep.mubr.bf16.mxu0 %v1352_v28  ;;  %776 = vmatprep.mubr.bf16.mxu1 %v1354_v29 }
  0x45   : > { %713 = vmatmul.mubr.bf16.gmra.mxu0 %v1356_v30  ;;  %777 = vmatmul.mubr.bf16.gmra.mxu1 %v1357_v31 }
  0x46   : > { %720 = vmatprep.mubr.bf16.mxu0 %v1358_v32  ;;  %784 = vmatprep.mubr.bf16.mxu1 %v1360_v33 }
  0x4d   : > { %721 = vmatmul.mubr.bf16.gmra.mxu0 %v1362_v34  ;;  %785 = vmatmul.mubr.bf16.gmra.mxu1 %v1363_v35 }
  0x4e   : > { %728 = vmatprep.mubr.bf16.mxu0 %v1364_v36  ;;  %792 = vmatprep.mubr.bf16.mxu1 %v1366_v37 }
  0x55   : > { %729 = vmatmul.mubr.bf16.gmra.mxu0 %v1368_v38  ;;  %793 = vmatmul.mubr.bf16.gmra.mxu1 %v1369_v39 }
  0x56   : > { %736 = vmatprep.mubr.bf16.mxu0 %v1370_v40  ;;  %800 = vmatprep.mubr.bf16.mxu1 %v1372_v41 }
  0x5d   : > { %737 = vmatmul.mubr.bf16.gmra.mxu0 %v1374_v42  ;;  %801 = vmatmul.mubr.bf16.gmra.mxu1 %v1375_v43 }
  0x5e   : > { %744 = vmatprep.mubr.bf16.mxu0 %v1376_v44  ;;  %808 = vmatprep.mubr.bf16.mxu1 %v1378_v45 }
  0x65   : > { %745 = vmatmul.mubr.bf16.gmra.mxu0 %v1380_v46  ;;  %809 = vmatmul.mubr.bf16.gmra.mxu1 %v1381_v47 }
  0xed   : > { %v1181_v48 = vpop.f32.mrf.mxu0  ;;  %v1229_v49 = vpop.f32.mrf.mxu1 }
  0xef   : > { %v1182_v50 = vpop.f32.mrf.mxu0  ;;  %v1230_v51 = vpop.f32.mrf.mxu1 }
  0xf0   : > { %v1183_v52 = vadd.f32 %v1182_v50, %v1181_v48  ;;  %v1231_v53 = vadd.f32 %v1230_v51, %v1229_v49 }
  0xf1   : > { %v1184_v55 = vpop.f32.mrf.mxu0  ;;  %v1232_v56 = vpop.f32.mrf.mxu1 }
  0xf2   : > { %v923_v59 = vadd.f32 %v1183_v52, %v1537_v54  ;;  %v939_v60 = vadd.f32 %v1231_v53, %v1537_v54 }
  0xf3   : > { %v1185_v57 = vpop.f32.mrf.mxu0  ;;  %v1233_v58 = vpop.f32.mrf.mxu1 }
  0xf4   : > { %v1186_v61 = vadd.f32 %v1185_v57, %v1184_v55  ;;  %v1234_v62 = vadd.f32 %v1233_v58, %v1232_v56  ;;  %955 = vst [vmem:[%s1544_s8] sm:$0xff] %v923_v59  ;;  %971 = vst [vmem:[%s1544_s8 + $0x80] sm:$0xff] %v939_v60 }
  0xf5   : > { %v1187_v63 = vpop.f32.mrf.mxu0  ;;  %v1235_v0 = vpop.f32.mrf.mxu1 }
  0xf6   : > { %v924_v3 = vadd.f32 %v1186_v61, %v1537_v54  ;;  %v940_v4 = vadd.f32 %v1234_v62, %v1537_v54 }
  0xf7   : > { %v1188_v1 = vpop.f32.mrf.mxu0  ;;  %v1236_v2 = vpop.f32.mrf.mxu1 }
  0xf8   : > { %v1189_v5 = vadd.f32 %v1188_v1, %v1187_v63  ;;  %v1237_v6 = vadd.f32 %v1236_v2, %v1235_v0  ;;  %956 = vst [vmem:[%s1544_s8 + $0x8] sm:$0xff] %v924_v3  ;;  %972 = vst [vmem:[%s1544_s8 + $0x88] sm:$0xff] %v940_v4 }
  0xf9   : > { %v1190_v7 = vpop.f32.mrf.mxu0  ;;  %v1238_v8 = vpop.f32.mrf.mxu1 }
  0xfa   : > { %v925_v11 = vadd.f32 %v1189_v5, %v1537_v54  ;;  %v941_v12 = vadd.f32 %v1237_v6, %v1537_v54 }
  0xfb   : > { %v1191_v9 = vpop.f32.mrf.mxu0  ;;  %v1239_v10 = vpop.f32.mrf.mxu1 }
  0xfc   : > { %v1192_v13 = vadd.f32 %v1191_v9, %v1190_v7  ;;  %v1240_v14 = vadd.f32 %v1239_v10, %v1238_v8  ;;  %957 = vst [vmem:[%s1544_s8 + $0x10] sm:$0xff] %v925_v11  ;;  %973 = vst [vmem:[%s1544_s8 + $0x90] sm:$0xff] %v941_v12 }
  0xfd   : > { %v1193_v15 = vpop.f32.mrf.mxu0  ;;  %v1241_v16 = vpop.f32.mrf.mxu1 }
  0xfe   : > { %v926_v19 = vadd.f32 %v1192_v13, %v1537_v54  ;;  %v942_v20 = vadd.f32 %v1240_v14, %v1537_v54 }
  0xff   : > { %v1194_v17 = vpop.f32.mrf.mxu0  ;;  %v1242_v18 = vpop.f32.mrf.mxu1 }
 0x100   : > { %v1195_v21 = vadd.f32 %v1194_v17, %v1193_v15  ;;  %v1243_v22 = vadd.f32 %v1242_v18, %v1241_v16  ;;  %958 = vst [vmem:[%s1544_s8 + $0x18] sm:$0xff] %v926_v19  ;;  %974 = vst [vmem:[%s1544_s8 + $0x98] sm:$0xff] %v942_v20 }
 0x101   : > { %v1196_v23 = vpop.f32.mrf.mxu0  ;;  %v1244_v24 = vpop.f32.mrf.mxu1 }
 0x102   : > { %v927_v27 = vadd.f32 %v1195_v21, %v1537_v54  ;;  %v943_v28 = vadd.f32 %v1243_v22, %v1537_v54 }
 0x103   : > { %v1197_v25 = vpop.f32.mrf.mxu0  ;;  %v1245_v26 = vpop.f32.mrf.mxu1 }
 0x104   : > { %v1198_v29 = vadd.f32 %v1197_v25, %v1196_v23  ;;  %v1246_v30 = vadd.f32 %v1245_v26, %v1244_v24  ;;  %959 = vst [vmem:[%s1544_s8 + $0x20] sm:$0xff] %v927_v27  ;;  %975 = vst [vmem:[%s1544_s8 + $0xa0] sm:$0xff] %v943_v28 }
 0x105   : > { %v1199_v31 = vpop.f32.mrf.mxu0  ;;  %v1247_v32 = vpop.f32.mrf.mxu1 }
 0x106   : > { %v928_v35 = vadd.f32 %v1198_v29, %v1537_v54  ;;  %v944_v36 = vadd.f32 %v1246_v30, %v1537_v54 }
 0x107   : > { %v1200_v33 = vpop.f32.mrf.mxu0  ;;  %v1248_v34 = vpop.f32.mrf.mxu1 }
 0x108   : > { %v1201_v37 = vadd.f32 %v1200_v33, %v1199_v31  ;;  %v1249_v38 = vadd.f32 %v1248_v34, %v1247_v32  ;;  %960 = vst [vmem:[%s1544_s8 + $0x28] sm:$0xff] %v928_v35  ;;  %976 = vst [vmem:[%s1544_s8 + $0xa8] sm:$0xff] %v944_v36 }
 0x109   : > { %v1202_v39 = vpop.f32.mrf.mxu0  ;;  %v1250_v40 = vpop.f32.mrf.mxu1 }
 0x10a   : > { %v929_v43 = vadd.f32 %v1201_v37, %v1537_v54  ;;  %v945_v44 = vadd.f32 %v1249_v38, %v1537_v54 }
 0x10b   : > { %v1203_v41 = vpop.f32.mrf.mxu0  ;;  %v1251_v42 = vpop.f32.mrf.mxu1 }
 0x10c   : > { %v1204_v45 = vadd.f32 %v1203_v41, %v1202_v39  ;;  %v1252_v46 = vadd.f32 %v1251_v42, %v1250_v40  ;;  %961 = vst [vmem:[%s1544_s8 + $0x30] sm:$0xff] %v929_v43  ;;  %977 = vst [vmem:[%s1544_s8 + $0xb0] sm:$0xff] %v945_v44 }
 0x10d   : > { %v1205_v47 = vpop.f32.mrf.mxu0  ;;  %v1253_v48 = vpop.f32.mrf.mxu1 }
 0x10e   : > { %v930_v51 = vadd.f32 %v1204_v45, %v1537_v54  ;;  %v946_v52 = vadd.f32 %v1252_v46, %v1537_v54 }
 0x10f   : > { %v1206_v49 = vpop.f32.mrf.mxu0  ;;  %v1254_v50 = vpop.f32.mrf.mxu1 }
 0x110   : > { %v1207_v53 = vadd.f32 %v1206_v49, %v1205_v47  ;;  %v1255_v55 = vadd.f32 %v1254_v50, %v1253_v48  ;;  %962 = vst [vmem:[%s1544_s8 + $0x38] sm:$0xff] %v930_v51  ;;  %978 = vst [vmem:[%s1544_s8 + $0xb8] sm:$0xff] %v946_v52 }
 0x111   : > { %v1208_v56 = vpop.f32.mrf.mxu0  ;;  %v1256_v57 = vpop.f32.mrf.mxu1 }
 0x112   : > { %v931_v60 = vadd.f32 %v1207_v53, %v1537_v54  ;;  %v947_v61 = vadd.f32 %v1255_v55, %v1537_v54 }
 0x113   : > { %v1209_v58 = vpop.f32.mrf.mxu0  ;;  %v1257_v59 = vpop.f32.mrf.mxu1 }
 0x114   : > { %v1210_v62 = vadd.f32 %v1209_v58, %v1208_v56  ;;  %v1258_v63 = vadd.f32 %v1257_v59, %v1256_v57  ;;  %963 = vst [vmem:[%s1544_s8 + $0x40] sm:$0xff] %v931_v60  ;;  %979 = vst [vmem:[%s1544_s8 + $0xc0] sm:$0xff] %v947_v61 }
 0x115   : > { %v1211_v0 = vpop.f32.mrf.mxu0  ;;  %v1259_v1 = vpop.f32.mrf.mxu1 }
 0x116   : > { %v932_v4 = vadd.f32 %v1210_v62, %v1537_v54  ;;  %v948_v5 = vadd.f32 %v1258_v63, %v1537_v54 }
 0x117   : > { %v1212_v2 = vpop.f32.mrf.mxu0  ;;  %v1260_v3 = vpop.f32.mrf.mxu1 }
 0x118   : > { %v1213_v6 = vadd.f32 %v1212_v2, %v1211_v0  ;;  %v1261_v7 = vadd.f32 %v1260_v3, %v1259_v1  ;;  %964 = vst [vmem:[%s1544_s8 + $0x48] sm:$0xff] %v932_v4  ;;  %980 = vst [vmem:[%s1544_s8 + $0xc8] sm:$0xff] %v948_v5 }
 0x119   : > { %v1214_v8 = vpop.f32.mrf.mxu0  ;;  %v1262_v9 = vpop.f32.mrf.mxu1 }
 0x11a   : > { %v933_v12 = vadd.f32 %v1213_v6, %v1537_v54  ;;  %v949_v13 = vadd.f32 %v1261_v7, %v1537_v54 }
 0x11b   : > { %v1215_v10 = vpop.f32.mrf.mxu0  ;;  %v1263_v11 = vpop.f32.mrf.mxu1 }
 0x11c   : > { %v1216_v14 = vadd.f32 %v1215_v10, %v1214_v8  ;;  %v1264_v15 = vadd.f32 %v1263_v11, %v1262_v9  ;;  %965 = vst [vmem:[%s1544_s8 + $0x50] sm:$0xff] %v933_v12  ;;  %981 = vst [vmem:[%s1544_s8 + $0xd0] sm:$0xff] %v949_v13 }
 0x11d   : > { %v1217_v16 = vpop.f32.mrf.mxu0  ;;  %v1265_v17 = vpop.f32.mrf.mxu1 }
 0x11e   : > { %v934_v20 = vadd.f32 %v1216_v14, %v1537_v54  ;;  %v950_v21 = vadd.f32 %v1264_v15, %v1537_v54 }
 0x11f   : > { %v1218_v18 = vpop.f32.mrf.mxu0  ;;  %v1266_v19 = vpop.f32.mrf.mxu1 }
 0x120   : > { %v1219_v22 = vadd.f32 %v1218_v18, %v1217_v16  ;;  %v1267_v23 = vadd.f32 %v1266_v19, %v1265_v17  ;;  %966 = vst [vmem:[%s1544_s8 + $0x58] sm:$0xff] %v934_v20  ;;  %982 = vst [vmem:[%s1544_s8 + $0xd8] sm:$0xff] %v950_v21 }
 0x121   : > { %v1220_v24 = vpop.f32.mrf.mxu0  ;;  %v1268_v25 = vpop.f32.mrf.mxu1 }
 0x122   : > { %v935_v28 = vadd.f32 %v1219_v22, %v1537_v54  ;;  %v951_v29 = vadd.f32 %v1267_v23, %v1537_v54 }
 0x123   : > { %v1221_v26 = vpop.f32.mrf.mxu0  ;;  %v1269_v27 = vpop.f32.mrf.mxu1 }
 0x124   : > { %v1222_v30 = vadd.f32 %v1221_v26, %v1220_v24  ;;  %v1270_v31 = vadd.f32 %v1269_v27, %v1268_v25  ;;  %967 = vst [vmem:[%s1544_s8 + $0x60] sm:$0xff] %v935_v28  ;;  %983 = vst [vmem:[%s1544_s8 + $0xe0] sm:$0xff] %v951_v29 }
 0x125   : > { %v1223_v32 = vpop.f32.mrf.mxu0  ;;  %v1271_v33 = vpop.f32.mrf.mxu1 }
 0x126   : > { %v936_v36 = vadd.f32 %v1222_v30, %v1537_v54  ;;  %v952_v37 = vadd.f32 %v1270_v31, %v1537_v54 }
 0x127   : > { %v1224_v34 = vpop.f32.mrf.mxu0  ;;  %v1272_v35 = vpop.f32.mrf.mxu1 }
 0x128   : > { %v1225_v38 = vadd.f32 %v1224_v34, %v1223_v32  ;;  %v1273_v39 = vadd.f32 %v1272_v35, %v1271_v33  ;;  %968 = vst [vmem:[%s1544_s8 + $0x68] sm:$0xff] %v936_v36  ;;  %984 = vst [vmem:[%s1544_s8 + $0xe8] sm:$0xff] %v952_v37 }
 0x129   : > { %v1226_v40 = vpop.f32.mrf.mxu0  ;;  %v1274_v41 = vpop.f32.mrf.mxu1 }
 0x12a   : > { %v937_v44 = vadd.f32 %v1225_v38, %v1537_v54  ;;  %v953_v45 = vadd.f32 %v1273_v39, %v1537_v54 }
 0x12b   : > { %v1227_v42 = vpop.f32.mrf.mxu0  ;;  %v1275_v43 = vpop.f32.mrf.mxu1 }
 0x12c   : > { %v1228_v46 = vadd.f32 %v1227_v42, %v1226_v40  ;;  %v1276_v47 = vadd.f32 %v1275_v43, %v1274_v41  ;;  %969 = vst [vmem:[%s1544_s8 + $0x70] sm:$0xff] %v937_v44  ;;  %985 = vst [vmem:[%s1544_s8 + $0xf0] sm:$0xff] %v953_v45 }
 0x12e   : > { %v938_v48 = vadd.f32 %v1228_v46, %v1537_v54  ;;  %v954_v49 = vadd.f32 %v1276_v47, %v1537_v54 }
 0x130   : > { %970 = vst [vmem:[%s1544_s8 + $0x78] sm:$0xff] %v938_v48  ;;  %986 = vst [vmem:[%s1544_s8 + $0xf8] sm:$0xff] %v954_v49 }
 0x131 PF: > { %s13_s14 = sadd.s32 1, %s1404_s14   ;;  %s1623_s12 = smov %s1400_s13 }
 0x132   : > { %p10_p5 = scmp.ge.s32.totalorder %s13_s14, 4   ;;  %s1624_s13 = smov %s1626_s15 }
 0x134   :  { %12 = sbr.rel (!%p10_p5) target bundleno = 2 (0x2), region = 76 }

// kernel: generator_forward.21
= control target key start
LH: loop header
LB: loop body
LE: loop exit
PB: predicated region body
PF: predicated region fallthrough
CT: control target
= control target key end

     0   :  { %s1033_s12 = smov 0   ;;  %s1035_s13 = smov 0   ;;  %s1381_s0 = inlined_call_operand.vmem [shape: bf16[128,640], index: 0, kind: input, shape index: {}]   ;;  %s1382_s1 = inlined_call_operand.vmem [shape: bf16[640,128], index: 1, kind: input, shape index: {}]   ;;  %s1383_s2 = inlined_call_operand.vmem [shape: f32[1,128], index: 2, kind: input, shape index: {}]   ;;  %s1384_s3 = inlined_call_operand.vmem [shape: f32[128,128], index: 3, kind: output, shape index: {}]  }
   0x1   :  { %s1037_s14 = smov 0   ;;  %s1039_s15 = smov 0  }
   0x2   :  { %s1041_s16 = smov 0  }
   0x3 LB: > { %s25_s17 = sadd.s32 1, %s1006_s15  ;;  %p48_p1 = scmp.ne.s32.totalorder %s998_s13, %s994_s12  ;;  %s1010_s16 = sphi %s1041_s16, %s13_s16   ;;  %s1006_s15 = sphi %s1039_s15, %s1388_s15   ;;  %s1002_s14 = sphi %s1037_s14, %s1387_s14   ;;  %s998_s13 = sphi %s1035_s13, %s1386_s13   ;;  %s994_s12 = sphi %s1033_s12, %s1385_s12  }
   0x4   : > { %p26_p0 = scmp.ge.s32.totalorder %s25_s17, 5  ;;  %p49_p2 = scmp.eq.s32.totalorder %s1010_s16, 0 }
   0x5   : > { %s41_s19 = sadd.s32 1, %s998_s13  ;;  %p821_p5 = scmp.ge.s32.totalorder %s1010_s16, 5 }
   0x6   : > { %s1390_s17 = smov (%p26_p0, %s25_s17), 0  ;;  %p50_p3 = por %p49_p2, %p48_p1 }
   0x7   : > { %s37_s18 = ssub.s32 %s1006_s15, %s1390_s17  ;;  %162 = sbr.rel (%p821_p5) target bundleno = 26 (0x1a), region = 20 }
   0x8   : > { %p39_p4 = scmp.eq.s32.totalorder %s37_s18, 0 }
   0xa   : > { %s1068_s20 = scalar_select %p39_p4, %s998_s13, %s41_s19  }
   0xc   : > { %165 = sbr.rel (!%p50_p3) target bundleno = 26 (0x1a), region = 24  ;;  %s167_s21 = sand.u32 (%p50_p3), 1, %s998_s13  }
   0xd   : > { %s823_s22 = sshll.u32 (%p50_p3), %s1006_s15, 2  ;;  %s822_s23 = sshll.u32 (%p50_p3), %s167_s21, 6 }
   0xe   : > { %s1076_s26 = scalar_lea.vmem (%p50_p3), %s1381_s0, %s823_s22  ;;  %s169_s27 = scalar_lea.vmem (%p50_p3), [#allocation2], %s822_s23 }
   0xf   : > { %v191_v0 = vld [vmem:[%s1076_s26] sm:$0xf] (%p50_p3)  ;;  %v193_v1 = vld [vmem:[%s1076_s26 + $0x14] sm:$0xf] (%p50_p3)  ;;  %v195_v2 = vld [vmem:[%s1076_s26 + $0x28] sm:$0xf] (%p50_p3) }
  0x10   : > { %192 = vst [vmem:[%s169_s27] sm:$0xf] (%p50_p3), %v191_v0  ;;  %194 = vst [vmem:[%s169_s27 + $0x4] sm:$0xf] (%p50_p3), %v193_v1  ;;  %v197_v3 = vld [vmem:[%s1076_s26 + $0x3c] sm:$0xf] (%p50_p3) }
  0x11   : > { %v199_v4 = vld [vmem:[%s1076_s26 + $0x50] sm:$0xf]  ;;  %196 = vst [vmem:[%s169_s27 + $0x8] sm:$0xf] %v195_v2  ;;  %198 = vst [vmem:[%s169_s27 + $0xc] sm:$0xf] %v197_v3 }
  0x12   : > { %200 = vst [vmem:[%s169_s27 + $0x10] sm:$0xf] %v199_v4  ;;  %v201_v5 = vld [vmem:[%s1076_s26 + $0x64] sm:$0xf]  ;;  %v203_v6 = vld [vmem:[%s1076_s26 + $0x78] sm:$0xf] }
  0x13   : > { %v205_v7 = vld [vmem:[%s1076_s26 + $0x8c] sm:$0xf]  ;;  %202 = vst [vmem:[%s169_s27 + $0x14] sm:$0xf] %v201_v5  ;;  %204 = vst [vmem:[%s169_s27 + $0x18] sm:$0xf] %v203_v6 }
  0x14   : > { %206 = vst [vmem:[%s169_s27 + $0x1c] sm:$0xf] %v205_v7  ;;  %v207_v8 = vld [vmem:[%s1076_s26 + $0xa0] sm:$0xf]  ;;  %v209_v9 = vld [vmem:[%s1076_s26 + $0xb4] sm:$0xf] }
  0x15   : > { %v211_v10 = vld [vmem:[%s1076_s26 + $0xc8] sm:$0xf]  ;;  %208 = vst [vmem:[%s169_s27 + $0x20] sm:$0xf] %v207_v8  ;;  %210 = vst [vmem:[%s169_s27 + $0x24] sm:$0xf] %v209_v9 }
  0x16   : > { %212 = vst [vmem:[%s169_s27 + $0x28] sm:$0xf] %v211_v10  ;;  %v213_v11 = vld [vmem:[%s1076_s26 + $0xdc] sm:$0xf]  ;;  %v215_v12 = vld [vmem:[%s1076_s26 + $0xf0] sm:$0xf] }
  0x17   : > { %v217_v13 = vld [vmem:[%s1076_s26 + $0x104] sm:$0xf]  ;;  %214 = vst [vmem:[%s169_s27 + $0x2c] sm:$0xf] %v213_v11  ;;  %216 = vst [vmem:[%s169_s27 + $0x30] sm:$0xf] %v215_v12 }
  0x18   : > { %218 = vst [vmem:[%s169_s27 + $0x34] sm:$0xf] %v217_v13  ;;  %v219_v14 = vld [vmem:[%s1076_s26 + $0x118] sm:$0xf]  ;;  %v221_v15 = vld [vmem:[%s1076_s26 + $0x12c] sm:$0xf] }
  0x19   : > { %220 = vst [vmem:[%s169_s27 + $0x38] sm:$0xf] %v219_v14  ;;  %222 = vst [vmem:[%s169_s27 + $0x3c] sm:$0xf] %v221_v15 }
  0x1a PF: > { %p824_p6 = scmp.ge.s32.totalorder %s1010_s16, 1  ;;  %p289_p7 = scmp.lt.s32.totalorder %s1010_s16, 6 }
  0x1c   : > { %p290_p8 = pnand %p824_p6, %p289_p7 }
  0x1d   : > { %s296_s28 = sand.u32 (!%p290_p8), 1, %s994_s12   ;;  %s826_s29 = sshll.u32 (!%p290_p8), %s1002_s14, 4 }
  0x1e   : > { %293 = sbr.rel (%p290_p8) target bundleno = 304 (0x130), region = 69  ;;  %s825_s30 = sshll.u32 (!%p290_p8), %s296_s28, 6 }
  0x1f   : > { %p335_p9 = scmp.lt.s32.totalorder (!%p290_p8), %s826_s29, 79  ;;  %s1103_s8 = scalar_lea.vmem (!%p290_p8), [#allocation2], %s825_s30 }
  0x20   : > { %p828_p10 = scmp.ne.s32.totalorder (!%p290_p8), %s1002_s14, 0 }
  0x23   : > { %s1392_s29 = smov (!%p335_p9, %s826_s29), 79  ;;  %359 = sbr.rel (%p828_p10) target bundleno = 49 (0x31), region = 77 }
  0x24   : > { %s827_s4 = sshll.u32 %s1392_s29, 2 }
  0x25   : > { %s1101_s7 = scalar_lea.vmem %s1382_s1, %s827_s4 }
  0x28   : > { %v1012_v16 = vmov 0.0  }
  0x29   : > { %360 = vst [vmem:[%s1384_s3] sm:$0xff] %v1012_v16  ;;  %361 = vst [vmem:[%s1384_s3 + $0x8] sm:$0xff] %v1012_v16 }
  0x2a   : > { %362 = vst [vmem:[%s1384_s3 + $0x10] sm:$0xff] %v1012_v16  ;;  %363 = vst [vmem:[%s1384_s3 + $0x18] sm:$0xff] %v1012_v16 }
  0x2b   : > { %364 = vst [vmem:[%s1384_s3 + $0x20] sm:$0xff] %v1012_v16  ;;  %365 = vst [vmem:[%s1384_s3 + $0x28] sm:$0xff] %v1012_v16 }
  0x2c   : > { %366 = vst [vmem:[%s1384_s3 + $0x30] sm:$0xff] %v1012_v16  ;;  %367 = vst [vmem:[%s1384_s3 + $0x38] sm:$0xff] %v1012_v16 }
  0x2d   : > { %368 = vst [vmem:[%s1384_s3 + $0x40] sm:$0xff] %v1012_v16  ;;  %369 = vst [vmem:[%s1384_s3 + $0x48] sm:$0xff] %v1012_v16 }
  0x2e   : > { %370 = vst [vmem:[%s1384_s3 + $0x50] sm:$0xff] %v1012_v16  ;;  %371 = vst [vmem:[%s1384_s3 + $0x58] sm:$0xff] %v1012_v16 }
  0x2f   : > { %372 = vst [vmem:[%s1384_s3 + $0x60] sm:$0xff] %v1012_v16  ;;  %373 = vst [vmem:[%s1384_s3 + $0x68] sm:$0xff] %v1012_v16 }
  0x30   : > { %374 = vst [vmem:[%s1384_s3 + $0x70] sm:$0xff] %v1012_v16  ;;  %375 = vst [vmem:[%s1384_s3 + $0x78] sm:$0xff] %v1012_v16 }
  0x31 PF: > { %v956_v17 = vld [vmem:[%s1101_s7 + $0x38] sm:$0xff]   ;;  %v957_v18 = vld [vmem:[%s1101_s7 + $0x30] sm:$0xff]   ;;  %v958_v19 = vld [vmem:[%s1101_s7 + $0x28] sm:$0xff]   ;;  %p845_p11 = scmp.ne.s32.totalorder %s1002_s14, 4 }
  0x32   : > { %867 = vmatprep.subr.bf16.mxu0 %v956_v17  ;;  %899 = vmatprep.subr.bf16.mxu1 %v956_v17  ;;  %v959_v20 = vld [vmem:[%s1101_s7 + $0x20] sm:$0xff]   ;;  %v960_v23 = vld [vmem:[%s1101_s7 + $0x18] sm:$0xff]   ;;  %v961_v24 = vld [vmem:[%s1101_s7 + $0x10] sm:$0xff]  }
  0x33   : > { %868 = vmatpush3.bf16.msra.mxu0 %v956_v17  ;;  %907 = vmatpush3.bf16.msra.mxu1 %v956_v17  ;;  %v964_v21 = vld [vmem:[%s1103_s8] sm:$0xff]   ;;  %v962_v25 = vld [vmem:[%s1101_s7 + $0x8] sm:$0xff]   ;;  %v968_v29 = vld [vmem:[%s1103_s8 + $0x10] sm:$0xff]  }
  0x34   : > { %869 = vmatprep.subr.bf16.mxu0 %v957_v18  ;;  %900 = vmatprep.subr.bf16.mxu1 %v957_v18  ;;  %v965_v22 = vld [vmem:[%s1103_s8 + $0x20] sm:$0xff]   ;;  %v966_v27 = vld [vmem:[%s1103_s8 + $0x8] sm:$0xff]   ;;  %v969_v30 = vld [vmem:[%s1103_s8 + $0x30] sm:$0xff]  }
  0x35   : > { %883 = vmatprep.mubr.bf16.mxu0 %v964_v21  ;;  %891 = vmatprep.mubr.bf16.mxu1 %v965_v22  ;;  %v963_v26 = vld [vmem:[%s1101_s7] sm:$0xff]   ;;  %v967_v28 = vld [vmem:[%s1103_s8 + $0x28] sm:$0xff]   ;;  %v970_v31 = vld [vmem:[%s1103_s8 + $0x18] sm:$0xff]  }
  0x36   : > { %v971_v32 = vld [vmem:[%s1103_s8 + $0x38] sm:$0xff]   ;;  %v378_v33 = vld [vmem:[%s1384_s3 + $0x10] sm:$0xff]  ;;  %v376_v37 = vld [vmem:[%s1384_s3] sm:$0xff] }
  0x37   : > { %870 = vmatpush3.bf16.msra.mxu0 %v957_v18  ;;  %908 = vmatpush3.bf16.msra.mxu1 %v957_v18  ;;  %v386_v34 = vld [vmem:[%s1384_s3 + $0x50] sm:$0xff]  ;;  %v384_v38 = vld [vmem:[%s1384_s3 + $0x40] sm:$0xff]  ;;  %v379_v43 = vld [vmem:[%s1384_s3 + $0x18] sm:$0xff] }
  0x38   : > { %871 = vmatprep.subr.bf16.mxu0 %v958_v19  ;;  %901 = vmatprep.subr.bf16.mxu1 %v958_v19  ;;  %v387_v44 = vld [vmem:[%s1384_s3 + $0x58] sm:$0xff]  ;;  %v377_v49 = vld [vmem:[%s1384_s3 + $0x8] sm:$0xff]  ;;  %v382_v55 = vld [vmem:[%s1384_s3 + $0x30] sm:$0xff] }
  0x39   : > { %v385_v50 = vld [vmem:[%s1384_s3 + $0x48] sm:$0xff]  ;;  %v390_v56 = vld [vmem:[%s1384_s3 + $0x70] sm:$0xff]  ;;  %v380_v61 = vld [vmem:[%s1384_s3 + $0x20] sm:$0xff] }
  0x3a   : > { %v388_v62 = vld [vmem:[%s1384_s3 + $0x60] sm:$0xff]  ;;  %v383_v3 = vld [vmem:[%s1384_s3 + $0x38] sm:$0xff]  ;;  %v381_v9 = vld [vmem:[%s1384_s3 + $0x28] sm:$0xff] }
  0x3b   : > { %872 = vmatpush3.bf16.msra.mxu0 %v958_v19  ;;  %909 = vmatpush3.bf16.msra.mxu1 %v958_v19  ;;  %v391_v4 = vld [vmem:[%s1384_s3 + $0x78] sm:$0xff]  ;;  %v389_v10 = vld [vmem:[%s1384_s3 + $0x68] sm:$0xff] }
  0x3c   : > { %873 = vmatprep.subr.bf16.mxu0 %v959_v20  ;;  %902 = vmatprep.subr.bf16.mxu1 %v959_v20 }
  0x3f   : > { %874 = vmatpush3.bf16.msra.mxu0 %v959_v20  ;;  %910 = vmatpush3.bf16.msra.mxu1 %v959_v20 }
  0x40   : > { %875 = vmatprep.subr.bf16.mxu0 %v960_v23  ;;  %903 = vmatprep.subr.bf16.mxu1 %v960_v23 }
  0x43   : > { %876 = vmatpush3.bf16.msra.mxu0 %v960_v23  ;;  %911 = vmatpush3.bf16.msra.mxu1 %v960_v23 }
  0x44   : > { %877 = vmatprep.subr.bf16.mxu0 %v961_v24  ;;  %904 = vmatprep.subr.bf16.mxu1 %v961_v24 }
  0x47   : > { %878 = vmatpush3.bf16.msra.mxu0 %v961_v24  ;;  %912 = vmatpush3.bf16.msra.mxu1 %v961_v24 }
  0x48   : > { %879 = vmatprep.subr.bf16.mxu0 %v962_v25  ;;  %905 = vmatprep.subr.bf16.mxu1 %v962_v25 }
  0x4b   : > { %880 = vmatpush3.bf16.msra.mxu0 %v962_v25  ;;  %913 = vmatpush3.bf16.msra.mxu1 %v962_v25 }
  0x4c   : > { %881 = vmatprep.subr.bf16.mxu0 %v963_v26  ;;  %906 = vmatprep.subr.bf16.mxu1 %v963_v26 }
  0x4f   : > { %882 = vmatpush3.bf16.msra.mxu0 %v963_v26  ;;  %914 = vmatpush3.bf16.msra.mxu1 %v963_v26 }
  0x52   : > { %884 = vmatmul.mubr.bf16.vlgmr.msra.gmra.mxu0 %v966_v27  ;;  %892 = vmatmul.mubr.bf16.vlgmr.msra.gmra.mxu1 %v967_v28 }
  0x53   : > { %887 = vmatprep.mubr.bf16.mxu0 %v968_v29  ;;  %895 = vmatprep.mubr.bf16.mxu1 %v969_v30 }
  0x5a   : > { %888 = vmatmul.mubr.bf16.gmra.mxu0 %v970_v31  ;;  %896 = vmatmul.mubr.bf16.gmra.mxu1 %v971_v32 }
 0x112   : > { %v885_v35 = vpop.f32.mrf.mxu0  ;;  %v893_v36 = vpop.f32.mrf.mxu1 }
 0x113   : > { %v619_v39 = vadd.f32 %v885_v35, %v378_v33  ;;  %v627_v40 = vadd.f32 %v893_v36, %v386_v34 }
 0x114   : > { %v554_v41 = vpop.f32.mrf.mxu0  ;;  %v586_v42 = vpop.f32.mrf.mxu1 }
 0x115   : > { %635 = vst [vmem:[%s1384_s3 + $0x10] sm:$0xff] %v619_v39  ;;  %643 = vst [vmem:[%s1384_s3 + $0x50] sm:$0xff] %v627_v40  ;;  %v617_v45 = vadd.f32 %v554_v41, %v376_v37  ;;  %v625_v46 = vadd.f32 %v586_v42, %v384_v38 }
 0x116   : > { %v886_v47 = vpop.f32.mrf.mxu0  ;;  %v894_v48 = vpop.f32.mrf.mxu1 }
 0x117   : > { %633 = vst [vmem:[%s1384_s3] sm:$0xff] %v617_v45  ;;  %641 = vst [vmem:[%s1384_s3 + $0x40] sm:$0xff] %v625_v46  ;;  %v620_v51 = vadd.f32 %v886_v47, %v379_v43  ;;  %v628_v52 = vadd.f32 %v894_v48, %v387_v44 }
 0x118   : > { %v557_v53 = vpop.f32.mrf.mxu0  ;;  %v589_v54 = vpop.f32.mrf.mxu1 }
 0x119   : > { %636 = vst [vmem:[%s1384_s3 + $0x18] sm:$0xff] %v620_v51  ;;  %644 = vst [vmem:[%s1384_s3 + $0x58] sm:$0xff] %v628_v52  ;;  %v618_v57 = vadd.f32 %v557_v53, %v377_v49  ;;  %v626_v58 = vadd.f32 %v589_v54, %v385_v50 }
 0x11a   : > { %v889_v59 = vpop.f32.mrf.mxu0  ;;  %v897_v60 = vpop.f32.mrf.mxu1 }
 0x11b   : > { %634 = vst [vmem:[%s1384_s3 + $0x8] sm:$0xff] %v618_v57  ;;  %642 = vst [vmem:[%s1384_s3 + $0x48] sm:$0xff] %v626_v58  ;;  %v623_v63 = vadd.f32 %v889_v59, %v382_v55  ;;  %v631_v0 = vadd.f32 %v897_v60, %v390_v56 }
 0x11c   : > { %v570_v1 = vpop.f32.mrf.mxu0  ;;  %v602_v2 = vpop.f32.mrf.mxu1 }
 0x11d   : > { %639 = vst [vmem:[%s1384_s3 + $0x30] sm:$0xff] %v623_v63  ;;  %647 = vst [vmem:[%s1384_s3 + $0x70] sm:$0xff] %v631_v0  ;;  %v621_v5 = vadd.f32 %v570_v1, %v380_v61  ;;  %v629_v6 = vadd.f32 %v602_v2, %v388_v62 }
 0x11e   : > { %v890_v7 = vpop.f32.mrf.mxu0  ;;  %v898_v8 = vpop.f32.mrf.mxu1 }
 0x11f   : > { %637 = vst [vmem:[%s1384_s3 + $0x20] sm:$0xff] %v621_v5  ;;  %645 = vst [vmem:[%s1384_s3 + $0x60] sm:$0xff] %v629_v6  ;;  %v624_v11 = vadd.f32 %v890_v7, %v383_v3  ;;  %v632_v12 = vadd.f32 %v898_v8, %v391_v4  ;;  %652 = sbr.rel (%p845_p11) target bundleno = 304 (0x130), region = 81 }
 0x120   : > { %v573_v13 = vpop.f32.mrf.mxu0  ;;  %v605_v14 = vpop.f32.mrf.mxu1 }
 0x121   : > { %640 = vst [vmem:[%s1384_s3 + $0x38] sm:$0xff] %v624_v11  ;;  %648 = vst [vmem:[%s1384_s3 + $0x78] sm:$0xff] %v632_v12  ;;  %v622_v15 = vadd.f32 %v573_v13, %v381_v9  ;;  %v630_v16 = vadd.f32 %v605_v14, %v389_v10 }
 0x123   : > { %638 = vst [vmem:[%s1384_s3 + $0x28] sm:$0xff] %v622_v15  ;;  %646 = vst [vmem:[%s1384_s3 + $0x68] sm:$0xff] %v630_v16 }
 0x124   : > { %v653_v17 = vld [vmem:[%s1384_s3] sm:$0xff]  ;;  %v654_v19 = vld [vmem:[%s1384_s3 + $0x8] sm:$0xff]  ;;  %v655_v22 = vld [vmem:[%s1384_s3 + $0x10] sm:$0xff] }
 0x125   : > { %v846_v18 = vld [vmem:[%s1383_s2] ss:$0 sm:$0xff]  ;;  %v656_v23 = vld [vmem:[%s1384_s3 + $0x18] sm:$0xff]  ;;  %v659_v29 = vld [vmem:[%s1384_s3 + $0x30] sm:$0xff] }
 0x126   : > { %v676_v20 = vadd.f32 %v846_v18, %v653_v17  ;;  %v677_v21 = vadd.f32 %v846_v18, %v654_v19  ;;  %v657_v24 = vld [vmem:[%s1384_s3 + $0x20] sm:$0xff]  ;;  %v678_v25 = vadd.f32 %v846_v18, %v655_v22  ;;  %v679_v26 = vadd.f32 %v846_v18, %v656_v23  ;;  %v662_v35 = vld [vmem:[%s1384_s3 + $0x48] sm:$0xff]  ;;  %v663_v36 = vld [vmem:[%s1384_s3 + $0x50] sm:$0xff] }
 0x127   : > { %v680_v27 = vadd.f32 %v846_v18, %v657_v24  ;;  %v682_v32 = vadd.f32 %v846_v18, %v659_v29  ;;  %v661_v34 = vld [vmem:[%s1384_s3 + $0x40] sm:$0xff]  ;;  %v685_v38 = vadd.f32 %v846_v18, %v662_v35  ;;  %v686_v39 = vadd.f32 %v846_v18, %v663_v36  ;;  %v664_v40 = vld [vmem:[%s1384_s3 + $0x58] sm:$0xff]  ;;  %v667_v46 = vld [vmem:[%s1384_s3 + $0x70] sm:$0xff] }
 0x128   : > { %v660_v30 = vld [vmem:[%s1384_s3 + $0x38] sm:$0xff]  ;;  %692 = vst [vmem:[%s1384_s3] sm:$0xff] %v676_v20  ;;  %693 = vst [vmem:[%s1384_s3 + $0x8] sm:$0xff] %v677_v21  ;;  %v684_v37 = vadd.f32 %v846_v18, %v661_v34  ;;  %v665_v41 = vld [vmem:[%s1384_s3 + $0x60] sm:$0xff]  ;;  %v687_v43 = vadd.f32 %v846_v18, %v664_v40  ;;  %v690_v48 = vadd.f32 %v846_v18, %v667_v46 }
 0x129   : > { %v683_v33 = vadd.f32 %v846_v18, %v660_v30  ;;  %694 = vst [vmem:[%s1384_s3 + $0x10] sm:$0xff] %v678_v25  ;;  %695 = vst [vmem:[%s1384_s3 + $0x18] sm:$0xff] %v679_v26  ;;  %v688_v44 = vadd.f32 %v846_v18, %v665_v41  ;;  %v668_v47 = vld [vmem:[%s1384_s3 + $0x78] sm:$0xff] }
 0x12a   : > { %v658_v28 = vld [vmem:[%s1384_s3 + $0x28] sm:$0xff]  ;;  %696 = vst [vmem:[%s1384_s3 + $0x20] sm:$0xff] %v680_v27  ;;  %698 = vst [vmem:[%s1384_s3 + $0x30] sm:$0xff] %v682_v32  ;;  %v691_v49 = vadd.f32 %v846_v18, %v668_v47 }
 0x12b   : > { %v681_v31 = vadd.f32 %v846_v18, %v658_v28  ;;  %v666_v42 = vld [vmem:[%s1384_s3 + $0x68] sm:$0xff]  ;;  %699 = vst [vmem:[%s1384_s3 + $0x38] sm:$0xff] %v683_v33  ;;  %700 = vst [vmem:[%s1384_s3 + $0x40] sm:$0xff] %v684_v37 }
 0x12c   : > { %v689_v45 = vadd.f32 %v846_v18, %v666_v42  ;;  %701 = vst [vmem:[%s1384_s3 + $0x48] sm:$0xff] %v685_v38  ;;  %702 = vst [vmem:[%s1384_s3 + $0x50] sm:$0xff] %v686_v39 }
 0x12d   : > { %697 = vst [vmem:[%s1384_s3 + $0x28] sm:$0xff] %v681_v31  ;;  %703 = vst [vmem:[%s1384_s3 + $0x58] sm:$0xff] %v687_v43 }
 0x12e   : > { %704 = vst [vmem:[%s1384_s3 + $0x60] sm:$0xff] %v688_v44  ;;  %705 = vst [vmem:[%s1384_s3 + $0x68] sm:$0xff] %v689_v45 }
 0x12f   : > { %706 = vst [vmem:[%s1384_s3 + $0x70] sm:$0xff] %v690_v48  ;;  %707 = vst [vmem:[%s1384_s3 + $0x78] sm:$0xff] %v691_v49 }
 0x130 PF: > { %s13_s16 = sadd.s32 1, %s1010_s16   ;;  %s1385_s12 = smov %s998_s13 }
 0x131   : > { %p10_p12 = scmp.ge.s32.totalorder %s13_s16, 7   ;;  %s1386_s13 = smov %s1068_s20 }
 0x132   : > { %s1387_s14 = smov %s1006_s15  ;;  %s1388_s15 = smov %s1390_s17 }
 0x133   :  { %12 = sbr.rel (!%p10_p12) target bundleno = 3 (0x3), region = 122 }

// kernel: generator_forward.22
= control target key start
LH: loop header
LB: loop body
LE: loop exit
PB: predicated region body
PF: predicated region fallthrough
CT: control target
= control target key end

     0   :  { %s383_s6 = smov 0   ;;  %s385_s7 = smov 0   ;;  %s423_s0 = inlined_call_operand.vmem [shape: f32[2,64,128], index: 0, kind: input, shape index: {}]   ;;  %s424_s1 = inlined_call_operand.vmem [shape: f32[2,64,128], index: 1, kind: output, shape index: {}]  }
   0x1   :  { %s387_s8 = smov 0  }
   0x2 LB: > { %s23_s9 = sadd.s32 1, %s367_s7  ;;  %p314_p0 = scmp.ge.s32.totalorder %s371_s8, 1  ;;  %s371_s8 = sphi %s387_s8, %s11_s8   ;;  %s367_s7 = sphi %s385_s7, %s426_s7   ;;  %s363_s6 = sphi %s383_s6, %s425_s6  }
   0x3   : > { %p25_p1 = scmp.ge.s32.totalorder %s23_s9, 2  ;;  %p106_p2 = scmp.lt.s32.totalorder %s371_s8, 3 }
   0x5   : > { %s428_s9 = smov (%p25_p1, %s23_s9), 0  ;;  %p107_p3 = pnand %p314_p0, %p106_p2 }
   0x6   : > { %p132_p4 = scmp.lt.s32.totalorder (!%p107_p3), %s363_s6, 1 }
   0x7   : > { %110 = sbr.rel (%p107_p3) target bundleno = 100 (0x64), region = 24 }
   0xc   : > { %s430_s6 = smov (!%p132_p4, %s363_s6), 1 }
   0xd   : > { %s321_s10 = sshll.u32 %s430_s6, 6 }
   0xe   : > { %s139_s13 = scalar_lea.vmem %s423_s0, %s321_s10  ;;  %s147_s16 = scalar_lea.vmem %s424_s1, %s321_s10 }
   0xf   : > { %v148_v0 = vld [vmem:[%s139_s13] sm:$0xff]  ;;  %v149_v1 = vld [vmem:[%s139_s13 + $0x8] sm:$0xff]  ;;  %v150_v2 = vld [vmem:[%s139_s13 + $0x10] sm:$0xff] }
  0x10   : > { %v156_v3 = vadd.f32 %v149_v1, %v148_v0  ;;  %v151_v4 = vld [vmem:[%s139_s13 + $0x18] sm:$0xff]  ;;  %v152_v6 = vld [vmem:[%s139_s13 + $0x20] sm:$0xff]  ;;  %v153_v8 = vld [vmem:[%s139_s13 + $0x28] sm:$0xff] }
  0x11   : > { %v154_v10 = vld [vmem:[%s139_s13 + $0x30] sm:$0xff]  ;;  %v155_v12 = vld [vmem:[%s139_s13 + $0x38] sm:$0xff] }
  0x12   : > { %v157_v5 = vadd.f32 %v156_v3, %v150_v2 }
  0x14   : > { %v158_v7 = vadd.f32 %v157_v5, %v151_v4 }
  0x16   : > { %v159_v9 = vadd.f32 %v158_v7, %v152_v6 }
  0x18   : > { %v160_v11 = vadd.f32 %v159_v9, %v153_v8 }
  0x1a   : > { %v161_v13 = vadd.f32 %v160_v11, %v154_v10 }
  0x1c   : > { %v162_v14 = vadd.f32 %v161_v13, %v155_v12 }
  0x1e   : > { %v163_v15 = vrot.slane %v162_v14, 4 }
  0x20   : > { %v164_v16 = vadd.f32 %v163_v15, %v162_v14 }
  0x22   : > { %v165_v17 = vrot.slane %v164_v16, 2 }
  0x24   : > { %v166_v18 = vadd.f32 %v165_v17, %v164_v16 }
  0x26   : > { %v167_v19 = vrot.slane %v166_v18, 1 }
  0x28   : > { %v168_v20 = vadd.f32 %v167_v19, %v166_v18 }
  0x2a   : > { %v170_v21 = vmul.f32 0.015625, %v168_v20 }
  0x2c   : > { %v171_v22 = vsub.f32 %v148_v0, %v170_v21  ;;  %v172_v23 = vsub.f32 %v149_v1, %v170_v21  ;;  %v173_v24 = vsub.f32 %v150_v2, %v170_v21  ;;  %v174_v25 = vsub.f32 %v151_v4, %v170_v21 }
  0x2d   : > { %v175_v26 = vsub.f32 %v152_v6, %v170_v21  ;;  %v176_v30 = vsub.f32 %v153_v8, %v170_v21  ;;  %v177_v33 = vsub.f32 %v154_v10, %v170_v21  ;;  %v178_v36 = vsub.f32 %v155_v12, %v170_v21 }
  0x2e   : > { %v179_v27 = vmul.f32 %v171_v22, %v171_v22  ;;  %v180_v28 = vmul.f32 %v172_v23, %v172_v23  ;;  %v181_v29 = vmul.f32 %v173_v24, %v173_v24  ;;  %v182_v31 = vmul.f32 %v174_v25, %v174_v25 }
  0x2f   : > { %v183_v34 = vmul.f32 %v175_v26, %v175_v26  ;;  %v184_v37 = vmul.f32 %v176_v30, %v176_v30  ;;  %v185_v39 = vmul.f32 %v177_v33, %v177_v33  ;;  %v186_v41 = vmul.f32 %v178_v36, %v178_v36 }
  0x30   : > { %v187_v32 = vadd.f32 %v180_v28, %v179_v27 }
  0x32   : > { %v188_v35 = vadd.f32 %v187_v32, %v181_v29 }
  0x34   : > { %v189_v38 = vadd.f32 %v188_v35, %v182_v31 }
  0x36   : > { %v190_v40 = vadd.f32 %v189_v38, %v183_v34 }
  0x38   : > { %v191_v42 = vadd.f32 %v190_v40, %v184_v37 }
  0x3a   : > { %v192_v43 = vadd.f32 %v191_v42, %v185_v39 }
  0x3c   : > { %v193_v44 = vadd.f32 %v192_v43, %v186_v41 }
  0x3e   : > { %v194_v45 = vrot.slane %v193_v44, 4 }
  0x40   : > { %v195_v46 = vadd.f32 %v194_v45, %v193_v44 }
  0x42   : > { %v196_v47 = vrot.slane %v195_v46, 2 }
  0x44   : > { %v197_v48 = vadd.f32 %v196_v47, %v195_v46 }
  0x46   : > { %v198_v49 = vrot.slane %v197_v48, 1 }
  0x48   : > { %v199_v50 = vadd.f32 %v198_v49, %v197_v48 }
  0x4a   : > { %v200_v51 = vmul.f32 0.015625, %v199_v50 }
  0x4c   : > { %v201_v52 = vadd.f32 1e-05, %v200_v51 }
  0x4e   : > { %347 = vrsqrt.f32 %v201_v52 }
  0x5b   : > { %v348_v53 = vpop.eup %347 }
  0x5c   : > { %v203_v54 = vmul.f32 %v348_v53, %v171_v22  ;;  %v204_v55 = vmul.f32 %v348_v53, %v172_v23  ;;  %v205_v56 = vmul.f32 %v348_v53, %v173_v24  ;;  %v206_v57 = vmul.f32 %v348_v53, %v174_v25 }
  0x5d   : > { %v207_v58 = vmul.f32 %v348_v53, %v175_v26  ;;  %v208_v59 = vmul.f32 %v348_v53, %v176_v30  ;;  %v209_v60 = vmul.f32 %v348_v53, %v177_v33  ;;  %v210_v61 = vmul.f32 %v348_v53, %v178_v36 }
  0x5e   : > { %v211_v62 = vmax.f32 %v203_v54, 0.0  ;;  %v212_v63 = vmax.f32 %v204_v55, 0.0  ;;  %v213_v0 = vmax.f32 %v205_v56, 0.0  ;;  %v214_v1 = vmax.f32 %v206_v57, 0.0 }
  0x5f   : > { %v215_v2 = vmax.f32 %v207_v58, 0.0  ;;  %v216_v3 = vmax.f32 %v208_v59, 0.0  ;;  %v217_v4 = vmax.f32 %v209_v60, 0.0  ;;  %v218_v5 = vmax.f32 %v210_v61, 0.0 }
  0x60   : > { %219 = vst [vmem:[%s147_s16] sm:$0xff] %v211_v62  ;;  %220 = vst [vmem:[%s147_s16 + $0x8] sm:$0xff] %v212_v63 }
  0x61   : > { %221 = vst [vmem:[%s147_s16 + $0x10] sm:$0xff] %v213_v0  ;;  %222 = vst [vmem:[%s147_s16 + $0x18] sm:$0xff] %v214_v1 }
  0x62   : > { %223 = vst [vmem:[%s147_s16 + $0x20] sm:$0xff] %v215_v2  ;;  %224 = vst [vmem:[%s147_s16 + $0x28] sm:$0xff] %v216_v3 }
  0x63   : > { %225 = vst [vmem:[%s147_s16 + $0x30] sm:$0xff] %v217_v4  ;;  %226 = vst [vmem:[%s147_s16 + $0x38] sm:$0xff] %v218_v5 }
  0x64 PF: > { %s11_s8 = sadd.s32 1, %s371_s8   ;;  %s425_s6 = smov %s367_s7 }
  0x65   : > { %p8_p5 = scmp.ge.s32.totalorder %s11_s8, 4   ;;  %s426_s7 = smov %s428_s9 }
  0x67   :  { %10 = sbr.rel (!%p8_p5) target bundleno = 2 (0x2), region = 54 }

// kernel: generator_forward.23
= control target key start
LH: loop header
LB: loop body
LE: loop exit
PB: predicated region body
PF: predicated region fallthrough
CT: control target
= control target key end

     0   :  { %s1217_s12 = smov 0   ;;  %s1219_s13 = smov 0   ;;  %s1467_s0 = inlined_call_operand.vmem [shape: bf16[32,1152], index: 0, kind: input, shape index: {}]   ;;  %s1468_s1 = inlined_call_operand.vmem [shape: bf16[1152,256], index: 1, kind: input, shape index: {}]   ;;  %s1469_s2 = inlined_call_operand.vmem [shape: f32[1,256], index: 2, kind: input, shape index: {}]   ;;  %s1470_s3 = inlined_call_operand.vmem [shape: f32[32,256], index: 3, kind: output, shape index: {}]  }
   0x1   :  { %s1221_s14 = smov 0   ;;  %s1223_s15 = smov 0  }
   0x2   :  { %s1225_s16 = smov 0  }
   0x3 LB: > { %s25_s17 = sadd.s32 1, %s1189_s15  ;;  %p48_p1 = scmp.ne.s32.totalorder %s1181_s13, %s1177_s12  ;;  %s1193_s16 = sphi %s1225_s16, %s13_s16   ;;  %s1189_s15 = sphi %s1223_s15, %s1474_s15   ;;  %s1185_s14 = sphi %s1221_s14, %s1473_s14   ;;  %s1181_s13 = sphi %s1219_s13, %s1472_s13   ;;  %s1177_s12 = sphi %s1217_s12, %s1471_s12  }
   0x4   : > { %p26_p0 = scmp.ge.s32.totalorder %s25_s17, 3  ;;  %p49_p2 = scmp.eq.s32.totalorder %s1193_s16, 0 }
   0x5   : > { %s41_s19 = sadd.s32 1, %s1181_s13  ;;  %p956_p5 = scmp.ge.s32.totalorder %s1193_s16, 3 }
   0x6   : > { %s1476_s17 = smov (%p26_p0, %s25_s17), 0  ;;  %p50_p3 = por %p49_p2, %p48_p1 }
   0x7   : > { %s37_s18 = ssub.s32 %s1189_s15, %s1476_s17  ;;  %164 = sbr.rel (%p956_p5) target bundleno = 21 (0x15), region = 20 }
   0x8   : > { %p39_p4 = scmp.eq.s32.totalorder %s37_s18, 0 }
   0xa   : > { %s1252_s20 = scalar_select %p39_p4, %s1181_s13, %s41_s19  }
   0xc   : > { %167 = sbr.rel (!%p50_p3) target bundleno = 21 (0x15), region = 24  ;;  %s169_s21 = sand.u32 (%p50_p3), 1, %s1181_s13  }
   0xd   : > { %s1029_s22 = smul.u32 (%p50_p3), 12, %s1189_s15 }
   0xe   : > { %s1031_s23 = smul.u32 (%p50_p3), 48, %s169_s21 }
   0xf   : > { %s177_s26 = scalar_lea.vmem (%p50_p3), %s1467_s0, %s1029_s22 }
  0x10   : > { %v192_v0 = vld [vmem:[%s177_s26] sm:$0xff] (%p50_p3)  ;;  %v196_v2 = vld [vmem:[%s177_s26 + $0x48] sm:$0xff] (%p50_p3)  ;;  %s171_s27 = scalar_lea.vmem (%p50_p3), [#allocation2], %s1031_s23  ;;  %v962_v6 = vld [vmem:[%s177_s26 + $0x50] sm:$0xf] (%p50_p3) }
  0x11   : > { %v194_v1 = vld [vmem:[%s177_s26 + $0x24] sm:$0xff]  ;;  %193 = vst [vmem:[%s171_s27] sm:$0xff] %v192_v0  ;;  %197 = vst [vmem:[%s171_s27 + $0x18] sm:$0xff] %v196_v2  ;;  %v198_v3 = vld [vmem:[%s177_s26 + $0x6c] sm:$0xff] }
  0x12   : > { %195 = vst [vmem:[%s171_s27 + $0xc] sm:$0xff] %v194_v1  ;;  %v958_v4 = vld [vmem:[%s177_s26 + $0x8] sm:$0xf]  ;;  %v960_v5 = vld [vmem:[%s177_s26 + $0x2c] sm:$0xf]  ;;  %199 = vst [vmem:[%s171_s27 + $0x24] sm:$0xff] %v198_v3 }
  0x13   : > { %959 = vst [vmem:[%s171_s27 + $0x8] sm:$0xf] %v958_v4  ;;  %961 = vst [vmem:[%s171_s27 + $0x14] sm:$0xf] %v960_v5  ;;  %v964_v7 = vld [vmem:[%s177_s26 + $0x74] sm:$0xf] }
  0x14   : > { %963 = vst [vmem:[%s171_s27 + $0x20] sm:$0xf] %v962_v6  ;;  %965 = vst [vmem:[%s171_s27 + $0x2c] sm:$0xf] %v964_v7 }
  0x15 PF: > { %p966_p6 = scmp.ge.s32.totalorder %s1193_s16, 1  ;;  %p235_p7 = scmp.lt.s32.totalorder %s1193_s16, 4 }
  0x17   : > { %p236_p8 = pnand %p966_p6, %p235_p7 }
  0x18   : > { %s242_s28 = sand.u32 (!%p236_p8), 1, %s1177_s12   ;;  %s286_s29 = smul.u32 (!%p236_p8), 48, %s1185_s14 }
  0x19   : > { %239 = sbr.rel (%p236_p8) target bundleno = 331 (0x14b), region = 54  ;;  %p969_p10 = scmp.ne.s32.totalorder (!%p236_p8), %s1185_s14, 0 }
  0x1a   : > { %s1032_s30 = smul.u32 (!%p236_p8), 48, %s242_s28  ;;  %p288_p9 = scmp.lt.s32.totalorder (!%p236_p8), %s286_s29, 143 }
  0x1c   : > { %s1269_s8 = scalar_lea.vmem (!%p236_p8), [#allocation2], %s1032_s30 }
  0x1e   : > { %s1478_s29 = smov (!%p288_p9, %s286_s29), 143  ;;  %319 = sbr.rel (%p969_p10) target bundleno = 40 (0x28), region = 62 }
  0x1f   : > { %s1030_s4 = sshll.u32 %s1478_s29, 3 }
  0x20   : > { %s1267_s7 = scalar_lea.vmem %s1468_s1, %s1030_s4 }
  0x23   : > { %v1195_v8 = vmov 0.0  }
  0x24   : > { %320 = vst [vmem:[%s1470_s3] sm:$0xff] %v1195_v8  ;;  %321 = vst [vmem:[%s1470_s3 + $0x8] sm:$0xff] %v1195_v8 }
  0x25   : > { %322 = vst [vmem:[%s1470_s3 + $0x10] sm:$0xff] %v1195_v8  ;;  %323 = vst [vmem:[%s1470_s3 + $0x18] sm:$0xff] %v1195_v8 }
  0x26   : > { %324 = vst [vmem:[%s1470_s3 + $0x20] sm:$0xff] %v1195_v8  ;;  %325 = vst [vmem:[%s1470_s3 + $0x28] sm:$0xff] %v1195_v8 }
  0x27   : > { %326 = vst [vmem:[%s1470_s3 + $0x30] sm:$0xff] %v1195_v8  ;;  %327 = vst [vmem:[%s1470_s3 + $0x38] sm:$0xff] %v1195_v8 }
  0x28 PF: > { %v1075_v9 = vld [vmem:[%s1267_s7 + $0x74] ss:$8 sps:$4 sm:$0xff]   ;;  %v1077_v10 = vld [vmem:[%s1267_s7 + $0x70] ss:$8 sps:$4 sm:$0xff]   ;;  %v1196_v11 = vmov 0   ;;  %p1024_p11 = scmp.ne.s32.totalorder %s1185_s14, 2 }
  0x29   : > { %749 = vmatprep.mubr.bf16.mxu1 %v1196_v11  ;;  %664 = vmatprep.subr.bf16.mxu0 %v1075_v9  ;;  %v1078_v12 = vld [vmem:[%s1267_s7 + $0x64] ss:$8 sps:$4 sm:$0xff]   ;;  %v1080_v13 = vld [vmem:[%s1267_s7 + $0x60] ss:$8 sps:$4 sm:$0xff]   ;;  %v1081_v14 = vld [vmem:[%s1267_s7 + $0x54] ss:$8 sps:$4 sm:$0xff]  }
  0x2a   : > { %665 = vmatpush1.bf16.msra.mxu0 %v1077_v10  ;;  %v1083_v15 = vld [vmem:[%s1267_s7 + $0x50] ss:$8 sps:$4 sm:$0xff]   ;;  %v1084_v16 = vld [vmem:[%s1267_s7 + $0x44] ss:$8 sps:$4 sm:$0xff]   ;;  %v1096_v17 = vld [vmem:[%s1267_s7 + $0x174] ss:$8 sps:$4 sm:$0xff]  }
  0x2b   : > { %666 = vmatprep.subr.bf16.mxu0 %v1078_v12  ;;  %v1098_v18 = vld [vmem:[%s1267_s7 + $0x170] ss:$8 sps:$4 sm:$0xff]   ;;  %v1086_v19 = vld [vmem:[%s1267_s7 + $0x40] ss:$8 sps:$4 sm:$0xff]   ;;  %v1087_v20 = vld [vmem:[%s1267_s7 + $0x34] ss:$8 sps:$4 sm:$0xff]   ;;  %717 = vmatprep.subr.bf16.mxu1 %v1096_v17 }
  0x2c   : > { %v1102_v21 = vld [vmem:[%s1267_s7 + $0x164] ss:$8 sps:$4 sm:$0xff]   ;;  %718 = vmatpush1.bf16.msra.mxu1 %v1098_v18  ;;  %v1104_v22 = vld [vmem:[%s1267_s7 + $0x160] ss:$8 sps:$4 sm:$0xff]   ;;  %v1089_v23 = vld [vmem:[%s1267_s7 + $0x30] ss:$8 sps:$4 sm:$0xff]  }
  0x2d   : > { %719 = vmatprep.subr.bf16.mxu1 %v1102_v21  ;;  %v1108_v24 = vld [vmem:[%s1267_s7 + $0x154] ss:$8 sps:$4 sm:$0xff]   ;;  %v1090_v25 = vld [vmem:[%s1267_s7 + $0x24] ss:$8 sps:$4 sm:$0xff]   ;;  %v1110_v26 = vld [vmem:[%s1267_s7 + $0x150] ss:$8 sps:$4 sm:$0xff]  }
  0x2e   : > { %667 = vmatpush1.bf16.msra.mxu0 %v1080_v13  ;;  %v1114_v27 = vld [vmem:[%s1267_s7 + $0x144] ss:$8 sps:$4 sm:$0xff]   ;;  %v1092_v28 = vld [vmem:[%s1267_s7 + $0x20] ss:$8 sps:$4 sm:$0xff]   ;;  %v1093_v29 = vld [vmem:[%s1267_s7 + $0x14] ss:$8 sps:$4 sm:$0xff]  }
  0x2f   : > { %668 = vmatprep.subr.bf16.mxu0 %v1081_v14  ;;  %v1116_v30 = vld [vmem:[%s1267_s7 + $0x140] ss:$8 sps:$4 sm:$0xff]   ;;  %v1120_v31 = vld [vmem:[%s1267_s7 + $0x134] ss:$8 sps:$4 sm:$0xff]   ;;  %v1095_v32 = vld [vmem:[%s1267_s7 + $0x10] ss:$8 sps:$4 sm:$0xff]  }
  0x30   : > { %720 = vmatpush1.bf16.msra.mxu1 %v1104_v22  ;;  %v1099_v33 = vld [vmem:[%s1267_s7 + $0x4] ss:$8 sps:$4 sm:$0xff]   ;;  %v1122_v34 = vld [vmem:[%s1267_s7 + $0x130] ss:$8 sps:$4 sm:$0xff]   ;;  %v1101_v36 = vld [vmem:[%s1267_s7] ss:$8 sps:$4 sm:$0xff]  }
  0x31   : > { %721 = vmatprep.subr.bf16.mxu1 %v1108_v24  ;;  %v1126_v35 = vld [vmem:[%s1267_s7 + $0x124] ss:$8 sps:$4 sm:$0xff]   ;;  %v1105_v37 = vld [vmem:[%s1267_s7 + $0xf4] ss:$8 sps:$4 sm:$0xff]   ;;  %v1128_v38 = vld [vmem:[%s1267_s7 + $0x120] ss:$8 sps:$4 sm:$0xff]  }
  0x32   : > { %669 = vmatpush1.bf16.msra.mxu0 %v1083_v15  ;;  %v1132_v39 = vld [vmem:[%s1267_s7 + $0x114] ss:$8 sps:$4 sm:$0xff]   ;;  %v1107_v40 = vld [vmem:[%s1267_s7 + $0xf0] ss:$8 sps:$4 sm:$0xff]   ;;  %v1111_v41 = vld [vmem:[%s1267_s7 + $0xe4] ss:$8 sps:$4 sm:$0xff]  }
  0x33   : > { %670 = vmatprep.subr.bf16.mxu0 %v1084_v16  ;;  %v1134_v42 = vld [vmem:[%s1267_s7 + $0x110] ss:$8 sps:$4 sm:$0xff]   ;;  %v1138_v43 = vld [vmem:[%s1267_s7 + $0x104] ss:$8 sps:$4 sm:$0xff]   ;;  %v1113_v45 = vld [vmem:[%s1267_s7 + $0xe0] ss:$8 sps:$4 sm:$0xff]  }
  0x34   : > { %722 = vmatpush1.bf16.msra.mxu1 %v1110_v26  ;;  %v1150_v44 = vld [vmem:[%s1269_s8 + $0x4] ss:$12 sps:$4 sm:$0xff]   ;;  %v1144_v50 = vld [vmem:[%s1269_s8 + $0x8] ss:$12 sps:$4 sm:$0xff]   ;;  %v1151_v55 = vld [vmem:[%s1269_s8 + $0x20] ss:$12 sps:$4 sm:$0xff]  }
  0x35   : > { %723 = vmatprep.subr.bf16.mxu1 %v1114_v27  ;;  %v1117_v46 = vld [vmem:[%s1267_s7 + $0xd4] ss:$8 sps:$4 sm:$0xff]   ;;  %696 = vmatprep.mubr.bf16.mxu0 %v1150_v44  ;;  %v1140_v47 = vld [vmem:[%s1267_s7 + $0x100] ss:$8 sps:$4 sm:$0xff]   ;;  %v1119_v48 = vld [vmem:[%s1267_s7 + $0xd0] ss:$8 sps:$4 sm:$0xff]  }
  0x36   : > { %671 = vmatpush1.bf16.msra.mxu0 %v1086_v19  ;;  %v1123_v49 = vld [vmem:[%s1267_s7 + $0xc4] ss:$8 sps:$4 sm:$0xff]   ;;  %v1125_v51 = vld [vmem:[%s1267_s7 + $0xc0] ss:$8 sps:$4 sm:$0xff]   ;;  %v1129_v52 = vld [vmem:[%s1267_s7 + $0xb4] ss:$8 sps:$4 sm:$0xff]  }
  0x37   : > { %672 = vmatprep.subr.bf16.mxu0 %v1087_v20  ;;  %v1131_v53 = vld [vmem:[%s1267_s7 + $0xb0] ss:$8 sps:$4 sm:$0xff]   ;;  %v1135_v54 = vld [vmem:[%s1267_s7 + $0xa4] ss:$8 sps:$4 sm:$0xff]   ;;  %v1137_v56 = vld [vmem:[%s1267_s7 + $0xa0] ss:$8 sps:$4 sm:$0xff]  }
  0x38   : > { %724 = vmatpush1.bf16.msra.mxu1 %v1116_v30  ;;  %v1141_v57 = vld [vmem:[%s1267_s7 + $0x94] ss:$8 sps:$4 sm:$0xff]   ;;  %v1143_v58 = vld [vmem:[%s1267_s7 + $0x90] ss:$8 sps:$4 sm:$0xff]   ;;  %v1145_v59 = vld [vmem:[%s1267_s7 + $0x84] ss:$8 sps:$4 sm:$0xff]  }
  0x39   : > { %725 = vmatprep.subr.bf16.mxu1 %v1120_v31  ;;  %v1147_v60 = vld [vmem:[%s1267_s7 + $0x80] ss:$8 sps:$4 sm:$0xff]   ;;  %v330_v12 = vld [vmem:[%s1470_s3 + $0x10] sm:$0xff]  ;;  %v331_v17 = vld [vmem:[%s1470_s3 + $0x18] sm:$0xff] }
  0x3a   : > { %673 = vmatpush1.bf16.msra.mxu0 %v1089_v23  ;;  %v1148_v61 = vld [vmem:[%s1269_s8] ss:$12 sps:$4 sm:$0xff]   ;;  %v1152_v62 = vld [vmem:[%s1269_s8 + $0x1c] ss:$12 sps:$4 sm:$0xff]   ;;  %v1154_v63 = vld [vmem:[%s1269_s8 + $0x18] ss:$12 sps:$4 sm:$0xff]  }
  0x3b   : > { %674 = vmatprep.subr.bf16.mxu0 %v1090_v25  ;;  %v328_v4 = vld [vmem:[%s1470_s3] sm:$0xff]  ;;  %v329_v7 = vld [vmem:[%s1470_s3 + $0x8] sm:$0xff]  ;;  %v334_v30 = vld [vmem:[%s1470_s3 + $0x30] sm:$0xff] }
  0x3c   : > { %726 = vmatpush1.bf16.msra.mxu1 %v1122_v34  ;;  %v332_v21 = vld [vmem:[%s1470_s3 + $0x20] sm:$0xff]  ;;  %v333_v26 = vld [vmem:[%s1470_s3 + $0x28] sm:$0xff] }
  0x3d   : > { %727 = vmatprep.subr.bf16.mxu1 %v1126_v35  ;;  %v335_v35 = vld [vmem:[%s1470_s3 + $0x38] sm:$0xff] }
  0x3e   : > { %675 = vmatpush1.bf16.msra.mxu0 %v1092_v28 }
  0x3f   : > { %676 = vmatprep.subr.bf16.mxu0 %v1093_v29 }
  0x40   : > { %728 = vmatpush1.bf16.msra.mxu1 %v1128_v38 }
  0x41   : > { %729 = vmatprep.subr.bf16.mxu1 %v1132_v39 }
  0x42   : > { %677 = vmatpush1.bf16.msra.mxu0 %v1095_v32 }
  0x43   : > { %678 = vmatprep.subr.bf16.mxu0 %v1099_v33 }
  0x44   : > { %730 = vmatpush1.bf16.msra.mxu1 %v1134_v42 }
  0x45   : > { %731 = vmatprep.subr.bf16.mxu1 %v1138_v43 }
  0x46   : > { %679 = vmatpush1.bf16.msra.mxu0 %v1101_v36 }
  0x47   : > { %680 = vmatprep.subr.bf16.mxu0 %v1105_v37 }
  0x48   : > { %732 = vmatpush1.bf16.msra.mxu1 %v1140_v47 }
  0x4a   : > { %681 = vmatpush2.bf16.msra.mxu0 %v1107_v40 }
  0x4b   : > { %682 = vmatprep.subr.bf16.mxu0 %v1111_v41  ;;  %750 = vmatmul.mubr.bf16.vlgmr.msra.gmra.mxu1 %v1144_v50 }
  0x4c   : > { %759 = vmatprep.mubr.bf16.mxu1 %v1196_v11 }
  0x4e   : > { %683 = vmatpush2.bf16.msra.mxu0 %v1113_v45 }
  0x4f   : > { %684 = vmatprep.subr.bf16.mxu0 %v1117_v46 }
  0x52   : > { %685 = vmatpush2.bf16.msra.mxu0 %v1119_v48 }
  0x53   : > { %686 = vmatprep.subr.bf16.mxu0 %v1123_v49  ;;  %760 = vmatmul.mubr.bf16.gmra.mxu1 %v1151_v55 }
  0x56   : > { %687 = vmatpush2.bf16.msra.mxu0 %v1125_v51 }
  0x57   : > { %688 = vmatprep.subr.bf16.mxu0 %v1129_v52 }
  0x5a   : > { %689 = vmatpush2.bf16.msra.mxu0 %v1131_v53 }
  0x5b   : > { %690 = vmatprep.subr.bf16.mxu0 %v1135_v54 }
  0x5e   : > { %691 = vmatpush2.bf16.msra.mxu0 %v1137_v56 }
  0x5f   : > { %692 = vmatprep.subr.bf16.mxu0 %v1141_v57 }
  0x62   : > { %693 = vmatpush2.bf16.msra.mxu0 %v1143_v58 }
  0x63   : > { %694 = vmatprep.subr.bf16.mxu0 %v1145_v59 }
  0x66   : > { %695 = vmatpush2.bf16.msra.mxu0 %v1147_v60 }
  0x69   : > { %697 = vmatmul.mubr.bf16.vlgmr.msra.gmra.mxu0 %v1148_v61 }
  0x6a   : > { %706 = vmatprep.mubr.bf16.mxu0 %v1152_v62 }
  0x71   : > { %707 = vmatmul.mubr.bf16.gmra.mxu0 %v1154_v63 }
 0x10b   : > { %v751_v0 = vpop.f32.mrf.mxu1 }
 0x10d   : > { %v753_v1 = vpop.f32.mrf.mxu1 }
 0x10f   : > { %v755_v2 = vpop.f32.mrf.mxu1 }
 0x111   : > { %v757_v3 = vpop.f32.mrf.mxu1 }
 0x113   : > { %v761_v9 = vpop.f32.mrf.mxu1 }
 0x115   : > { %v763_v16 = vpop.f32.mrf.mxu1 }
 0x117   : > { %v765_v25 = vpop.f32.mrf.mxu1 }
 0x119   : > { %v767_v34 = vpop.f32.mrf.mxu1 }
 0x129   : > { %v698_v5 = vpop.f32.mrf.mxu0 }
 0x12a   : > { %v752_v6 = vadd.f32 %v751_v0, %v698_v5 }
 0x12b   : > { %v700_v8 = vpop.f32.mrf.mxu0 }
 0x12c   : > { %v770_v10 = vadd.f32 %v752_v6, %v328_v4  ;;  %v754_v11 = vadd.f32 %v753_v1, %v700_v8 }
 0x12d   : > { %v702_v13 = vpop.f32.mrf.mxu0 }
 0x12e   : > { %778 = vst [vmem:[%s1470_s3] sm:$0xff] %v770_v10  ;;  %v771_v14 = vadd.f32 %v754_v11, %v329_v7  ;;  %v756_v15 = vadd.f32 %v755_v2, %v702_v13 }
 0x12f   : > { %v704_v18 = vpop.f32.mrf.mxu0 }
 0x130   : > { %779 = vst [vmem:[%s1470_s3 + $0x8] sm:$0xff] %v771_v14  ;;  %v772_v19 = vadd.f32 %v756_v15, %v330_v12  ;;  %v758_v20 = vadd.f32 %v757_v3, %v704_v18 }
 0x131   : > { %v708_v22 = vpop.f32.mrf.mxu0 }
 0x132   : > { %780 = vst [vmem:[%s1470_s3 + $0x10] sm:$0xff] %v772_v19  ;;  %v773_v23 = vadd.f32 %v758_v20, %v331_v17  ;;  %v762_v24 = vadd.f32 %v761_v9, %v708_v22 }
 0x133   : > { %v710_v27 = vpop.f32.mrf.mxu0 }
 0x134   : > { %781 = vst [vmem:[%s1470_s3 + $0x18] sm:$0xff] %v773_v23  ;;  %v774_v28 = vadd.f32 %v762_v24, %v332_v21  ;;  %v764_v29 = vadd.f32 %v763_v16, %v710_v27 }
 0x135   : > { %v712_v31 = vpop.f32.mrf.mxu0 }
 0x136   : > { %782 = vst [vmem:[%s1470_s3 + $0x20] sm:$0xff] %v774_v28  ;;  %v775_v32 = vadd.f32 %v764_v29, %v333_v26  ;;  %v766_v33 = vadd.f32 %v765_v25, %v712_v31 }
 0x137   : > { %v714_v36 = vpop.f32.mrf.mxu0 }
 0x138   : > { %783 = vst [vmem:[%s1470_s3 + $0x28] sm:$0xff] %v775_v32  ;;  %v776_v37 = vadd.f32 %v766_v33, %v334_v30  ;;  %v768_v38 = vadd.f32 %v767_v34, %v714_v36  ;;  %789 = sbr.rel (%p1024_p11) target bundleno = 331 (0x14b), region = 66 }
 0x13a   : > { %784 = vst [vmem:[%s1470_s3 + $0x30] sm:$0xff] %v776_v37  ;;  %v777_v39 = vadd.f32 %v768_v38, %v335_v35 }
 0x13c   : > { %785 = vst [vmem:[%s1470_s3 + $0x38] sm:$0xff] %v777_v39 }
 0x13d   : > { %v800_v40 = vlaneseq  ;;  %v798_v42 = vld [vmem:[%s1469_s2] sm:$0x3]  ;;  %v791_v45 = vld [vmem:[%s1470_s3 + $0x8] sm:$0xff]  ;;  %v792_v47 = vld [vmem:[%s1470_s3 + $0x10] sm:$0xff] }
 0x13e   : > { %v790_v43 = vld [vmem:[%s1470_s3] sm:$0xff]  ;;  %v793_v48 = vld [vmem:[%s1470_s3 + $0x18] sm:$0xff] }
 0x13f   : > { %v801_v41 = vshrl.u32 %v800_v40, 7  ;;  %v794_v49 = vld [vmem:[%s1470_s3 + $0x20] sm:$0xff]  ;;  %v795_v52 = vld [vmem:[%s1470_s3 + $0x28] sm:$0xff] }
 0x141   : > { %v802_v44 = vsub.s32 0, %v801_v41  ;;  %v806_v46 = vsub.s32 1, %v801_v41  ;;  %v796_v53 = vld [vmem:[%s1470_s3 + $0x30] sm:$0xff] }
 0x143   : > { %v803_v50 = vrot.slane %v798_v42, %v802_v44  ;;  %v807_v51 = vrot.slane %v798_v42, %v806_v46  ;;  %v797_v54 = vld [vmem:[%s1470_s3 + $0x38] sm:$0xff] }
 0x145   : > { %v810_v55 = vadd.f32 %v803_v50, %v790_v43  ;;  %v811_v56 = vadd.f32 %v807_v51, %v791_v45  ;;  %v812_v57 = vadd.f32 %v803_v50, %v792_v47  ;;  %v813_v58 = vadd.f32 %v807_v51, %v793_v48 }
 0x146   : > { %v814_v59 = vadd.f32 %v803_v50, %v794_v49  ;;  %v815_v60 = vadd.f32 %v807_v51, %v795_v52  ;;  %v816_v61 = vadd.f32 %v803_v50, %v796_v53  ;;  %v817_v62 = vadd.f32 %v807_v51, %v797_v54 }
 0x147   : > { %818 = vst [vmem:[%s1470_s3] sm:$0xff] %v810_v55  ;;  %819 = vst [vmem:[%s1470_s3 + $0x8] sm:$0xff] %v811_v56 }
 0x148   : > { %820 = vst [vmem:[%s1470_s3 + $0x10] sm:$0xff] %v812_v57  ;;  %821 = vst [vmem:[%s1470_s3 + $0x18] sm:$0xff] %v813_v58 }
 0x149   : > { %822 = vst [vmem:[%s1470_s3 + $0x20] sm:$0xff] %v814_v59  ;;  %823 = vst [vmem:[%s1470_s3 + $0x28] sm:$0xff] %v815_v60 }
 0x14a   : > { %824 = vst [vmem:[%s1470_s3 + $0x30] sm:$0xff] %v816_v61  ;;  %825 = vst [vmem:[%s1470_s3 + $0x38] sm:$0xff] %v817_v62 }
 0x14b PF: > { %s13_s16 = sadd.s32 1, %s1193_s16   ;;  %s1471_s12 = smov %s1181_s13 }
 0x14c   : > { %p10_p12 = scmp.ge.s32.totalorder %s13_s16, 5   ;;  %s1472_s13 = smov %s1252_s20 }
 0x14d   : > { %s1473_s14 = smov %s1189_s15  ;;  %s1474_s15 = smov %s1476_s17 }
 0x14e   :  { %12 = sbr.rel (!%p10_p12) target bundleno = 3 (0x3), region = 113 }

// kernel: generator_forward.24
= control target key start
LH: loop header
LB: loop body
LE: loop exit
PB: predicated region body
PF: predicated region fallthrough
CT: control target
= control target key end

     0   :  { %s458_s6 = smov 0   ;;  %s460_s7 = smov 0   ;;  %s558_s0 = inlined_call_operand.vmem [shape: f32[2,16,256], index: 0, kind: input, shape index: {}]   ;;  %s559_s1 = inlined_call_operand.vmem [shape: f32[2,16,256], index: 1, kind: output, shape index: {}]  }
   0x1   :  { %s462_s8 = smov 0   ;;  %s464_s9 = smov 0  }
   0x2   :  { %s466_s10 = smov 0   ;;  %s468_s11 = smov 0  }
   0x3   :  { %s470_s12 = smov 0  }
   0x4 LB: > { %s20_s13 = sadd.s32 1, %s438_s10  ;;  %s23_s14 = sadd.s32 1, %s442_s11  ;;  %s446_s12 = sphi %s470_s12, %s11_s12   ;;  %s442_s11 = sphi %s468_s11, %s566_s11   ;;  %s438_s10 = sphi %s466_s10, %s565_s10   ;;  %s434_s9 = sphi %s464_s9, %s564_s9   ;;  %s430_s8 = sphi %s462_s8, %s563_s8   ;;  %s426_s7 = sphi %s460_s7, %s562_s7   ;;  %s422_s6 = sphi %s458_s6, %s561_s6  }
   0x5   : > { %p21_p0 = scmp.ge.s32.totalorder %s20_s13, 2  ;;  %s319_s15 = sadd.s32 4294967295, %s446_s12  }
   0x6   : > { %p39_p1 = scmp.ne.s32.totalorder %s426_s7, %s422_s6  ;;  %p40_p2 = scmp.eq.s32.totalorder %s446_s12, 0 }
   0x7   : > { %s568_s13 = smov (%p21_p0, %s20_s13), 0  ;;  %s570_s14 = smov (!%p21_p0, %s23_s14), %s442_s11 }
   0x8   : > { %p25_p3 = scmp.ge.s32.totalorder %s570_s14, 2  ;;  %p71_p4 = scmp.eq.s32.totalorder %s319_s15, 3 }
   0x9   : > { %s28_s16 = ssub.s32 %s438_s10, %s568_s13  ;;  %p41_p5 = por %p40_p2, %p39_p1 }
   0xa   : > { %s572_s14 = smov (%p25_p3, %s570_s14), 0  ;;  %p506_p6 = por %p71_p4, %p39_p1 }
   0xb   : > { %s27_s18 = ssub.s32 %s442_s11, %s572_s14  ;;  %s32_s20 = sadd.s32 1, %s426_s7 }
   0xc   : > { %s29_s19 = sor.u32 %s28_s16, %s27_s18  ;;  %p322_p8 = scmp.ge.s32.totalorder %s446_s12, 4 }
   0xd   : > { %p30_p7 = scmp.eq.s32.totalorder %s29_s19, 0 }
   0xe   : > { %93 = sbr.rel (%p322_p8) target bundleno = 26 (0x1a), region = 16 }
   0xf   : > { %s514_s21 = scalar_select %p30_p7, %s426_s7, %s32_s20  }
  0x13   : > { %96 = sbr.rel (!%p41_p5) target bundleno = 26 (0x1a), region = 20  ;;  %s98_s22 = sand.u32 (%p41_p5), 1, %s426_s7  }
  0x14   : > { %s324_s23 = sshll.u32 (%p41_p5), %s442_s11, 2  ;;  %s323_s24 = sshll.u32 (%p41_p5), %s98_s22, 4 }
  0x15   : > { %s102_s25 = sadd.s32 (%p41_p5), %s438_s10, %s324_s23  ;;  %s100_s30 = scalar_lea.vmem (%p41_p5), [#allocation2], %s323_s24 }
  0x16   : > { %s325_s26 = sshll.u32 (%p41_p5), %s102_s25, 3 }
  0x17   : > { %s104_s29 = scalar_lea.vmem (%p41_p5), %s558_s0, %s325_s26 }
  0x18   : > { %v135_v0 = vld [vmem:[%s104_s29] sm:$0xff]  ;;  %v137_v1 = vld [vmem:[%s104_s29 + $0x10] sm:$0xff] }
  0x19   : > { %136 = vst [vmem:[%s100_s30] sm:$0xff] %v135_v0  ;;  %138 = vst [vmem:[%s100_s30 + $0x8] sm:$0xff] %v137_v1 }
  0x1a PF: > { %p326_p9 = scmp.ge.s32.totalorder %s446_s12, 1  ;;  %p143_p10 = scmp.lt.s32.totalorder %s446_s12, 5 }
  0x1c   : > { %p144_p11 = pnand %p326_p9, %p143_p10 }
  0x1d   : > { %s150_s2 = sand.u32 (!%p144_p11), 1, %s422_s6  }
  0x1e   : > { %147 = sbr.rel (%p144_p11) target bundleno = 101 (0x65), region = 58  ;;  %s526_s3 = sshll.u32 (!%p144_p11), %s150_s2, 4 }
  0x1f   : > { %s152_s4 = scalar_lea.vmem (!%p144_p11), [#allocation2], %s526_s3  ;;  %s167_s5 = scalar_lea.vmem (!%p144_p11), [#allocation3], %s526_s3 }
  0x23   : > { %v168_v2 = vld [vmem:[%s152_s4] sm:$0xff]  ;;  %v169_v3 = vld [vmem:[%s152_s4 + $0x8] sm:$0xff]  ;;  %s330_s6 = sshll.u32 (%p506_p6), %s434_s9, 2 }
  0x24   : > { %v170_v4 = vadd.f32 %v169_v3, %v168_v2  ;;  %s207_s15 = sadd.s32 (%p506_p6), %s430_s8, %s330_s6 }
  0x25   : > { %s331_s16 = sshll.u32 (%p506_p6), %s207_s15, 3 }
  0x26   : > { %v171_v5 = vrot.slane %v170_v4, 4  ;;  %s209_s20 = scalar_lea.vmem (%p506_p6), %s559_s1, %s331_s16 }
  0x28   : > { %v172_v6 = vadd.f32 %v171_v5, %v170_v4 }
  0x2a   : > { %v173_v7 = vrot.slane %v172_v6, 2 }
  0x2c   : > { %v174_v8 = vadd.f32 %v173_v7, %v172_v6 }
  0x2e   : > { %v175_v9 = vrot.slane %v174_v8, 1 }
  0x30   : > { %v176_v10 = vadd.f32 %v175_v9, %v174_v8 }
  0x32   : > { %v178_v11 = vmul.f32 0.0625, %v176_v10 }
  0x34   : > { %v179_v12 = vsub.f32 %v168_v2, %v178_v11  ;;  %v180_v13 = vsub.f32 %v169_v3, %v178_v11 }
  0x36   : > { %v181_v14 = vmul.f32 %v179_v12, %v179_v12  ;;  %v182_v15 = vmul.f32 %v180_v13, %v180_v13 }
  0x38   : > { %v183_v16 = vadd.f32 %v182_v15, %v181_v14 }
  0x3a   : > { %v184_v17 = vrot.slane %v183_v16, 4 }
  0x3c   : > { %v185_v18 = vadd.f32 %v184_v17, %v183_v16 }
  0x3e   : > { %v186_v19 = vrot.slane %v185_v18, 2 }
  0x40   : > { %v187_v20 = vadd.f32 %v186_v19, %v185_v18 }
  0x42   : > { %v188_v21 = vrot.slane %v187_v20, 1 }
  0x44   : > { %v189_v22 = vadd.f32 %v188_v21, %v187_v20 }
  0x46   : > { %v190_v23 = vmul.f32 0.0625, %v189_v22 }
  0x48   : > { %v191_v24 = vadd.f32 1e-05, %v190_v23 }
  0x4a   : > { %390 = vrsqrt.f32 %v191_v24 }
  0x57   : > { %v391_v25 = vpop.eup %390 }
  0x58   : > { %v193_v26 = vmul.f32 %v391_v25, %v179_v12  ;;  %v194_v27 = vmul.f32 %v391_v25, %v180_v13  ;;  %205 = sbr.rel (!%p506_p6) target bundleno = 101 (0x65), region = 66 }
  0x5a   : > { %v195_v28 = vmax.f32 %v193_v26, 0.0  ;;  %v196_v29 = vmax.f32 %v194_v27, 0.0 }
  0x5c   : > { %197 = vst [vmem:[%s167_s5] sm:$0xff] %v195_v28  ;;  %198 = vst [vmem:[%s167_s5 + $0x8] sm:$0xff] %v196_v29 }
  0x63   : > { %v240_v30 = vld [vmem:[%s167_s5] sm:$0xff]  ;;  %v242_v31 = vld [vmem:[%s167_s5 + $0x8] sm:$0xff] }
  0x64   : > { %241 = vst [vmem:[%s209_s20] sm:$0xff] %v240_v30  ;;  %243 = vst [vmem:[%s209_s20 + $0x10] sm:$0xff] %v242_v31 }
  0x65 PF: > { %s11_s12 = sadd.s32 1, %s446_s12   ;;  %s561_s6 = smov %s426_s7 }
  0x66   : > { %p8_p12 = scmp.ge.s32.totalorder %s11_s12, 6   ;;  %s562_s7 = smov %s514_s21 }
  0x67   : > { %s563_s8 = smov %s438_s10  ;;  %s564_s9 = smov %s442_s11 }
  0x68   : > { %s565_s10 = smov %s568_s13  ;;  %s566_s11 = smov %s572_s14 }
  0x69   :  { %10 = sbr.rel (!%p8_p12) target bundleno = 4 (0x4), region = 135 }

// kernel: generator_forward.28
= control target key start
LH: loop header
LB: loop body
LE: loop exit
PB: predicated region body
PF: predicated region fallthrough
CT: control target
= control target key end

     0   :  { %s579_s9 = smov 0   ;;  %s581_s10 = smov 0   ;;  %s694_s0 = inlined_call_operand.vmem [shape: f32[2,16,256], index: 0, kind: input, shape index: {}]   ;;  %s695_s1 = inlined_call_operand.vmem [shape: f32[2,16,256], index: 1, kind: input, shape index: {}]   ;;  %s696_s2 = inlined_call_operand.vmem [shape: f32[2,16,256], index: 2, kind: output, shape index: {}]  }
   0x1   :  { %s583_s11 = smov 0   ;;  %s585_s12 = smov 0  }
   0x2   :  { %s587_s13 = smov 0   ;;  %s589_s14 = smov 0  }
   0x3   :  { %s591_s15 = smov 0  }
   0x4 LB: > { %s21_s16 = sadd.s32 1, %s554_s13  ;;  %s24_s17 = sadd.s32 1, %s558_s14  ;;  %s562_s15 = sphi %s591_s15, %s12_s15   ;;  %s558_s14 = sphi %s589_s14, %s704_s14   ;;  %s554_s13 = sphi %s587_s13, %s703_s13   ;;  %s550_s12 = sphi %s585_s12, %s702_s12   ;;  %s546_s11 = sphi %s583_s11, %s701_s11   ;;  %s542_s10 = sphi %s581_s10, %s700_s10   ;;  %s538_s9 = sphi %s579_s9, %s699_s9  }
   0x5   : > { %p22_p0 = scmp.ge.s32.totalorder %s21_s16, 2  ;;  %s431_s18 = sadd.s32 4294967295, %s562_s15  }
   0x6   : > { %p40_p1 = scmp.ne.s32.totalorder %s542_s10, %s538_s9  ;;  %p41_p2 = scmp.eq.s32.totalorder %s562_s15, 0 }
   0x7   : > { %s706_s16 = smov (%p22_p0, %s21_s16), 0  ;;  %s708_s17 = smov (!%p22_p0, %s24_s17), %s558_s14 }
   0x8   : > { %p26_p3 = scmp.ge.s32.totalorder %s708_s17, 2  ;;  %p100_p4 = scmp.eq.s32.totalorder %s431_s18, 3 }
   0x9   : > { %s29_s19 = ssub.s32 %s554_s13, %s706_s16  ;;  %p625_p5 = por %p41_p2, %p40_p1 }
   0xa   : > { %s710_s17 = smov (%p26_p3, %s708_s17), 0  ;;  %p631_p6 = por %p100_p4, %p40_p1 }
   0xb   : > { %s28_s22 = ssub.s32 %s558_s14, %s710_s17  ;;  %s33_s24 = sadd.s32 1, %s542_s10 }
   0xc   : > { %s30_s23 = sor.u32 %s29_s19, %s28_s22  ;;  %p434_p8 = scmp.ge.s32.totalorder %s562_s15, 4 }
   0xd   : > { %p31_p7 = scmp.eq.s32.totalorder %s30_s23, 0 }
   0xe   : > { %122 = sbr.rel (%p434_p8) target bundleno = 33 (0x21), region = 16 }
   0xf   : > { %s639_s25 = scalar_select %p31_p7, %s542_s10, %s33_s24  }
  0x13   : > { %125 = sbr.rel (!%p625_p5) target bundleno = 26 (0x1a), region = 20  ;;  %s127_s26 = sand.u32 (%p625_p5), 1, %s542_s10  }
  0x14   : > { %s436_s27 = sshll.u32 (%p625_p5), %s558_s14, 2  ;;  %s435_s28 = sshll.u32 (%p625_p5), %s127_s26, 4 }
  0x15   : > { %s131_s29 = sadd.s32 (%p625_p5), %s554_s13, %s436_s27  ;;  %s129_s6 = scalar_lea.vmem (%p625_p5), [#allocation2], %s435_s28 }
  0x16   : > { %s437_s30 = sshll.u32 (%p625_p5), %s131_s29, 3 }
  0x17   : > { %s133_s5 = scalar_lea.vmem (%p625_p5), %s694_s0, %s437_s30 }
  0x18   : > { %v164_v0 = vld [vmem:[%s133_s5] sm:$0xff]  ;;  %v166_v1 = vld [vmem:[%s133_s5 + $0x10] sm:$0xff] }
  0x19   : > { %165 = vst [vmem:[%s129_s6] sm:$0xff] %v164_v0  ;;  %167 = vst [vmem:[%s129_s6 + $0x8] sm:$0xff] %v166_v1 }
  0x1a PF: > { %173 = sbr.rel (!%p625_p5) target bundleno = 33 (0x21), region = 58  ;;  %s175_s7 = sand.u32 (%p625_p5), 1, %s542_s10  }
  0x1b   : > { %s439_s8 = sshll.u32 (%p625_p5), %s558_s14, 2  ;;  %s438_s18 = sshll.u32 (%p625_p5), %s175_s7, 4 }
  0x1c   : > { %s179_s19 = sadd.s32 (%p625_p5), %s554_s13, %s439_s8  ;;  %s177_s27 = scalar_lea.vmem (%p625_p5), [#allocation3], %s438_s18 }
  0x1d   : > { %s440_s22 = sshll.u32 (%p625_p5), %s179_s19, 3 }
  0x1e   : > { %s181_s26 = scalar_lea.vmem (%p625_p5), %s695_s1, %s440_s22 }
  0x1f   : > { %v212_v2 = vld [vmem:[%s181_s26] sm:$0xff]  ;;  %v214_v3 = vld [vmem:[%s181_s26 + $0x10] sm:$0xff] }
  0x20   : > { %213 = vst [vmem:[%s177_s27] sm:$0xff] %v212_v2  ;;  %215 = vst [vmem:[%s177_s27 + $0x8] sm:$0xff] %v214_v3 }
  0x21 PF: > { %p441_p9 = scmp.ge.s32.totalorder %s562_s15, 1  ;;  %p220_p10 = scmp.lt.s32.totalorder %s562_s15, 5 }
  0x23   : > { %p221_p11 = pnand %p441_p9, %p220_p10 }
  0x24   : > { %s227_s20 = sand.u32 (!%p221_p11), 1, %s538_s9  }
  0x25   : > { %224 = sbr.rel (%p221_p11) target bundleno = 108 (0x6c), region = 96  ;;  %s661_s28 = sshll.u32 (!%p221_p11), %s227_s20, 4 }
  0x26   : > { %s229_s29 = scalar_lea.vmem (!%p221_p11), [#allocation2], %s661_s28  ;;  %s236_s9 = scalar_lea.vmem (!%p221_p11), [#allocation3], %s661_s28 }
  0x27   : > { %s257_s30 = scalar_lea.vmem (!%p221_p11), [#allocation4], %s661_s28 }
  0x2a   : > { %v258_v4 = vld [vmem:[%s229_s29] sm:$0xff]  ;;  %v259_v5 = vld [vmem:[%s229_s29 + $0x8] sm:$0xff]  ;;  %s446_s3 = sshll.u32 (%p631_p6), %s550_s12, 2 }
  0x2b   : > { %v260_v6 = vadd.f32 %v259_v5, %v258_v4  ;;  %v285_v28 = vld [vmem:[%s236_s9] sm:$0xff]  ;;  %v286_v29 = vld [vmem:[%s236_s9 + $0x8] sm:$0xff]  ;;  %s299_s4 = sadd.s32 (%p631_p6), %s546_s11, %s446_s3 }
  0x2c   : > { %s447_s5 = sshll.u32 (%p631_p6), %s299_s4, 3 }
  0x2d   : > { %v261_v7 = vrot.slane %v260_v6, 4  ;;  %s301_s8 = scalar_lea.vmem (%p631_p6), %s696_s2, %s447_s5 }
  0x2f   : > { %v262_v8 = vadd.f32 %v261_v7, %v260_v6 }
  0x31   : > { %v263_v9 = vrot.slane %v262_v8, 2 }
  0x33   : > { %v264_v10 = vadd.f32 %v263_v9, %v262_v8 }
  0x35   : > { %v265_v11 = vrot.slane %v264_v10, 1 }
  0x37   : > { %v266_v12 = vadd.f32 %v265_v11, %v264_v10 }
  0x39   : > { %v268_v13 = vmul.f32 0.0625, %v266_v12 }
  0x3b   : > { %v269_v14 = vsub.f32 %v258_v4, %v268_v13  ;;  %v270_v15 = vsub.f32 %v259_v5, %v268_v13 }
  0x3d   : > { %v271_v16 = vmul.f32 %v269_v14, %v269_v14  ;;  %v272_v17 = vmul.f32 %v270_v15, %v270_v15 }
  0x3f   : > { %v273_v18 = vadd.f32 %v272_v17, %v271_v16 }
  0x41   : > { %v274_v19 = vrot.slane %v273_v18, 4 }
  0x43   : > { %v275_v20 = vadd.f32 %v274_v19, %v273_v18 }
  0x45   : > { %v276_v21 = vrot.slane %v275_v20, 2 }
  0x47   : > { %v277_v22 = vadd.f32 %v276_v21, %v275_v20 }
  0x49   : > { %v278_v23 = vrot.slane %v277_v22, 1 }
  0x4b   : > { %v279_v24 = vadd.f32 %v278_v23, %v277_v22 }
  0x4d   : > { %v280_v25 = vmul.f32 0.0625, %v279_v24 }
  0x4f   : > { %v281_v26 = vadd.f32 1e-05, %v280_v25 }
  0x51   : > { %506 = vrsqrt.f32 %v281_v26 }
  0x5e   : > { %v507_v27 = vpop.eup %506 }
  0x5f   : > { %v283_v30 = vmul.f32 %v507_v27, %v269_v14  ;;  %v284_v31 = vmul.f32 %v507_v27, %v270_v15  ;;  %297 = sbr.rel (!%p631_p6) target bundleno = 108 (0x6c), region = 108 }
  0x61   : > { %v287_v32 = vadd.f32 %v285_v28, %v283_v30  ;;  %v288_v33 = vadd.f32 %v286_v29, %v284_v31 }
  0x63   : > { %289 = vst [vmem:[%s257_s30] sm:$0xff] %v287_v32  ;;  %290 = vst [vmem:[%s257_s30 + $0x8] sm:$0xff] %v288_v33 }
  0x6a   : > { %v332_v34 = vld [vmem:[%s257_s30] sm:$0xff]  ;;  %v334_v35 = vld [vmem:[%s257_s30 + $0x8] sm:$0xff] }
  0x6b   : > { %333 = vst [vmem:[%s301_s8] sm:$0xff] %v332_v34  ;;  %335 = vst [vmem:[%s301_s8 + $0x10] sm:$0xff] %v334_v35 }
  0x6c PF: > { %s12_s15 = sadd.s32 1, %s562_s15   ;;  %s699_s9 = smov %s542_s10 }
  0x6d   : > { %p9_p12 = scmp.ge.s32.totalorder %s12_s15, 6   ;;  %s700_s10 = smov %s639_s25 }
  0x6e   : > { %s701_s11 = smov %s554_s13  ;;  %s702_s12 = smov %s558_s14 }
  0x6f   : > { %s703_s13 = smov %s706_s16  ;;  %s704_s14 = smov %s710_s17 }
  0x70   :  { %11 = sbr.rel (!%p9_p12) target bundleno = 4 (0x4), region = 185 }

// kernel: generator_forward.25
= control target key start
LH: loop header
LB: loop body
LE: loop exit
PB: predicated region body
PF: predicated region fallthrough
CT: control target
= control target key end

     0   :  { %s1217_s12 = smov 0   ;;  %s1219_s13 = smov 0   ;;  %s1467_s0 = inlined_call_operand.vmem [shape: bf16[32,2304], index: 0, kind: input, shape index: {}]   ;;  %s1468_s1 = inlined_call_operand.vmem [shape: bf16[2304,256], index: 1, kind: input, shape index: {}]   ;;  %s1469_s2 = inlined_call_operand.vmem [shape: f32[1,256], index: 2, kind: input, shape index: {}]   ;;  %s1470_s3 = inlined_call_operand.vmem [shape: f32[32,256], index: 3, kind: output, shape index: {}]  }
   0x1   :  { %s1221_s14 = smov 0   ;;  %s1223_s15 = smov 0  }
   0x2   :  { %s1225_s16 = smov 0  }
   0x3 LB: > { %s25_s17 = sadd.s32 1, %s1189_s15  ;;  %p48_p1 = scmp.ne.s32.totalorder %s1181_s13, %s1177_s12  ;;  %s1193_s16 = sphi %s1225_s16, %s13_s16   ;;  %s1189_s15 = sphi %s1223_s15, %s1474_s15   ;;  %s1185_s14 = sphi %s1221_s14, %s1473_s14   ;;  %s1181_s13 = sphi %s1219_s13, %s1472_s13   ;;  %s1177_s12 = sphi %s1217_s12, %s1471_s12  }
   0x4   : > { %p26_p0 = scmp.ge.s32.totalorder %s25_s17, 6  ;;  %p49_p2 = scmp.eq.s32.totalorder %s1193_s16, 0 }
   0x5   : > { %s41_s19 = sadd.s32 1, %s1181_s13  ;;  %p956_p5 = scmp.ge.s32.totalorder %s1193_s16, 6 }
   0x6   : > { %s1476_s17 = smov (%p26_p0, %s25_s17), 0  ;;  %p50_p3 = por %p49_p2, %p48_p1 }
   0x7   : > { %s37_s18 = ssub.s32 %s1189_s15, %s1476_s17  ;;  %164 = sbr.rel (%p956_p5) target bundleno = 21 (0x15), region = 20 }
   0x8   : > { %p39_p4 = scmp.eq.s32.totalorder %s37_s18, 0 }
   0xa   : > { %s1252_s20 = scalar_select %p39_p4, %s1181_s13, %s41_s19  }
   0xc   : > { %167 = sbr.rel (!%p50_p3) target bundleno = 21 (0x15), region = 24  ;;  %s169_s21 = sand.u32 (%p50_p3), 1, %s1181_s13  }
   0xd   : > { %s1029_s22 = smul.u32 (%p50_p3), 12, %s1189_s15 }
   0xe   : > { %s1031_s23 = smul.u32 (%p50_p3), 48, %s169_s21 }
   0xf   : > { %s177_s26 = scalar_lea.vmem (%p50_p3), %s1467_s0, %s1029_s22 }
  0x10   : > { %v192_v0 = vld [vmem:[%s177_s26] sm:$0xff] (%p50_p3)  ;;  %v194_v1 = vld [vmem:[%s177_s26 + $0x48] sm:$0xff] (%p50_p3)  ;;  %v196_v2 = vld [vmem:[%s177_s26 + $0x90] sm:$0xff] (%p50_p3)  ;;  %s171_s27 = scalar_lea.vmem (%p50_p3), [#allocation2], %s1031_s23 }
  0x11   : > { %193 = vst [vmem:[%s171_s27] sm:$0xff] %v192_v0  ;;  %195 = vst [vmem:[%s171_s27 + $0xc] sm:$0xff] %v194_v1  ;;  %v198_v3 = vld [vmem:[%s177_s26 + $0xd8] sm:$0xff]  ;;  %v958_v4 = vld [vmem:[%s177_s26 + $0x8] sm:$0xf] }
  0x12   : > { %197 = vst [vmem:[%s171_s27 + $0x18] sm:$0xff] %v196_v2  ;;  %v960_v5 = vld [vmem:[%s177_s26 + $0x50] sm:$0xf]  ;;  %199 = vst [vmem:[%s171_s27 + $0x24] sm:$0xff] %v198_v3  ;;  %v962_v6 = vld [vmem:[%s177_s26 + $0x98] sm:$0xf] }
  0x13   : > { %959 = vst [vmem:[%s171_s27 + $0x8] sm:$0xf] %v958_v4  ;;  %961 = vst [vmem:[%s171_s27 + $0x14] sm:$0xf] %v960_v5  ;;  %v964_v7 = vld [vmem:[%s177_s26 + $0xe0] sm:$0xf] }
  0x14   : > { %963 = vst [vmem:[%s171_s27 + $0x20] sm:$0xf] %v962_v6  ;;  %965 = vst [vmem:[%s171_s27 + $0x2c] sm:$0xf] %v964_v7 }
  0x15 PF: > { %p966_p6 = scmp.ge.s32.totalorder %s1193_s16, 1  ;;  %p235_p7 = scmp.lt.s32.totalorder %s1193_s16, 7 }
  0x17   : > { %p236_p8 = pnand %p966_p6, %p235_p7 }
  0x18   : > { %s242_s28 = sand.u32 (!%p236_p8), 1, %s1177_s12   ;;  %s286_s29 = smul.u32 (!%p236_p8), 48, %s1185_s14 }
  0x19   : > { %239 = sbr.rel (%p236_p8) target bundleno = 331 (0x14b), region = 54  ;;  %p969_p10 = scmp.ne.s32.totalorder (!%p236_p8), %s1185_s14, 0 }
  0x1a   : > { %s1032_s30 = smul.u32 (!%p236_p8), 48, %s242_s28  ;;  %p288_p9 = scmp.lt.s32.totalorder (!%p236_p8), %s286_s29, 287 }
  0x1c   : > { %s1269_s8 = scalar_lea.vmem (!%p236_p8), [#allocation2], %s1032_s30 }
  0x1e   : > { %s1478_s29 = smov (!%p288_p9, %s286_s29), 287  ;;  %319 = sbr.rel (%p969_p10) target bundleno = 40 (0x28), region = 62 }
  0x1f   : > { %s1030_s4 = sshll.u32 %s1478_s29, 3 }
  0x20   : > { %s1267_s7 = scalar_lea.vmem %s1468_s1, %s1030_s4 }
  0x23   : > { %v1195_v8 = vmov 0.0  }
  0x24   : > { %320 = vst [vmem:[%s1470_s3] sm:$0xff] %v1195_v8  ;;  %321 = vst [vmem:[%s1470_s3 + $0x8] sm:$0xff] %v1195_v8 }
  0x25   : > { %322 = vst [vmem:[%s1470_s3 + $0x10] sm:$0xff] %v1195_v8  ;;  %323 = vst [vmem:[%s1470_s3 + $0x18] sm:$0xff] %v1195_v8 }
  0x26   : > { %324 = vst [vmem:[%s1470_s3 + $0x20] sm:$0xff] %v1195_v8  ;;  %325 = vst [vmem:[%s1470_s3 + $0x28] sm:$0xff] %v1195_v8 }
  0x27   : > { %326 = vst [vmem:[%s1470_s3 + $0x30] sm:$0xff] %v1195_v8  ;;  %327 = vst [vmem:[%s1470_s3 + $0x38] sm:$0xff] %v1195_v8 }
  0x28 PF: > { %v1075_v9 = vld [vmem:[%s1267_s7 + $0x74] ss:$8 sps:$4 sm:$0xff]   ;;  %v1077_v10 = vld [vmem:[%s1267_s7 + $0x70] ss:$8 sps:$4 sm:$0xff]   ;;  %v1196_v11 = vmov 0   ;;  %p1024_p11 = scmp.ne.s32.totalorder %s1185_s14, 5 }
  0x29   : > { %749 = vmatprep.mubr.bf16.mxu1 %v1196_v11  ;;  %664 = vmatprep.subr.bf16.mxu0 %v1075_v9  ;;  %v1078_v12 = vld [vmem:[%s1267_s7 + $0x64] ss:$8 sps:$4 sm:$0xff]   ;;  %v1080_v13 = vld [vmem:[%s1267_s7 + $0x60] ss:$8 sps:$4 sm:$0xff]   ;;  %v1081_v14 = vld [vmem:[%s1267_s7 + $0x54] ss:$8 sps:$4 sm:$0xff]  }
  0x2a   : > { %665 = vmatpush1.bf16.msra.mxu0 %v1077_v10  ;;  %v1083_v15 = vld [vmem:[%s1267_s7 + $0x50] ss:$8 sps:$4 sm:$0xff]   ;;  %v1084_v16 = vld [vmem:[%s1267_s7 + $0x44] ss:$8 sps:$4 sm:$0xff]   ;;  %v1096_v17 = vld [vmem:[%s1267_s7 + $0x174] ss:$8 sps:$4 sm:$0xff]  }
  0x2b   : > { %666 = vmatprep.subr.bf16.mxu0 %v1078_v12  ;;  %v1098_v18 = vld [vmem:[%s1267_s7 + $0x170] ss:$8 sps:$4 sm:$0xff]   ;;  %v1086_v19 = vld [vmem:[%s1267_s7 + $0x40] ss:$8 sps:$4 sm:$0xff]   ;;  %v1087_v20 = vld [vmem:[%s1267_s7 + $0x34] ss:$8 sps:$4 sm:$0xff]   ;;  %717 = vmatprep.subr.bf16.mxu1 %v1096_v17 }
  0x2c   : > { %v1102_v21 = vld [vmem:[%s1267_s7 + $0x164] ss:$8 sps:$4 sm:$0xff]   ;;  %718 = vmatpush1.bf16.msra.mxu1 %v1098_v18  ;;  %v1104_v22 = vld [vmem:[%s1267_s7 + $0x160] ss:$8 sps:$4 sm:$0xff]   ;;  %v1089_v23 = vld [vmem:[%s1267_s7 + $0x30] ss:$8 sps:$4 sm:$0xff]  }
  0x2d   : > { %719 = vmatprep.subr.bf16.mxu1 %v1102_v21  ;;  %v1108_v24 = vld [vmem:[%s1267_s7 + $0x154] ss:$8 sps:$4 sm:$0xff]   ;;  %v1090_v25 = vld [vmem:[%s1267_s7 + $0x24] ss:$8 sps:$4 sm:$0xff]   ;;  %v1110_v26 = vld [vmem:[%s1267_s7 + $0x150] ss:$8 sps:$4 sm:$0xff]  }
  0x2e   : > { %667 = vmatpush1.bf16.msra.mxu0 %v1080_v13  ;;  %v1114_v27 = vld [vmem:[%s1267_s7 + $0x144] ss:$8 sps:$4 sm:$0xff]   ;;  %v1092_v28 = vld [vmem:[%s1267_s7 + $0x20] ss:$8 sps:$4 sm:$0xff]   ;;  %v1093_v29 = vld [vmem:[%s1267_s7 + $0x14] ss:$8 sps:$4 sm:$0xff]  }
  0x2f   : > { %668 = vmatprep.subr.bf16.mxu0 %v1081_v14  ;;  %v1116_v30 = vld [vmem:[%s1267_s7 + $0x140] ss:$8 sps:$4 sm:$0xff]   ;;  %v1120_v31 = vld [vmem:[%s1267_s7 + $0x134] ss:$8 sps:$4 sm:$0xff]   ;;  %v1095_v32 = vld [vmem:[%s1267_s7 + $0x10] ss:$8 sps:$4 sm:$0xff]  }
  0x30   : > { %720 = vmatpush1.bf16.msra.mxu1 %v1104_v22  ;;  %v1099_v33 = vld [vmem:[%s1267_s7 + $0x4] ss:$8 sps:$4 sm:$0xff]   ;;  %v1122_v34 = vld [vmem:[%s1267_s7 + $0x130] ss:$8 sps:$4 sm:$0xff]   ;;  %v1101_v36 = vld [vmem:[%s1267_s7] ss:$8 sps:$4 sm:$0xff]  }
  0x31   : > { %721 = vmatprep.subr.bf16.mxu1 %v1108_v24  ;;  %v1126_v35 = vld [vmem:[%s1267_s7 + $0x124] ss:$8 sps:$4 sm:$0xff]   ;;  %v1105_v37 = vld [vmem:[%s1267_s7 + $0xf4] ss:$8 sps:$4 sm:$0xff]   ;;  %v1128_v38 = vld [vmem:[%s1267_s7 + $0x120] ss:$8 sps:$4 sm:$0xff]  }
  0x32   : > { %669 = vmatpush1.bf16.msra.mxu0 %v1083_v15  ;;  %v1132_v39 = vld [vmem:[%s1267_s7 + $0x114] ss:$8 sps:$4 sm:$0xff]   ;;  %v1107_v40 = vld [vmem:[%s1267_s7 + $0xf0] ss:$8 sps:$4 sm:$0xff]   ;;  %v1111_v41 = vld [vmem:[%s1267_s7 + $0xe4] ss:$8 sps:$4 sm:$0xff]  }
  0x33   : > { %670 = vmatprep.subr.bf16.mxu0 %v1084_v16  ;;  %v1134_v42 = vld [vmem:[%s1267_s7 + $0x110] ss:$8 sps:$4 sm:$0xff]   ;;  %v1138_v43 = vld [vmem:[%s1267_s7 + $0x104] ss:$8 sps:$4 sm:$0xff]   ;;  %v1113_v45 = vld [vmem:[%s1267_s7 + $0xe0] ss:$8 sps:$4 sm:$0xff]  }
  0x34   : > { %722 = vmatpush1.bf16.msra.mxu1 %v1110_v26  ;;  %v1150_v44 = vld [vmem:[%s1269_s8 + $0x4] ss:$12 sps:$4 sm:$0xff]   ;;  %v1144_v50 = vld [vmem:[%s1269_s8 + $0x8] ss:$12 sps:$4 sm:$0xff]   ;;  %v1151_v55 = vld [vmem:[%s1269_s8 + $0x20] ss:$12 sps:$4 sm:$0xff]  }
  0x35   : > { %723 = vmatprep.subr.bf16.mxu1 %v1114_v27  ;;  %v1117_v46 = vld [vmem:[%s1267_s7 + $0xd4] ss:$8 sps:$4 sm:$0xff]   ;;  %696 = vmatprep.mubr.bf16.mxu0 %v1150_v44  ;;  %v1140_v47 = vld [vmem:[%s1267_s7 + $0x100] ss:$8 sps:$4 sm:$0xff]   ;;  %v1119_v48 = vld [vmem:[%s1267_s7 + $0xd0] ss:$8 sps:$4 sm:$0xff]  }
  0x36   : > { %671 = vmatpush1.bf16.msra.mxu0 %v1086_v19  ;;  %v1123_v49 = vld [vmem:[%s1267_s7 + $0xc4] ss:$8 sps:$4 sm:$0xff]   ;;  %v1125_v51 = vld [vmem:[%s1267_s7 + $0xc0] ss:$8 sps:$4 sm:$0xff]   ;;  %v1129_v52 = vld [vmem:[%s1267_s7 + $0xb4] ss:$8 sps:$4 sm:$0xff]  }
  0x37   : > { %672 = vmatprep.subr.bf16.mxu0 %v1087_v20  ;;  %v1131_v53 = vld [vmem:[%s1267_s7 + $0xb0] ss:$8 sps:$4 sm:$0xff]   ;;  %v1135_v54 = vld [vmem:[%s1267_s7 + $0xa4] ss:$8 sps:$4 sm:$0xff]   ;;  %v1137_v56 = vld [vmem:[%s1267_s7 + $0xa0] ss:$8 sps:$4 sm:$0xff]  }
  0x38   : > { %724 = vmatpush1.bf16.msra.mxu1 %v1116_v30  ;;  %v1141_v57 = vld [vmem:[%s1267_s7 + $0x94] ss:$8 sps:$4 sm:$0xff]   ;;  %v1143_v58 = vld [vmem:[%s1267_s7 + $0x90] ss:$8 sps:$4 sm:$0xff]   ;;  %v1145_v59 = vld [vmem:[%s1267_s7 + $0x84] ss:$8 sps:$4 sm:$0xff]  }
  0x39   : > { %725 = vmatprep.subr.bf16.mxu1 %v1120_v31  ;;  %v1147_v60 = vld [vmem:[%s1267_s7 + $0x80] ss:$8 sps:$4 sm:$0xff]   ;;  %v330_v12 = vld [vmem:[%s1470_s3 + $0x10] sm:$0xff]  ;;  %v331_v17 = vld [vmem:[%s1470_s3 + $0x18] sm:$0xff] }
  0x3a   : > { %673 = vmatpush1.bf16.msra.mxu0 %v1089_v23  ;;  %v1148_v61 = vld [vmem:[%s1269_s8] ss:$12 sps:$4 sm:$0xff]   ;;  %v1152_v62 = vld [vmem:[%s1269_s8 + $0x1c] ss:$12 sps:$4 sm:$0xff]   ;;  %v1154_v63 = vld [vmem:[%s1269_s8 + $0x18] ss:$12 sps:$4 sm:$0xff]  }
  0x3b   : > { %674 = vmatprep.subr.bf16.mxu0 %v1090_v25  ;;  %v328_v4 = vld [vmem:[%s1470_s3] sm:$0xff]  ;;  %v329_v7 = vld [vmem:[%s1470_s3 + $0x8] sm:$0xff]  ;;  %v334_v30 = vld [vmem:[%s1470_s3 + $0x30] sm:$0xff] }
  0x3c   : > { %726 = vmatpush1.bf16.msra.mxu1 %v1122_v34  ;;  %v332_v21 = vld [vmem:[%s1470_s3 + $0x20] sm:$0xff]  ;;  %v333_v26 = vld [vmem:[%s1470_s3 + $0x28] sm:$0xff] }
  0x3d   : > { %727 = vmatprep.subr.bf16.mxu1 %v1126_v35  ;;  %v335_v35 = vld [vmem:[%s1470_s3 + $0x38] sm:$0xff] }
  0x3e   : > { %675 = vmatpush1.bf16.msra.mxu0 %v1092_v28 }
  0x3f   : > { %676 = vmatprep.subr.bf16.mxu0 %v1093_v29 }
  0x40   : > { %728 = vmatpush1.bf16.msra.mxu1 %v1128_v38 }
  0x41   : > { %729 = vmatprep.subr.bf16.mxu1 %v1132_v39 }
  0x42   : > { %677 = vmatpush1.bf16.msra.mxu0 %v1095_v32 }
  0x43   : > { %678 = vmatprep.subr.bf16.mxu0 %v1099_v33 }
  0x44   : > { %730 = vmatpush1.bf16.msra.mxu1 %v1134_v42 }
  0x45   : > { %731 = vmatprep.subr.bf16.mxu1 %v1138_v43 }
  0x46   : > { %679 = vmatpush1.bf16.msra.mxu0 %v1101_v36 }
  0x47   : > { %680 = vmatprep.subr.bf16.mxu0 %v1105_v37 }
  0x48   : > { %732 = vmatpush1.bf16.msra.mxu1 %v1140_v47 }
  0x4a   : > { %681 = vmatpush2.bf16.msra.mxu0 %v1107_v40 }
  0x4b   : > { %682 = vmatprep.subr.bf16.mxu0 %v1111_v41  ;;  %750 = vmatmul.mubr.bf16.vlgmr.msra.gmra.mxu1 %v1144_v50 }
  0x4c   : > { %759 = vmatprep.mubr.bf16.mxu1 %v1196_v11 }
  0x4e   : > { %683 = vmatpush2.bf16.msra.mxu0 %v1113_v45 }
  0x4f   : > { %684 = vmatprep.subr.bf16.mxu0 %v1117_v46 }
  0x52   : > { %685 = vmatpush2.bf16.msra.mxu0 %v1119_v48 }
  0x53   : > { %686 = vmatprep.subr.bf16.mxu0 %v1123_v49  ;;  %760 = vmatmul.mubr.bf16.gmra.mxu1 %v1151_v55 }
  0x56   : > { %687 = vmatpush2.bf16.msra.mxu0 %v1125_v51 }
  0x57   : > { %688 = vmatprep.subr.bf16.mxu0 %v1129_v52 }
  0x5a   : > { %689 = vmatpush2.bf16.msra.mxu0 %v1131_v53 }
  0x5b   : > { %690 = vmatprep.subr.bf16.mxu0 %v1135_v54 }
  0x5e   : > { %691 = vmatpush2.bf16.msra.mxu0 %v1137_v56 }
  0x5f   : > { %692 = vmatprep.subr.bf16.mxu0 %v1141_v57 }
  0x62   : > { %693 = vmatpush2.bf16.msra.mxu0 %v1143_v58 }
  0x63   : > { %694 = vmatprep.subr.bf16.mxu0 %v1145_v59 }
  0x66   : > { %695 = vmatpush2.bf16.msra.mxu0 %v1147_v60 }
  0x69   : > { %697 = vmatmul.mubr.bf16.vlgmr.msra.gmra.mxu0 %v1148_v61 }
  0x6a   : > { %706 = vmatprep.mubr.bf16.mxu0 %v1152_v62 }
  0x71   : > { %707 = vmatmul.mubr.bf16.gmra.mxu0 %v1154_v63 }
 0x10b   : > { %v751_v0 = vpop.f32.mrf.mxu1 }
 0x10d   : > { %v753_v1 = vpop.f32.mrf.mxu1 }
 0x10f   : > { %v755_v2 = vpop.f32.mrf.mxu1 }
 0x111   : > { %v757_v3 = vpop.f32.mrf.mxu1 }
 0x113   : > { %v761_v9 = vpop.f32.mrf.mxu1 }
 0x115   : > { %v763_v16 = vpop.f32.mrf.mxu1 }
 0x117   : > { %v765_v25 = vpop.f32.mrf.mxu1 }
 0x119   : > { %v767_v34 = vpop.f32.mrf.mxu1 }
 0x129   : > { %v698_v5 = vpop.f32.mrf.mxu0 }
 0x12a   : > { %v752_v6 = vadd.f32 %v751_v0, %v698_v5 }
 0x12b   : > { %v700_v8 = vpop.f32.mrf.mxu0 }
 0x12c   : > { %v770_v10 = vadd.f32 %v752_v6, %v328_v4  ;;  %v754_v11 = vadd.f32 %v753_v1, %v700_v8 }
 0x12d   : > { %v702_v13 = vpop.f32.mrf.mxu0 }
 0x12e   : > { %778 = vst [vmem:[%s1470_s3] sm:$0xff] %v770_v10  ;;  %v771_v14 = vadd.f32 %v754_v11, %v329_v7  ;;  %v756_v15 = vadd.f32 %v755_v2, %v702_v13 }
 0x12f   : > { %v704_v18 = vpop.f32.mrf.mxu0 }
 0x130   : > { %779 = vst [vmem:[%s1470_s3 + $0x8] sm:$0xff] %v771_v14  ;;  %v772_v19 = vadd.f32 %v756_v15, %v330_v12  ;;  %v758_v20 = vadd.f32 %v757_v3, %v704_v18 }
 0x131   : > { %v708_v22 = vpop.f32.mrf.mxu0 }
 0x132   : > { %780 = vst [vmem:[%s1470_s3 + $0x10] sm:$0xff] %v772_v19  ;;  %v773_v23 = vadd.f32 %v758_v20, %v331_v17  ;;  %v762_v24 = vadd.f32 %v761_v9, %v708_v22 }
 0x133   : > { %v710_v27 = vpop.f32.mrf.mxu0 }
 0x134   : > { %781 = vst [vmem:[%s1470_s3 + $0x18] sm:$0xff] %v773_v23  ;;  %v774_v28 = vadd.f32 %v762_v24, %v332_v21  ;;  %v764_v29 = vadd.f32 %v763_v16, %v710_v27 }
 0x135   : > { %v712_v31 = vpop.f32.mrf.mxu0 }
 0x136   : > { %782 = vst [vmem:[%s1470_s3 + $0x20] sm:$0xff] %v774_v28  ;;  %v775_v32 = vadd.f32 %v764_v29, %v333_v26  ;;  %v766_v33 = vadd.f32 %v765_v25, %v712_v31 }
 0x137   : > { %v714_v36 = vpop.f32.mrf.mxu0 }
 0x138   : > { %783 = vst [vmem:[%s1470_s3 + $0x28] sm:$0xff] %v775_v32  ;;  %v776_v37 = vadd.f32 %v766_v33, %v334_v30  ;;  %v768_v38 = vadd.f32 %v767_v34, %v714_v36  ;;  %789 = sbr.rel (%p1024_p11) target bundleno = 331 (0x14b), region = 66 }
 0x13a   : > { %784 = vst [vmem:[%s1470_s3 + $0x30] sm:$0xff] %v776_v37  ;;  %v777_v39 = vadd.f32 %v768_v38, %v335_v35 }
 0x13c   : > { %785 = vst [vmem:[%s1470_s3 + $0x38] sm:$0xff] %v777_v39 }
 0x13d   : > { %v800_v40 = vlaneseq  ;;  %v798_v42 = vld [vmem:[%s1469_s2] sm:$0x3]  ;;  %v791_v45 = vld [vmem:[%s1470_s3 + $0x8] sm:$0xff]  ;;  %v792_v47 = vld [vmem:[%s1470_s3 + $0x10] sm:$0xff] }
 0x13e   : > { %v790_v43 = vld [vmem:[%s1470_s3] sm:$0xff]  ;;  %v793_v48 = vld [vmem:[%s1470_s3 + $0x18] sm:$0xff] }
 0x13f   : > { %v801_v41 = vshrl.u32 %v800_v40, 7  ;;  %v794_v49 = vld [vmem:[%s1470_s3 + $0x20] sm:$0xff]  ;;  %v795_v52 = vld [vmem:[%s1470_s3 + $0x28] sm:$0xff] }
 0x141   : > { %v802_v44 = vsub.s32 0, %v801_v41  ;;  %v806_v46 = vsub.s32 1, %v801_v41  ;;  %v796_v53 = vld [vmem:[%s1470_s3 + $0x30] sm:$0xff] }
 0x143   : > { %v803_v50 = vrot.slane %v798_v42, %v802_v44  ;;  %v807_v51 = vrot.slane %v798_v42, %v806_v46  ;;  %v797_v54 = vld [vmem:[%s1470_s3 + $0x38] sm:$0xff] }
 0x145   : > { %v810_v55 = vadd.f32 %v803_v50, %v790_v43  ;;  %v811_v56 = vadd.f32 %v807_v51, %v791_v45  ;;  %v812_v57 = vadd.f32 %v803_v50, %v792_v47  ;;  %v813_v58 = vadd.f32 %v807_v51, %v793_v48 }
 0x146   : > { %v814_v59 = vadd.f32 %v803_v50, %v794_v49  ;;  %v815_v60 = vadd.f32 %v807_v51, %v795_v52  ;;  %v816_v61 = vadd.f32 %v803_v50, %v796_v53  ;;  %v817_v62 = vadd.f32 %v807_v51, %v797_v54 }
 0x147   : > { %818 = vst [vmem:[%s1470_s3] sm:$0xff] %v810_v55  ;;  %819 = vst [vmem:[%s1470_s3 + $0x8] sm:$0xff] %v811_v56 }
 0x148   : > { %820 = vst [vmem:[%s1470_s3 + $0x10] sm:$0xff] %v812_v57  ;;  %821 = vst [vmem:[%s1470_s3 + $0x18] sm:$0xff] %v813_v58 }
 0x149   : > { %822 = vst [vmem:[%s1470_s3 + $0x20] sm:$0xff] %v814_v59  ;;  %823 = vst [vmem:[%s1470_s3 + $0x28] sm:$0xff] %v815_v60 }
 0x14a   : > { %824 = vst [vmem:[%s1470_s3 + $0x30] sm:$0xff] %v816_v61  ;;  %825 = vst [vmem:[%s1470_s3 + $0x38] sm:$0xff] %v817_v62 }
 0x14b PF: > { %s13_s16 = sadd.s32 1, %s1193_s16   ;;  %s1471_s12 = smov %s1181_s13 }
 0x14c   : > { %p10_p12 = scmp.ge.s32.totalorder %s13_s16, 8   ;;  %s1472_s13 = smov %s1252_s20 }
 0x14d   : > { %s1473_s14 = smov %s1189_s15  ;;  %s1474_s15 = smov %s1476_s17 }
 0x14e   :  { %12 = sbr.rel (!%p10_p12) target bundleno = 3 (0x3), region = 113 }

// kernel: tile.13
= control target key start
LH: loop header
LB: loop body
LE: loop exit
PB: predicated region body
PF: predicated region fallthrough
CT: control target
= control target key end

     0   :  { %s22_s0 = inlined_call_operand.vmem [shape: f32[128], index: 0, kind: input, shape index: {}]   ;;  %s23_s1 = inlined_call_operand.vmem [shape: f32[4,128], index: 1, kind: output, shape index: {}]  }
   0x1   :  { %v4_v0 = vld [vmem:[%s22_s0] ss:$0 sm:$0xff] }
   0x2   :  { %5 = vst [vmem:[%s23_s1] sm:$0xf] %v4_v0 }

// kernel: generator_forward.33
= control target key start
LH: loop header
LB: loop body
LE: loop exit
PB: predicated region body
PF: predicated region fallthrough
CT: control target
= control target key end

     0   :  { %s2163_s0 = inlined_call_operand.vmem [shape: bf16[32,1024], index: 0, kind: input, shape index: {}]   ;;  %s2164_s1 = inlined_call_operand.vmem [shape: bf16[1024,512], index: 1, kind: input, shape index: {}]   ;;  %s2165_s2 = inlined_call_operand.vmem [shape: f32[1,512], index: 2, kind: input, shape index: {}]   ;;  %s2166_s3 = inlined_call_operand.vmem [shape: f32[32,512], index: 3, kind: output, shape index: {}]  }
   0x1   :  { %2168 = sst [smem:[#allocation6_spill]] %s2163_s0 }
   0x2   :  { %2169 = sst [smem:[#allocation7_spill]] %s2164_s1 }
   0x3   :  { %s1733_s12 = smov 0   ;;  %s1735_s13 = smov 0  }
   0x4   :  { %s1737_s14 = smov 0   ;;  %s1739_s15 = smov 0  }
   0x5   :  { %s1741_s16 = smov 0   ;;  %s1743_s17 = smov 0  }
   0x6   :  { %s1745_s18 = smov 0   ;;  %s1747_s19 = smov 0  }
   0x7   :  { %s1749_s20 = smov 0   ;;  %s1751_s21 = smov 0  }
   0x8   :  { %s1753_s22 = smov 0  }
   0x9 LB: > { %s1328_s23 = sadd.s32 4294967295, %s1710_s22   ;;  %s25_s24 = sadd.s32 1, %s1702_s20  ;;  %s1710_s22 = sphi %s1753_s22, %s13_s22   ;;  %s1706_s21 = sphi %s1751_s21, %s2186_s21   ;;  %s1702_s20 = sphi %s1749_s20, %s2185_s20   ;;  %s1698_s19 = sphi %s1747_s19, %s2184_s19   ;;  %s1694_s18 = sphi %s1745_s18, %s2183_s18   ;;  %s1690_s17 = sphi %s1743_s17, %s2182_s17   ;;  %s1686_s16 = sphi %s1741_s16, %s2181_s16   ;;  %s1682_s15 = sphi %s1739_s15, %s2180_s15   ;;  %s1678_s14 = sphi %s1737_s14, %s2179_s14   ;;  %s1674_s13 = sphi %s1735_s13, %s2178_s13   ;;  %s1670_s12 = sphi %s1733_s12, %s2177_s12  }
   0xa   : > { %p26_p0 = scmp.ge.s32.totalorder %s25_s24, 2  ;;  %s28_s25 = sadd.s32 1, %s1706_s21 }
   0xb   : > { %s41_s26 = sadd.s32 1, %s1690_s17  ;;  %p48_p1 = scmp.ne.s32.totalorder %s1690_s17, %s1686_s16 }
   0xc   : > { %s2188_s24 = smov (%p26_p0, %s25_s24), 0  ;;  %s2190_s25 = smov (!%p26_p0, %s28_s25), %s1706_s21 }
   0xd   : > { %s37_s27 = ssub.s32 %s1702_s20, %s2188_s24  ;;  %p49_p2 = scmp.eq.s32.totalorder %s1710_s22, 0 }
   0xe   : > { %p30_p3 = scmp.ge.s32.totalorder %s2190_s25, 2  ;;  %p39_p4 = scmp.eq.s32.totalorder %s37_s27, 0 }
   0xf   : > { %p1800_p5 = por %p49_p2, %p48_p1  ;;  %s69_s29 = sadd.s32 1, %s1682_s15 }
  0x10   : > { %s2192_s25 = smov (%p30_p3, %s2190_s25), 0  ;;  %p76_p6 = scmp.ne.s32.totalorder %s1682_s15, %s1678_s14 }
  0x11   : > { %2171 = sst [smem:[#allocation5_spill]] %s2192_s25  ;;  %s65_s4 = ssub.s32 %s1706_s21, %s2192_s25 }
  0x12   : > { %s1808_s30 = scalar_select %p39_p4, %s1690_s17, %s41_s26  }
  0x13   : > { %s66_s5 = sor.u32 %s65_s4, %s37_s27  ;;  %p121_p7 = scmp.eq.s32.totalorder %s65_s4, 0 }
  0x14   : > { %p67_p8 = scmp.eq.s32.totalorder %s66_s5, 0  ;;  %p1814_p9 = por %p76_p6, %p49_p2 }
  0x15   : > { %s123_s7 = sadd.s32 1, %s1674_s13  ;;  %p133_p10 = scmp.ne.s32.totalorder %s1674_s13, %s1670_s12 }
  0x16   : > { %s1822_s8 = scalar_select %p67_p8, %s1682_s15, %s69_s29  }
  0x17   : > { %s1825_s9 = scalar_select %p121_p7, %s1674_s13, %s123_s7  }
  0x18   : > { %p134_p11 = scmp.eq.s32.totalorder %s1328_s23, 3  ;;  %p1331_p13 = scmp.ge.s32.totalorder %s1710_s22, 4 }
  0x1a   : > { %p1827_p12 = por %p134_p11, %p133_p10  ;;  %156 = sbr.rel (%p1331_p13) target bundleno = 87 (0x57), region = 16 }
  0x1f   : > { %159 = sbr.rel (!%p1800_p5) target bundleno = 45 (0x2d), region = 20  ;;  %s161_s11 = sand.u32 (%p1800_p5), 1, %s1690_s17  }
  0x20   : > { %s1424_s26 = sshll.u32 (%p1800_p5), %s1702_s20, 4  ;;  %s1332_s27 = sshll.u32 (%p1800_p5), %s161_s11, 6 }
  0x21   : > { %s2174_s0 = sld [smem:[#allocation6_spill]] (%p1800_p5)  ;;  %s163_s23 = scalar_lea.vmem (%p1800_p5), [#allocation2], %s1332_s27 }
  0x27   : > { %s169_s5 = scalar_lea.vmem %s2174_s0, %s1424_s26 }
  0x28   : > { %v182_v0 = vld [vmem:[%s169_s5] sm:$0xff]  ;;  %v184_v1 = vld [vmem:[%s169_s5 + $0x8] sm:$0xff] }
  0x29   : > { %v186_v2 = vld [vmem:[%s169_s5 + $0x20] sm:$0xff]  ;;  %183 = vst [vmem:[%s163_s23] sm:$0xff] %v182_v0  ;;  %185 = vst [vmem:[%s163_s23 + $0x8] sm:$0xff] %v184_v1  ;;  %v188_v3 = vld [vmem:[%s169_s5 + $0x28] sm:$0xff] }
  0x2a   : > { %187 = vst [vmem:[%s163_s23 + $0x10] sm:$0xff] %v186_v2  ;;  %v190_v4 = vld [vmem:[%s169_s5 + $0x40] sm:$0xff]  ;;  %v192_v5 = vld [vmem:[%s169_s5 + $0x48] sm:$0xff]  ;;  %189 = vst [vmem:[%s163_s23 + $0x18] sm:$0xff] %v188_v3 }
  0x2b   : > { %191 = vst [vmem:[%s163_s23 + $0x20] sm:$0xff] %v190_v4  ;;  %193 = vst [vmem:[%s163_s23 + $0x28] sm:$0xff] %v192_v5  ;;  %v194_v6 = vld [vmem:[%s169_s5 + $0x60] sm:$0xff]  ;;  %v196_v7 = vld [vmem:[%s169_s5 + $0x68] sm:$0xff] }
  0x2c   : > { %195 = vst [vmem:[%s163_s23 + $0x30] sm:$0xff] %v194_v6  ;;  %197 = vst [vmem:[%s163_s23 + $0x38] sm:$0xff] %v196_v7 }
  0x2d PF: > { %203 = sbr.rel (!%p1814_p9) target bundleno = 87 (0x57), region = 43  ;;  %s205_s28 = sand.u32 (%p1814_p9), 1, %s1682_s15  }
  0x2e   : > { %s1337_s7 = sshll.u32 (%p1814_p9), %s1706_s21, 1  ;;  %s1335_s11 = sshll.u32 (%p1814_p9), %s205_s28, 9 }
  0x2f   : > { %s1425_s26 = sshll.u32 (%p1814_p9), %s1702_s20, 8  ;;  %s2175_s1 = sld [smem:[#allocation7_spill]] (%p1814_p9) }
  0x30   : > { %s211_s27 = sadd.s32 (%p1814_p9), %s1425_s26, %s1337_s7  ;;  %s1852_s6 = scalar_lea.vmem (%p1814_p9), [#allocation3], %s1335_s11 }
  0x31   : > { %s1339_s29 = sshll.u32 (%p1814_p9), %s211_s27, 2 }
  0x35   : > { %s1847_s25 = scalar_lea.vmem %s2175_s1, %s1339_s29 }
  0x36   : > { %v368_v8 = vld [vmem:[%s1847_s25] sm:$0xff]  ;;  %v370_v9 = vld [vmem:[%s1847_s25 + $0x10] sm:$0xff] }
  0x37   : > { %v372_v10 = vld [vmem:[%s1847_s25 + $0x20] sm:$0xff]  ;;  %369 = vst [vmem:[%s1852_s6] sm:$0xff] %v368_v8  ;;  %371 = vst [vmem:[%s1852_s6 + $0x8] sm:$0xff] %v370_v9  ;;  %v374_v11 = vld [vmem:[%s1847_s25 + $0x30] sm:$0xff] }
  0x38   : > { %373 = vst [vmem:[%s1852_s6 + $0x10] sm:$0xff] %v372_v10  ;;  %v376_v12 = vld [vmem:[%s1847_s25 + $0x40] sm:$0xff]  ;;  %v378_v13 = vld [vmem:[%s1847_s25 + $0x50] sm:$0xff]  ;;  %375 = vst [vmem:[%s1852_s6 + $0x18] sm:$0xff] %v374_v11 }
  0x39   : > { %377 = vst [vmem:[%s1852_s6 + $0x20] sm:$0xff] %v376_v12  ;;  %379 = vst [vmem:[%s1852_s6 + $0x28] sm:$0xff] %v378_v13  ;;  %v380_v14 = vld [vmem:[%s1847_s25 + $0x60] sm:$0xff]  ;;  %v382_v15 = vld [vmem:[%s1847_s25 + $0x70] sm:$0xff] }
  0x3a   : > { %v384_v16 = vld [vmem:[%s1847_s25 + $0x80] sm:$0xff]  ;;  %381 = vst [vmem:[%s1852_s6 + $0x30] sm:$0xff] %v380_v14  ;;  %383 = vst [vmem:[%s1852_s6 + $0x38] sm:$0xff] %v382_v15  ;;  %v386_v17 = vld [vmem:[%s1847_s25 + $0x90] sm:$0xff] }
  0x3b   : > { %385 = vst [vmem:[%s1852_s6 + $0x40] sm:$0xff] %v384_v16  ;;  %v388_v18 = vld [vmem:[%s1847_s25 + $0xa0] sm:$0xff]  ;;  %v390_v19 = vld [vmem:[%s1847_s25 + $0xb0] sm:$0xff]  ;;  %387 = vst [vmem:[%s1852_s6 + $0x48] sm:$0xff] %v386_v17 }
  0x3c   : > { %389 = vst [vmem:[%s1852_s6 + $0x50] sm:$0xff] %v388_v18  ;;  %391 = vst [vmem:[%s1852_s6 + $0x58] sm:$0xff] %v390_v19  ;;  %v392_v20 = vld [vmem:[%s1847_s25 + $0xc0] sm:$0xff]  ;;  %v394_v21 = vld [vmem:[%s1847_s25 + $0xd0] sm:$0xff] }
  0x3d   : > { %v396_v22 = vld [vmem:[%s1847_s25 + $0xe0] sm:$0xff]  ;;  %393 = vst [vmem:[%s1852_s6 + $0x60] sm:$0xff] %v392_v20  ;;  %395 = vst [vmem:[%s1852_s6 + $0x68] sm:$0xff] %v394_v21  ;;  %v398_v23 = vld [vmem:[%s1847_s25 + $0xf0] sm:$0xff] }
  0x3e   : > { %397 = vst [vmem:[%s1852_s6 + $0x70] sm:$0xff] %v396_v22  ;;  %v400_v24 = vld [vmem:[%s1847_s25 + $0x100] sm:$0xff]  ;;  %v402_v25 = vld [vmem:[%s1847_s25 + $0x110] sm:$0xff]  ;;  %399 = vst [vmem:[%s1852_s6 + $0x78] sm:$0xff] %v398_v23 }
  0x3f   : > { %401 = vst [vmem:[%s1852_s6 + $0x80] sm:$0xff] %v400_v24  ;;  %403 = vst [vmem:[%s1852_s6 + $0x88] sm:$0xff] %v402_v25  ;;  %v404_v26 = vld [vmem:[%s1847_s25 + $0x120] sm:$0xff]  ;;  %v406_v27 = vld [vmem:[%s1847_s25 + $0x130] sm:$0xff] }
  0x40   : > { %v408_v28 = vld [vmem:[%s1847_s25 + $0x140] sm:$0xff]  ;;  %405 = vst [vmem:[%s1852_s6 + $0x90] sm:$0xff] %v404_v26  ;;  %407 = vst [vmem:[%s1852_s6 + $0x98] sm:$0xff] %v406_v27  ;;  %v410_v29 = vld [vmem:[%s1847_s25 + $0x150] sm:$0xff] }
  0x41   : > { %409 = vst [vmem:[%s1852_s6 + $0xa0] sm:$0xff] %v408_v28  ;;  %v412_v30 = vld [vmem:[%s1847_s25 + $0x160] sm:$0xff]  ;;  %v414_v31 = vld [vmem:[%s1847_s25 + $0x170] sm:$0xff]  ;;  %411 = vst [vmem:[%s1852_s6 + $0xa8] sm:$0xff] %v410_v29 }
  0x42   : > { %413 = vst [vmem:[%s1852_s6 + $0xb0] sm:$0xff] %v412_v30  ;;  %415 = vst [vmem:[%s1852_s6 + $0xb8] sm:$0xff] %v414_v31  ;;  %v416_v32 = vld [vmem:[%s1847_s25 + $0x180] sm:$0xff]  ;;  %v418_v33 = vld [vmem:[%s1847_s25 + $0x190] sm:$0xff] }
  0x43   : > { %v420_v34 = vld [vmem:[%s1847_s25 + $0x1a0] sm:$0xff]  ;;  %417 = vst [vmem:[%s1852_s6 + $0xc0] sm:$0xff] %v416_v32  ;;  %419 = vst [vmem:[%s1852_s6 + $0xc8] sm:$0xff] %v418_v33  ;;  %v422_v35 = vld [vmem:[%s1847_s25 + $0x1b0] sm:$0xff] }
  0x44   : > { %421 = vst [vmem:[%s1852_s6 + $0xd0] sm:$0xff] %v420_v34  ;;  %v424_v36 = vld [vmem:[%s1847_s25 + $0x1c0] sm:$0xff]  ;;  %v426_v37 = vld [vmem:[%s1847_s25 + $0x1d0] sm:$0xff]  ;;  %423 = vst [vmem:[%s1852_s6 + $0xd8] sm:$0xff] %v422_v35 }
  0x45   : > { %425 = vst [vmem:[%s1852_s6 + $0xe0] sm:$0xff] %v424_v36  ;;  %427 = vst [vmem:[%s1852_s6 + $0xe8] sm:$0xff] %v426_v37  ;;  %v428_v38 = vld [vmem:[%s1847_s25 + $0x1e0] sm:$0xff]  ;;  %v430_v39 = vld [vmem:[%s1847_s25 + $0x1f0] sm:$0xff] }
  0x46   : > { %v432_v40 = vld [vmem:[%s1847_s25 + $0x200] sm:$0xff]  ;;  %429 = vst [vmem:[%s1852_s6 + $0xf0] sm:$0xff] %v428_v38  ;;  %431 = vst [vmem:[%s1852_s6 + $0xf8] sm:$0xff] %v430_v39  ;;  %v434_v41 = vld [vmem:[%s1847_s25 + $0x210] sm:$0xff] }
  0x47   : > { %433 = vst [vmem:[%s1852_s6 + $0x100] sm:$0xff] %v432_v40  ;;  %v436_v42 = vld [vmem:[%s1847_s25 + $0x220] sm:$0xff]  ;;  %v438_v43 = vld [vmem:[%s1847_s25 + $0x230] sm:$0xff]  ;;  %435 = vst [vmem:[%s1852_s6 + $0x108] sm:$0xff] %v434_v41 }
  0x48   : > { %437 = vst [vmem:[%s1852_s6 + $0x110] sm:$0xff] %v436_v42  ;;  %439 = vst [vmem:[%s1852_s6 + $0x118] sm:$0xff] %v438_v43  ;;  %v440_v44 = vld [vmem:[%s1847_s25 + $0x240] sm:$0xff]  ;;  %v442_v45 = vld [vmem:[%s1847_s25 + $0x250] sm:$0xff] }
  0x49   : > { %v444_v46 = vld [vmem:[%s1847_s25 + $0x260] sm:$0xff]  ;;  %441 = vst [vmem:[%s1852_s6 + $0x120] sm:$0xff] %v440_v44  ;;  %443 = vst [vmem:[%s1852_s6 + $0x128] sm:$0xff] %v442_v45  ;;  %v446_v47 = vld [vmem:[%s1847_s25 + $0x270] sm:$0xff] }
  0x4a   : > { %445 = vst [vmem:[%s1852_s6 + $0x130] sm:$0xff] %v444_v46  ;;  %v448_v48 = vld [vmem:[%s1847_s25 + $0x280] sm:$0xff]  ;;  %v450_v49 = vld [vmem:[%s1847_s25 + $0x290] sm:$0xff]  ;;  %447 = vst [vmem:[%s1852_s6 + $0x138] sm:$0xff] %v446_v47 }
  0x4b   : > { %449 = vst [vmem:[%s1852_s6 + $0x140] sm:$0xff] %v448_v48  ;;  %451 = vst [vmem:[%s1852_s6 + $0x148] sm:$0xff] %v450_v49  ;;  %v452_v50 = vld [vmem:[%s1847_s25 + $0x2a0] sm:$0xff]  ;;  %v454_v51 = vld [vmem:[%s1847_s25 + $0x2b0] sm:$0xff] }
  0x4c   : > { %v456_v52 = vld [vmem:[%s1847_s25 + $0x2c0] sm:$0xff]  ;;  %453 = vst [vmem:[%s1852_s6 + $0x150] sm:$0xff] %v452_v50  ;;  %455 = vst [vmem:[%s1852_s6 + $0x158] sm:$0xff] %v454_v51  ;;  %v458_v53 = vld [vmem:[%s1847_s25 + $0x2d0] sm:$0xff] }
  0x4d   : > { %457 = vst [vmem:[%s1852_s6 + $0x160] sm:$0xff] %v456_v52  ;;  %v460_v54 = vld [vmem:[%s1847_s25 + $0x2e0] sm:$0xff]  ;;  %v462_v55 = vld [vmem:[%s1847_s25 + $0x2f0] sm:$0xff]  ;;  %459 = vst [vmem:[%s1852_s6 + $0x168] sm:$0xff] %v458_v53 }
  0x4e   : > { %461 = vst [vmem:[%s1852_s6 + $0x170] sm:$0xff] %v460_v54  ;;  %463 = vst [vmem:[%s1852_s6 + $0x178] sm:$0xff] %v462_v55  ;;  %v464_v56 = vld [vmem:[%s1847_s25 + $0x300] sm:$0xff]  ;;  %v466_v57 = vld [vmem:[%s1847_s25 + $0x310] sm:$0xff] }
  0x4f   : > { %v468_v58 = vld [vmem:[%s1847_s25 + $0x320] sm:$0xff]  ;;  %465 = vst [vmem:[%s1852_s6 + $0x180] sm:$0xff] %v464_v56  ;;  %467 = vst [vmem:[%s1852_s6 + $0x188] sm:$0xff] %v466_v57  ;;  %v470_v59 = vld [vmem:[%s1847_s25 + $0x330] sm:$0xff] }
  0x50   : > { %469 = vst [vmem:[%s1852_s6 + $0x190] sm:$0xff] %v468_v58  ;;  %v472_v60 = vld [vmem:[%s1847_s25 + $0x340] sm:$0xff]  ;;  %v474_v61 = vld [vmem:[%s1847_s25 + $0x350] sm:$0xff]  ;;  %471 = vst [vmem:[%s1852_s6 + $0x198] sm:$0xff] %v470_v59 }
  0x51   : > { %473 = vst [vmem:[%s1852_s6 + $0x1a0] sm:$0xff] %v472_v60  ;;  %475 = vst [vmem:[%s1852_s6 + $0x1a8] sm:$0xff] %v474_v61  ;;  %v476_v62 = vld [vmem:[%s1847_s25 + $0x360] sm:$0xff]  ;;  %v478_v63 = vld [vmem:[%s1847_s25 + $0x370] sm:$0xff] }
  0x52   : > { %v480_v0 = vld [vmem:[%s1847_s25 + $0x380] sm:$0xff]  ;;  %477 = vst [vmem:[%s1852_s6 + $0x1b0] sm:$0xff] %v476_v62  ;;  %479 = vst [vmem:[%s1852_s6 + $0x1b8] sm:$0xff] %v478_v63  ;;  %v482_v1 = vld [vmem:[%s1847_s25 + $0x390] sm:$0xff] }
  0x53   : > { %481 = vst [vmem:[%s1852_s6 + $0x1c0] sm:$0xff] %v480_v0  ;;  %v484_v2 = vld [vmem:[%s1847_s25 + $0x3a0] sm:$0xff]  ;;  %v486_v3 = vld [vmem:[%s1847_s25 + $0x3b0] sm:$0xff]  ;;  %483 = vst [vmem:[%s1852_s6 + $0x1c8] sm:$0xff] %v482_v1 }
  0x54   : > { %485 = vst [vmem:[%s1852_s6 + $0x1d0] sm:$0xff] %v484_v2  ;;  %487 = vst [vmem:[%s1852_s6 + $0x1d8] sm:$0xff] %v486_v3  ;;  %v488_v4 = vld [vmem:[%s1847_s25 + $0x3c0] sm:$0xff]  ;;  %v490_v5 = vld [vmem:[%s1847_s25 + $0x3d0] sm:$0xff] }
  0x55   : > { %v492_v6 = vld [vmem:[%s1847_s25 + $0x3e0] sm:$0xff]  ;;  %489 = vst [vmem:[%s1852_s6 + $0x1e0] sm:$0xff] %v488_v4  ;;  %491 = vst [vmem:[%s1852_s6 + $0x1e8] sm:$0xff] %v490_v5  ;;  %v494_v7 = vld [vmem:[%s1847_s25 + $0x3f0] sm:$0xff] }
  0x56   : > { %493 = vst [vmem:[%s1852_s6 + $0x1f0] sm:$0xff] %v492_v6  ;;  %495 = vst [vmem:[%s1852_s6 + $0x1f8] sm:$0xff] %v494_v7 }
  0x57 PF: > { %p1340_p0 = scmp.ge.s32.totalorder %s1710_s22, 1  ;;  %p508_p1 = scmp.lt.s32.totalorder %s1710_s22, 5 }
  0x59   : > { %p509_p2 = pnand %p1340_p0, %p508_p1 }
  0x5a   : > { %s515_s0 = sand.u32 (!%p509_p2), 1, %s1686_s16   ;;  %s522_s5 = sand.u32 (!%p509_p2), 1, %s1678_s14  }
  0x5b   : > { %512 = sbr.rel (%p509_p2) target bundleno = 408 (0x198), region = 85  ;;  %s1341_s23 = sshll.u32 (!%p509_p2), %s515_s0, 6 }
  0x5c   : > { %s1342_s28 = sshll.u32 (!%p509_p2), %s522_s5, 9  ;;  %s549_s7 = sand.u32 (!%p509_p2), 1, %s1670_s12  }
  0x5d   : > { %s1344_s11 = sshll.u32 (!%p509_p2), %s1698_s19, 1  ;;  %s1343_s25 = sshll.u32 (!%p509_p2), %s549_s7, 6 }
  0x5e   : > { %p557_p3 = scmp.lt.s32.totalorder (!%p509_p2), %s1344_s11, 3  ;;  %s1991_s4 = scalar_lea.vmem (!%p509_p2), [#allocation2], %s1341_s23 }
  0x5f   : > { %s1993_s6 = scalar_lea.vmem (!%p509_p2), [#allocation3], %s1342_s28  ;;  %s1995_s1 = scalar_lea.vmem (!%p509_p2), [#allocation4], %s1343_s25 }
  0x60   : > { %s2194_s11 = smov (!%p557_p3, %s1344_s11), 3  ;;  %p1345_p4 = scmp.ne.s32.totalorder %s1694_s18, 0 }
  0x61   : > { %s559_s29 = scalar_lea.vmem %s2165_s2, %s2194_s11 }
  0x62   : > { %566 = sbr.rel (%p1345_p4) target bundleno = 108 (0x6c), region = 97 }
  0x67   : > { %v1712_v8 = vmov 0.0  }
  0x68   : > { %567 = vst [vmem:[%s1995_s1] sm:$0xff] %v1712_v8  ;;  %568 = vst [vmem:[%s1995_s1 + $0x8] sm:$0xff] %v1712_v8 }
  0x69   : > { %569 = vst [vmem:[%s1995_s1 + $0x10] sm:$0xff] %v1712_v8  ;;  %570 = vst [vmem:[%s1995_s1 + $0x18] sm:$0xff] %v1712_v8 }
  0x6a   : > { %571 = vst [vmem:[%s1995_s1 + $0x20] sm:$0xff] %v1712_v8  ;;  %572 = vst [vmem:[%s1995_s1 + $0x28] sm:$0xff] %v1712_v8 }
  0x6b   : > { %573 = vst [vmem:[%s1995_s1 + $0x30] sm:$0xff] %v1712_v8  ;;  %574 = vst [vmem:[%s1995_s1 + $0x38] sm:$0xff] %v1712_v8 }
  0x6c PF: > { %v1516_v9 = vld [vmem:[%s1993_s6 + $0x74] ss:$8 sps:$4 sm:$0xff]   ;;  %v1520_v11 = vld [vmem:[%s1993_s6 + $0x70] ss:$8 sps:$4 sm:$0xff]   ;;  %v1522_v13 = vld [vmem:[%s1993_s6 + $0x64] ss:$8 sps:$4 sm:$0xff]  }
  0x6d   : > { %v1518_v10 = vld [vmem:[%s1993_s6 + $0x174] ss:$8 sps:$4 sm:$0xff]   ;;  %1015 = vmatprep.subr.bf16.mxu0 %v1516_v9  ;;  %v1521_v12 = vld [vmem:[%s1993_s6 + $0x170] ss:$8 sps:$4 sm:$0xff]   ;;  %v1524_v14 = vld [vmem:[%s1993_s6 + $0x164] ss:$8 sps:$4 sm:$0xff]  }
  0x6e   : > { %1068 = vmatprep.subr.bf16.mxu1 %v1518_v10  ;;  %1016 = vmatpush1.bf16.msra.mxu0 %v1520_v11  ;;  %v1526_v15 = vld [vmem:[%s1993_s6 + $0x60] ss:$8 sps:$4 sm:$0xff]   ;;  %v1528_v17 = vld [vmem:[%s1993_s6 + $0x54] ss:$8 sps:$4 sm:$0xff]   ;;  %v1532_v19 = vld [vmem:[%s1993_s6 + $0x50] ss:$8 sps:$4 sm:$0xff]  }
  0x6f   : > { %1069 = vmatpush1.bf16.msra.mxu1 %v1521_v12  ;;  %1017 = vmatprep.subr.bf16.mxu0 %v1522_v13  ;;  %v1527_v16 = vld [vmem:[%s1993_s6 + $0x160] ss:$8 sps:$4 sm:$0xff]   ;;  %v1530_v18 = vld [vmem:[%s1993_s6 + $0x154] ss:$8 sps:$4 sm:$0xff]   ;;  %v1533_v20 = vld [vmem:[%s1993_s6 + $0x150] ss:$8 sps:$4 sm:$0xff]  }
  0x70   : > { %1070 = vmatprep.subr.bf16.mxu1 %v1524_v14  ;;  %v1534_v21 = vld [vmem:[%s1993_s6 + $0x44] ss:$8 sps:$4 sm:$0xff]   ;;  %v1538_v23 = vld [vmem:[%s1993_s6 + $0x40] ss:$8 sps:$4 sm:$0xff]   ;;  %v1540_v25 = vld [vmem:[%s1993_s6 + $0x34] ss:$8 sps:$4 sm:$0xff]  }
  0x71   : > { %v1536_v22 = vld [vmem:[%s1993_s6 + $0x144] ss:$8 sps:$4 sm:$0xff]   ;;  %v1539_v24 = vld [vmem:[%s1993_s6 + $0x140] ss:$8 sps:$4 sm:$0xff]   ;;  %v1542_v26 = vld [vmem:[%s1993_s6 + $0x134] ss:$8 sps:$4 sm:$0xff]  }
  0x72   : > { %1018 = vmatpush1.bf16.msra.mxu0 %v1526_v15  ;;  %v1544_v27 = vld [vmem:[%s1993_s6 + $0x30] ss:$8 sps:$4 sm:$0xff]   ;;  %v1546_v29 = vld [vmem:[%s1993_s6 + $0x24] ss:$8 sps:$4 sm:$0xff]   ;;  %v1550_v31 = vld [vmem:[%s1993_s6 + $0x20] ss:$8 sps:$4 sm:$0xff]  }
  0x73   : > { %1071 = vmatpush1.bf16.msra.mxu1 %v1527_v16  ;;  %1019 = vmatprep.subr.bf16.mxu0 %v1528_v17  ;;  %v1545_v28 = vld [vmem:[%s1993_s6 + $0x130] ss:$8 sps:$4 sm:$0xff]   ;;  %v1548_v30 = vld [vmem:[%s1993_s6 + $0x124] ss:$8 sps:$4 sm:$0xff]   ;;  %v1551_v32 = vld [vmem:[%s1993_s6 + $0x120] ss:$8 sps:$4 sm:$0xff]  }
  0x74   : > { %1072 = vmatprep.subr.bf16.mxu1 %v1530_v18  ;;  %v1552_v33 = vld [vmem:[%s1993_s6 + $0x14] ss:$8 sps:$4 sm:$0xff]   ;;  %v1556_v35 = vld [vmem:[%s1993_s6 + $0x10] ss:$8 sps:$4 sm:$0xff]   ;;  %v1558_v37 = vld [vmem:[%s1993_s6 + $0x4] ss:$8 sps:$4 sm:$0xff]  }
  0x75   : > { %v1554_v34 = vld [vmem:[%s1993_s6 + $0x114] ss:$8 sps:$4 sm:$0xff]   ;;  %v1557_v36 = vld [vmem:[%s1993_s6 + $0x110] ss:$8 sps:$4 sm:$0xff]   ;;  %v1560_v38 = vld [vmem:[%s1993_s6 + $0x104] ss:$8 sps:$4 sm:$0xff]  }
  0x76   : > { %1020 = vmatpush1.bf16.msra.mxu0 %v1532_v19  ;;  %v1562_v39 = vld [vmem:[%s1993_s6] ss:$8 sps:$4 sm:$0xff]   ;;  %v1564_v41 = vld [vmem:[%s1993_s6 + $0xf4] ss:$8 sps:$4 sm:$0xff]   ;;  %v1568_v43 = vld [vmem:[%s1993_s6 + $0xf0] ss:$8 sps:$4 sm:$0xff]  }
  0x77   : > { %1073 = vmatpush1.bf16.msra.mxu1 %v1533_v20  ;;  %1021 = vmatprep.subr.bf16.mxu0 %v1534_v21  ;;  %v1563_v40 = vld [vmem:[%s1993_s6 + $0x100] ss:$8 sps:$4 sm:$0xff]   ;;  %v1566_v42 = vld [vmem:[%s1993_s6 + $0x1f4] ss:$8 sps:$4 sm:$0xff]   ;;  %v1569_v44 = vld [vmem:[%s1993_s6 + $0x1f0] ss:$8 sps:$4 sm:$0xff]  }
  0x78   : > { %1074 = vmatprep.subr.bf16.mxu1 %v1536_v22  ;;  %v1570_v45 = vld [vmem:[%s1993_s6 + $0xe4] ss:$8 sps:$4 sm:$0xff]   ;;  %v1574_v47 = vld [vmem:[%s1993_s6 + $0xe0] ss:$8 sps:$4 sm:$0xff]   ;;  %v1576_v49 = vld [vmem:[%s1993_s6 + $0xd4] ss:$8 sps:$4 sm:$0xff]  }
  0x79   : > { %v1572_v46 = vld [vmem:[%s1993_s6 + $0x1e4] ss:$8 sps:$4 sm:$0xff]   ;;  %v1575_v48 = vld [vmem:[%s1993_s6 + $0x1e0] ss:$8 sps:$4 sm:$0xff]   ;;  %v1578_v50 = vld [vmem:[%s1993_s6 + $0x1d4] ss:$8 sps:$4 sm:$0xff]  }
  0x7a   : > { %1022 = vmatpush1.bf16.msra.mxu0 %v1538_v23  ;;  %v1580_v51 = vld [vmem:[%s1993_s6 + $0xd0] ss:$8 sps:$4 sm:$0xff]   ;;  %v1582_v53 = vld [vmem:[%s1993_s6 + $0xc4] ss:$8 sps:$4 sm:$0xff]   ;;  %v1586_v55 = vld [vmem:[%s1993_s6 + $0xc0] ss:$8 sps:$4 sm:$0xff]  }
  0x7b   : > { %1075 = vmatpush1.bf16.msra.mxu1 %v1539_v24  ;;  %1023 = vmatprep.subr.bf16.mxu0 %v1540_v25  ;;  %v1581_v52 = vld [vmem:[%s1993_s6 + $0x1d0] ss:$8 sps:$4 sm:$0xff]   ;;  %v1584_v54 = vld [vmem:[%s1993_s6 + $0x1c4] ss:$8 sps:$4 sm:$0xff]   ;;  %v1587_v56 = vld [vmem:[%s1993_s6 + $0x1c0] ss:$8 sps:$4 sm:$0xff]  }
  0x7c   : > { %1076 = vmatprep.subr.bf16.mxu1 %v1542_v26  ;;  %v1588_v57 = vld [vmem:[%s1993_s6 + $0xb4] ss:$8 sps:$4 sm:$0xff]   ;;  %v1592_v61 = vld [vmem:[%s1993_s6 + $0xb0] ss:$8 sps:$4 sm:$0xff]   ;;  %v1594_v63 = vld [vmem:[%s1993_s6 + $0xa4] ss:$8 sps:$4 sm:$0xff]  }
  0x7d   : > { %v1614_v58 = vld [vmem:[%s1991_s4 + $0x4] ss:$16 sps:$4 sm:$0xff]   ;;  %v1617_v60 = vld [vmem:[%s1991_s4 + $0xc] ss:$16 sps:$4 sm:$0xff]   ;;  %v1593_v62 = vld [vmem:[%s1993_s6 + $0x1b0] ss:$8 sps:$4 sm:$0xff]  }
  0x7e   : > { %1024 = vmatpush1.bf16.msra.mxu0 %v1544_v27  ;;  %v1590_v59 = vld [vmem:[%s1993_s6 + $0x1b4] ss:$8 sps:$4 sm:$0xff]   ;;  %1047 = vmatprep.mubr.bf16.mxu0 %v1614_v58  ;;  %v1596_v0 = vld [vmem:[%s1993_s6 + $0x1a4] ss:$8 sps:$4 sm:$0xff]   ;;  %v1598_v1 = vld [vmem:[%s1993_s6 + $0xa0] ss:$8 sps:$4 sm:$0xff]  }
  0x7f   : > { %1077 = vmatpush1.bf16.msra.mxu1 %v1545_v28  ;;  %1025 = vmatprep.subr.bf16.mxu0 %v1546_v29  ;;  %v1599_v2 = vld [vmem:[%s1993_s6 + $0x1a0] ss:$8 sps:$4 sm:$0xff]   ;;  %v1600_v3 = vld [vmem:[%s1993_s6 + $0x94] ss:$8 sps:$4 sm:$0xff]   ;;  %v1604_v5 = vld [vmem:[%s1993_s6 + $0x90] ss:$8 sps:$4 sm:$0xff]  }
  0x80   : > { %1078 = vmatprep.subr.bf16.mxu1 %v1548_v30  ;;  %1100 = vmatprep.mubr.bf16.mxu1 %v1617_v60  ;;  %v1602_v4 = vld [vmem:[%s1993_s6 + $0x194] ss:$8 sps:$4 sm:$0xff]   ;;  %v1605_v6 = vld [vmem:[%s1993_s6 + $0x190] ss:$8 sps:$4 sm:$0xff]   ;;  %v1606_v7 = vld [vmem:[%s1993_s6 + $0x84] ss:$8 sps:$4 sm:$0xff]  }
  0x81   : > { %v1608_v8 = vld [vmem:[%s1993_s6 + $0x184] ss:$8 sps:$4 sm:$0xff]   ;;  %v1610_v9 = vld [vmem:[%s1993_s6 + $0x80] ss:$8 sps:$4 sm:$0xff]   ;;  %v577_v27 = vld [vmem:[%s1995_s1 + $0x10] sm:$0xff]  ;;  %p1418_p5 = scmp.ne.s32.totalorder %s1694_s18, 1 }
  0x82   : > { %1026 = vmatpush1.bf16.msra.mxu0 %v1550_v31  ;;  %v1611_v10 = vld [vmem:[%s1993_s6 + $0x180] ss:$8 sps:$4 sm:$0xff]   ;;  %v1618_v13 = vld [vmem:[%s1991_s4 + $0x24] ss:$16 sps:$4 sm:$0xff]   ;;  %v1620_v14 = vld [vmem:[%s1991_s4 + $0x2c] ss:$16 sps:$4 sm:$0xff]  }
  0x83   : > { %1079 = vmatpush1.bf16.msra.mxu1 %v1551_v32  ;;  %1027 = vmatprep.subr.bf16.mxu0 %v1552_v33  ;;  %v1612_v11 = vld [vmem:[%s1991_s4] ss:$16 sps:$4 sm:$0xff]   ;;  %v1615_v12 = vld [vmem:[%s1991_s4 + $0x8] ss:$16 sps:$4 sm:$0xff]  }
  0x84   : > { %1080 = vmatprep.subr.bf16.mxu1 %v1554_v34  ;;  %v1622_v15 = vld [vmem:[%s1991_s4 + $0x20] ss:$16 sps:$4 sm:$0xff]   ;;  %v1623_v16 = vld [vmem:[%s1991_s4 + $0x28] ss:$16 sps:$4 sm:$0xff]  }
  0x85   : > { %v575_v18 = vld [vmem:[%s1995_s1] sm:$0xff]  ;;  %v576_v22 = vld [vmem:[%s1995_s1 + $0x8] sm:$0xff]  ;;  %v578_v32 = vld [vmem:[%s1995_s1 + $0x18] sm:$0xff] }
  0x86   : > { %1028 = vmatpush1.bf16.msra.mxu0 %v1556_v35 }
  0x87   : > { %1081 = vmatpush1.bf16.msra.mxu1 %v1557_v36  ;;  %1029 = vmatprep.subr.bf16.mxu0 %v1558_v37  ;;  %v579_v37 = vld [vmem:[%s1995_s1 + $0x20] sm:$0xff] }
  0x88   : > { %1082 = vmatprep.subr.bf16.mxu1 %v1560_v38 }
  0x8a   : > { %1030 = vmatpush1.bf16.msra.mxu0 %v1562_v39 }
  0x8b   : > { %1083 = vmatpush1.bf16.msra.mxu1 %v1563_v40  ;;  %1031 = vmatprep.subr.bf16.mxu0 %v1564_v41 }
  0x8c   : > { %1084 = vmatprep.subr.bf16.mxu1 %v1566_v42  ;;  %v580_v42 = vld [vmem:[%s1995_s1 + $0x28] sm:$0xff] }
  0x8e   : > { %1032 = vmatpush2.bf16.msra.mxu0 %v1568_v43 }
  0x8f   : > { %1085 = vmatpush2.bf16.msra.mxu1 %v1569_v44  ;;  %1033 = vmatprep.subr.bf16.mxu0 %v1570_v45 }
  0x90   : > { %1086 = vmatprep.subr.bf16.mxu1 %v1572_v46 }
  0x92   : > { %1034 = vmatpush2.bf16.msra.mxu0 %v1574_v47  ;;  %v581_v47 = vld [vmem:[%s1995_s1 + $0x30] sm:$0xff] }
  0x93   : > { %1087 = vmatpush2.bf16.msra.mxu1 %v1575_v48  ;;  %1035 = vmatprep.subr.bf16.mxu0 %v1576_v49 }
  0x94   : > { %1088 = vmatprep.subr.bf16.mxu1 %v1578_v50 }
  0x96   : > { %1036 = vmatpush2.bf16.msra.mxu0 %v1580_v51 }
  0x97   : > { %1089 = vmatpush2.bf16.msra.mxu1 %v1581_v52  ;;  %1037 = vmatprep.subr.bf16.mxu0 %v1582_v53  ;;  %v582_v52 = vld [vmem:[%s1995_s1 + $0x38] sm:$0xff] }
  0x98   : > { %1090 = vmatprep.subr.bf16.mxu1 %v1584_v54 }
  0x9a   : > { %1038 = vmatpush2.bf16.msra.mxu0 %v1586_v55 }
  0x9b   : > { %1091 = vmatpush2.bf16.msra.mxu1 %v1587_v56  ;;  %1039 = vmatprep.subr.bf16.mxu0 %v1588_v57 }
  0x9c   : > { %1092 = vmatprep.subr.bf16.mxu1 %v1590_v59 }
  0x9e   : > { %1040 = vmatpush2.bf16.msra.mxu0 %v1592_v61 }
  0x9f   : > { %1093 = vmatpush2.bf16.msra.mxu1 %v1593_v62  ;;  %1041 = vmatprep.subr.bf16.mxu0 %v1594_v63 }
  0xa0   : > { %1094 = vmatprep.subr.bf16.mxu1 %v1596_v0 }
  0xa2   : > { %1042 = vmatpush2.bf16.msra.mxu0 %v1598_v1 }
  0xa3   : > { %1095 = vmatpush2.bf16.msra.mxu1 %v1599_v2  ;;  %1043 = vmatprep.subr.bf16.mxu0 %v1600_v3 }
  0xa4   : > { %1096 = vmatprep.subr.bf16.mxu1 %v1602_v4 }
  0xa6   : > { %1044 = vmatpush2.bf16.msra.mxu0 %v1604_v5 }
  0xa7   : > { %1097 = vmatpush2.bf16.msra.mxu1 %v1605_v6  ;;  %1045 = vmatprep.subr.bf16.mxu0 %v1606_v7 }
  0xa8   : > { %1098 = vmatprep.subr.bf16.mxu1 %v1608_v8 }
  0xaa   : > { %1046 = vmatpush2.bf16.msra.mxu0 %v1610_v9 }
  0xab   : > { %1099 = vmatpush2.bf16.msra.mxu1 %v1611_v10 }
  0xad   : > { %1048 = vmatmul.mubr.bf16.vlgmr.msra.gmra.mxu0 %v1612_v11 }
  0xae   : > { %1101 = vmatmul.mubr.bf16.vlgmr.msra.gmra.mxu1 %v1615_v12  ;;  %1057 = vmatprep.mubr.bf16.mxu0 %v1618_v13 }
  0xaf   : > { %1110 = vmatprep.mubr.bf16.mxu1 %v1620_v14 }
  0xb5   : > { %1058 = vmatmul.mubr.bf16.gmra.mxu0 %v1622_v15 }
  0xb6   : > { %1111 = vmatmul.mubr.bf16.gmra.mxu1 %v1623_v16 }
 0x16d   : > { %v1049_v17 = vpop.f32.mrf.mxu0 }
 0x16e   : > { %v1102_v19 = vpop.f32.mrf.mxu1 }
 0x16f   : > { %v1103_v20 = vadd.f32 %v1102_v19, %v1049_v17  ;;  %v1051_v21 = vpop.f32.mrf.mxu0 }
 0x170   : > { %v1104_v23 = vpop.f32.mrf.mxu1 }
 0x171   : > { %v1121_v24 = vadd.f32 %v1103_v20, %v575_v18  ;;  %v1105_v25 = vadd.f32 %v1104_v23, %v1051_v21  ;;  %v1053_v26 = vpop.f32.mrf.mxu0 }
 0x172   : > { %v1106_v28 = vpop.f32.mrf.mxu1 }
 0x173   : > { %1129 = vst [vmem:[%s1995_s1] sm:$0xff] %v1121_v24  ;;  %v1122_v29 = vadd.f32 %v1105_v25, %v576_v22  ;;  %v1107_v30 = vadd.f32 %v1106_v28, %v1053_v26  ;;  %v1055_v31 = vpop.f32.mrf.mxu0 }
 0x174   : > { %v1108_v33 = vpop.f32.mrf.mxu1 }
 0x175   : > { %1130 = vst [vmem:[%s1995_s1 + $0x8] sm:$0xff] %v1122_v29  ;;  %v1123_v34 = vadd.f32 %v1107_v30, %v577_v27  ;;  %v1109_v35 = vadd.f32 %v1108_v33, %v1055_v31  ;;  %v1059_v36 = vpop.f32.mrf.mxu0 }
 0x176   : > { %v1112_v38 = vpop.f32.mrf.mxu1 }
 0x177   : > { %1131 = vst [vmem:[%s1995_s1 + $0x10] sm:$0xff] %v1123_v34  ;;  %v1124_v39 = vadd.f32 %v1109_v35, %v578_v32  ;;  %v1113_v40 = vadd.f32 %v1112_v38, %v1059_v36  ;;  %v1061_v41 = vpop.f32.mrf.mxu0 }
 0x178   : > { %v1114_v43 = vpop.f32.mrf.mxu1 }
 0x179   : > { %1132 = vst [vmem:[%s1995_s1 + $0x18] sm:$0xff] %v1124_v39  ;;  %v1125_v44 = vadd.f32 %v1113_v40, %v579_v37  ;;  %v1115_v45 = vadd.f32 %v1114_v43, %v1061_v41  ;;  %v1063_v46 = vpop.f32.mrf.mxu0 }
 0x17a   : > { %v1116_v48 = vpop.f32.mrf.mxu1 }
 0x17b   : > { %1133 = vst [vmem:[%s1995_s1 + $0x20] sm:$0xff] %v1125_v44  ;;  %v1126_v49 = vadd.f32 %v1115_v45, %v580_v42  ;;  %v1117_v50 = vadd.f32 %v1116_v48, %v1063_v46  ;;  %v1065_v51 = vpop.f32.mrf.mxu0 }
 0x17c   : > { %v1118_v53 = vpop.f32.mrf.mxu1 }
 0x17d   : > { %1134 = vst [vmem:[%s1995_s1 + $0x28] sm:$0xff] %v1126_v49  ;;  %v1127_v54 = vadd.f32 %v1117_v50, %v581_v47  ;;  %v1119_v55 = vadd.f32 %v1118_v53, %v1065_v51  ;;  %1140 = sbr.rel (%p1418_p5) target bundleno = 400 (0x190), region = 101 }
 0x17f   : > { %1135 = vst [vmem:[%s1995_s1 + $0x30] sm:$0xff] %v1127_v54  ;;  %v1128_v56 = vadd.f32 %v1119_v55, %v582_v52 }
 0x181   : > { %1136 = vst [vmem:[%s1995_s1 + $0x38] sm:$0xff] %v1128_v56 }
 0x182   : > { %v1151_v57 = vlaneseq  ;;  %v1149_v59 = vld [vmem:[%s559_s29] sm:$0x3]  ;;  %v1142_v62 = vld [vmem:[%s1995_s1 + $0x8] sm:$0xff]  ;;  %v1143_v0 = vld [vmem:[%s1995_s1 + $0x10] sm:$0xff] }
 0x183   : > { %v1141_v60 = vld [vmem:[%s1995_s1] sm:$0xff]  ;;  %v1144_v1 = vld [vmem:[%s1995_s1 + $0x18] sm:$0xff] }
 0x184   : > { %v1152_v58 = vshrl.u32 %v1151_v57, 7  ;;  %v1145_v2 = vld [vmem:[%s1995_s1 + $0x20] sm:$0xff]  ;;  %v1146_v5 = vld [vmem:[%s1995_s1 + $0x28] sm:$0xff] }
 0x186   : > { %v1153_v61 = vsub.s32 0, %v1152_v58  ;;  %v1157_v63 = vsub.s32 1, %v1152_v58  ;;  %v1147_v6 = vld [vmem:[%s1995_s1 + $0x30] sm:$0xff] }
 0x188   : > { %v1154_v3 = vrot.slane %v1149_v59, %v1153_v61  ;;  %v1158_v4 = vrot.slane %v1149_v59, %v1157_v63  ;;  %v1148_v7 = vld [vmem:[%s1995_s1 + $0x38] sm:$0xff] }
 0x18a   : > { %v1161_v8 = vadd.f32 %v1154_v3, %v1141_v60  ;;  %v1162_v9 = vadd.f32 %v1158_v4, %v1142_v62  ;;  %v1163_v10 = vadd.f32 %v1154_v3, %v1143_v0  ;;  %v1164_v11 = vadd.f32 %v1158_v4, %v1144_v1 }
 0x18b   : > { %v1165_v12 = vadd.f32 %v1154_v3, %v1145_v2  ;;  %v1166_v13 = vadd.f32 %v1158_v4, %v1146_v5  ;;  %v1167_v14 = vadd.f32 %v1154_v3, %v1147_v6  ;;  %v1168_v15 = vadd.f32 %v1158_v4, %v1148_v7 }
 0x18c   : > { %1169 = vst [vmem:[%s1995_s1] sm:$0xff] %v1161_v8  ;;  %1170 = vst [vmem:[%s1995_s1 + $0x8] sm:$0xff] %v1162_v9 }
 0x18d   : > { %1171 = vst [vmem:[%s1995_s1 + $0x10] sm:$0xff] %v1163_v10  ;;  %1172 = vst [vmem:[%s1995_s1 + $0x18] sm:$0xff] %v1164_v11 }
 0x18e   : > { %1173 = vst [vmem:[%s1995_s1 + $0x20] sm:$0xff] %v1165_v12  ;;  %1174 = vst [vmem:[%s1995_s1 + $0x28] sm:$0xff] %v1166_v13 }
 0x18f   : > { %1175 = vst [vmem:[%s1995_s1 + $0x30] sm:$0xff] %v1167_v14  ;;  %1176 = vst [vmem:[%s1995_s1 + $0x38] sm:$0xff] %v1168_v15 }
 0x190 PF: > { %1183 = sbr.rel (!%p1827_p12) target bundleno = 408 (0x198), region = 105  ;;  %s1426_s16 = sshll.u32 (%p1827_p12), %s1698_s19, 4 }
 0x191   : > { %s1189_s5 = scalar_lea.vmem (%p1827_p12), %s2166_s3, %s1426_s16 }
 0x193   : > { %v1202_v16 = vld [vmem:[%s1995_s1] sm:$0xff] (%p1827_p12)  ;;  %v1204_v17 = vld [vmem:[%s1995_s1 + $0x8] sm:$0xff] (%p1827_p12) }
 0x194   : > { %v1206_v18 = vld [vmem:[%s1995_s1 + $0x10] sm:$0xff] (%p1827_p12)  ;;  %v1208_v19 = vld [vmem:[%s1995_s1 + $0x18] sm:$0xff] (%p1827_p12)  ;;  %1203 = vst [vmem:[%s1189_s5] sm:$0xff] (%p1827_p12), %v1202_v16  ;;  %1205 = vst [vmem:[%s1189_s5 + $0x8] sm:$0xff] (%p1827_p12), %v1204_v17 }
 0x195   : > { %v1210_v20 = vld [vmem:[%s1995_s1 + $0x20] sm:$0xff]  ;;  %v1212_v21 = vld [vmem:[%s1995_s1 + $0x28] sm:$0xff]  ;;  %1207 = vst [vmem:[%s1189_s5 + $0x20] sm:$0xff] %v1206_v18  ;;  %1209 = vst [vmem:[%s1189_s5 + $0x28] sm:$0xff] %v1208_v19 }
 0x196   : > { %1211 = vst [vmem:[%s1189_s5 + $0x40] sm:$0xff] %v1210_v20  ;;  %1213 = vst [vmem:[%s1189_s5 + $0x48] sm:$0xff] %v1212_v21  ;;  %v1214_v22 = vld [vmem:[%s1995_s1 + $0x30] sm:$0xff]  ;;  %v1216_v23 = vld [vmem:[%s1995_s1 + $0x38] sm:$0xff] }
 0x197   : > { %1215 = vst [vmem:[%s1189_s5 + $0x60] sm:$0xff] %v1214_v22  ;;  %1217 = vst [vmem:[%s1189_s5 + $0x68] sm:$0xff] %v1216_v23 }
 0x198 PF: > { %s13_s22 = sadd.s32 1, %s1710_s22   ;;  %s2176_s10 = sld [smem:[#allocation5_spill]] }
 0x199   : > { %p10_p6 = scmp.ge.s32.totalorder %s13_s22, 6   ;;  %s2177_s12 = smov %s1674_s13 }
 0x19a   : > { %s2178_s13 = smov %s1825_s9  ;;  %s2179_s14 = smov %s1682_s15 }
 0x19b   : > { %s2180_s15 = smov %s1822_s8  ;;  %s2181_s16 = smov %s1690_s17 }
 0x19c   : > { %s2182_s17 = smov %s1808_s30  ;;  %s2183_s18 = smov %s1702_s20 }
 0x19d   : > { %s2184_s19 = smov %s1706_s21  ;;  %s2185_s20 = smov %s2188_s24 }
 0x19e   : > { %s2186_s21 = smov %s2176_s10  ;;  %12 = sbr.rel (!%p10_p6) target bundleno = 9 (0x9), region = 170 }

// kernel: tile.18
= control target key start
LH: loop header
LB: loop body
LE: loop exit
PB: predicated region body
PF: predicated region fallthrough
CT: control target
= control target key end

     0   :  { %s22_s0 = inlined_call_operand.vmem [shape: f32[64], index: 0, kind: input, shape index: {}]   ;;  %s23_s1 = inlined_call_operand.vmem [shape: f32[4,64], index: 1, kind: output, shape index: {}]  }
   0x1   :  { %v4_v0 = vld [vmem:[%s22_s0] ss:$0 sm:$0xff] }
   0x2   :  { %5 = vst [vmem:[%s23_s1] sm:$0xf] %v4_v0 }

// kernel: generator_forward.35
= control target key start
LH: loop header
LB: loop body
LE: loop exit
PB: predicated region body
PF: predicated region fallthrough
CT: control target
= control target key end

     0   :  { %s1747_s1 = inlined_call_operand.vmem [shape: bf16[512,256], index: 1, kind: input, shape index: {}]   ;;  %s1748_s0 = inlined_call_operand.vmem [shape: bf16[128,512], index: 0, kind: input, shape index: {}]   ;;  %s1749_s2 = inlined_call_operand.vmem [shape: f32[1,256], index: 2, kind: input, shape index: {}]   ;;  %s1750_s3 = inlined_call_operand.vmem [shape: f32[128,256], index: 3, kind: output, shape index: {}]  }
   0x1   :  { %v1160_v0 = vld [vmem:[%s1747_s1 + $0x74] ss:$8 sps:$4 sm:$0xff]   ;;  %v1164_v2 = vld [vmem:[%s1747_s1 + $0x70] ss:$8 sps:$4 sm:$0xff]   ;;  %v1166_v4 = vld [vmem:[%s1747_s1 + $0x64] ss:$8 sps:$4 sm:$0xff]  }
   0x2   :  { %v1162_v1 = vld [vmem:[%s1747_s1 + $0x174] ss:$8 sps:$4 sm:$0xff]   ;;  %658 = vmatprep.subr.bf16.mxu0 %v1160_v0  ;;  %v1165_v3 = vld [vmem:[%s1747_s1 + $0x170] ss:$8 sps:$4 sm:$0xff]   ;;  %v1168_v5 = vld [vmem:[%s1747_s1 + $0x164] ss:$8 sps:$4 sm:$0xff]  }
   0x3   :  { %771 = vmatprep.subr.bf16.mxu1 %v1162_v1  ;;  %659 = vmatpush1.bf16.msra.mxu0 %v1164_v2  ;;  %v1170_v6 = vld [vmem:[%s1747_s1 + $0x60] ss:$8 sps:$4 sm:$0xff]   ;;  %v1172_v8 = vld [vmem:[%s1747_s1 + $0x54] ss:$8 sps:$4 sm:$0xff]   ;;  %v1176_v10 = vld [vmem:[%s1747_s1 + $0x50] ss:$8 sps:$4 sm:$0xff]  }
   0x4   :  { %772 = vmatpush1.bf16.msra.mxu1 %v1165_v3  ;;  %660 = vmatprep.subr.bf16.mxu0 %v1166_v4  ;;  %v1171_v7 = vld [vmem:[%s1747_s1 + $0x160] ss:$8 sps:$4 sm:$0xff]   ;;  %v1174_v9 = vld [vmem:[%s1747_s1 + $0x154] ss:$8 sps:$4 sm:$0xff]   ;;  %v1177_v11 = vld [vmem:[%s1747_s1 + $0x150] ss:$8 sps:$4 sm:$0xff]  }
   0x5   :  { %773 = vmatprep.subr.bf16.mxu1 %v1168_v5  ;;  %v1178_v12 = vld [vmem:[%s1747_s1 + $0x44] ss:$8 sps:$4 sm:$0xff]   ;;  %v1182_v14 = vld [vmem:[%s1747_s1 + $0x40] ss:$8 sps:$4 sm:$0xff]   ;;  %v1184_v16 = vld [vmem:[%s1747_s1 + $0x34] ss:$8 sps:$4 sm:$0xff]  }
   0x6   :  { %v1180_v13 = vld [vmem:[%s1747_s1 + $0x144] ss:$8 sps:$4 sm:$0xff]   ;;  %v1183_v15 = vld [vmem:[%s1747_s1 + $0x140] ss:$8 sps:$4 sm:$0xff]   ;;  %v1186_v17 = vld [vmem:[%s1747_s1 + $0x134] ss:$8 sps:$4 sm:$0xff]  }
   0x7   :  { %661 = vmatpush1.bf16.msra.mxu0 %v1170_v6  ;;  %v1188_v18 = vld [vmem:[%s1747_s1 + $0x30] ss:$8 sps:$4 sm:$0xff]   ;;  %v1190_v20 = vld [vmem:[%s1747_s1 + $0x24] ss:$8 sps:$4 sm:$0xff]   ;;  %v1194_v22 = vld [vmem:[%s1747_s1 + $0x20] ss:$8 sps:$4 sm:$0xff]  }
   0x8   :  { %774 = vmatpush1.bf16.msra.mxu1 %v1171_v7  ;;  %662 = vmatprep.subr.bf16.mxu0 %v1172_v8  ;;  %v1189_v19 = vld [vmem:[%s1747_s1 + $0x130] ss:$8 sps:$4 sm:$0xff]   ;;  %v1192_v21 = vld [vmem:[%s1747_s1 + $0x124] ss:$8 sps:$4 sm:$0xff]   ;;  %v1195_v23 = vld [vmem:[%s1747_s1 + $0x120] ss:$8 sps:$4 sm:$0xff]  }
   0x9   :  { %775 = vmatprep.subr.bf16.mxu1 %v1174_v9  ;;  %v1196_v24 = vld [vmem:[%s1747_s1 + $0x14] ss:$8 sps:$4 sm:$0xff]   ;;  %v1200_v26 = vld [vmem:[%s1747_s1 + $0x10] ss:$8 sps:$4 sm:$0xff]   ;;  %v1202_v28 = vld [vmem:[%s1747_s1 + $0x4] ss:$8 sps:$4 sm:$0xff]  }
   0xa   :  { %v1198_v25 = vld [vmem:[%s1747_s1 + $0x114] ss:$8 sps:$4 sm:$0xff]   ;;  %v1201_v27 = vld [vmem:[%s1747_s1 + $0x110] ss:$8 sps:$4 sm:$0xff]   ;;  %v1204_v29 = vld [vmem:[%s1747_s1 + $0x104] ss:$8 sps:$4 sm:$0xff]  }
   0xb   :  { %663 = vmatpush1.bf16.msra.mxu0 %v1176_v10  ;;  %v1206_v30 = vld [vmem:[%s1747_s1] ss:$8 sps:$4 sm:$0xff]   ;;  %v1208_v32 = vld [vmem:[%s1747_s1 + $0xf4] ss:$8 sps:$4 sm:$0xff]   ;;  %v1212_v34 = vld [vmem:[%s1747_s1 + $0xf0] ss:$8 sps:$4 sm:$0xff]  }
   0xc   :  { %776 = vmatpush1.bf16.msra.mxu1 %v1177_v11  ;;  %664 = vmatprep.subr.bf16.mxu0 %v1178_v12  ;;  %v1207_v31 = vld [vmem:[%s1747_s1 + $0x100] ss:$8 sps:$4 sm:$0xff]   ;;  %v1210_v33 = vld [vmem:[%s1747_s1 + $0x1f4] ss:$8 sps:$4 sm:$0xff]   ;;  %v1213_v35 = vld [vmem:[%s1747_s1 + $0x1f0] ss:$8 sps:$4 sm:$0xff]  }
   0xd   :  { %777 = vmatprep.subr.bf16.mxu1 %v1180_v13  ;;  %v1214_v36 = vld [vmem:[%s1747_s1 + $0xe4] ss:$8 sps:$4 sm:$0xff]   ;;  %v1218_v38 = vld [vmem:[%s1747_s1 + $0xe0] ss:$8 sps:$4 sm:$0xff]   ;;  %v1220_v40 = vld [vmem:[%s1747_s1 + $0xd4] ss:$8 sps:$4 sm:$0xff]  }
   0xe   :  { %v1216_v37 = vld [vmem:[%s1747_s1 + $0x1e4] ss:$8 sps:$4 sm:$0xff]   ;;  %v1219_v39 = vld [vmem:[%s1747_s1 + $0x1e0] ss:$8 sps:$4 sm:$0xff]   ;;  %v1222_v41 = vld [vmem:[%s1747_s1 + $0x1d4] ss:$8 sps:$4 sm:$0xff]  }
   0xf   :  { %665 = vmatpush1.bf16.msra.mxu0 %v1182_v14  ;;  %v1224_v42 = vld [vmem:[%s1747_s1 + $0xd0] ss:$8 sps:$4 sm:$0xff]   ;;  %v1226_v44 = vld [vmem:[%s1747_s1 + $0xc4] ss:$8 sps:$4 sm:$0xff]   ;;  %v1230_v46 = vld [vmem:[%s1747_s1 + $0xc0] ss:$8 sps:$4 sm:$0xff]  }
  0x10   :  { %778 = vmatpush1.bf16.msra.mxu1 %v1183_v15  ;;  %666 = vmatprep.subr.bf16.mxu0 %v1184_v16  ;;  %v1225_v43 = vld [vmem:[%s1747_s1 + $0x1d0] ss:$8 sps:$4 sm:$0xff]   ;;  %v1228_v45 = vld [vmem:[%s1747_s1 + $0x1c4] ss:$8 sps:$4 sm:$0xff]   ;;  %v1231_v47 = vld [vmem:[%s1747_s1 + $0x1c0] ss:$8 sps:$4 sm:$0xff]  }
  0x11   :  { %779 = vmatprep.subr.bf16.mxu1 %v1186_v17  ;;  %v1232_v48 = vld [vmem:[%s1747_s1 + $0xb4] ss:$8 sps:$4 sm:$0xff]   ;;  %v1236_v52 = vld [vmem:[%s1747_s1 + $0xb0] ss:$8 sps:$4 sm:$0xff]   ;;  %v1238_v54 = vld [vmem:[%s1747_s1 + $0xa4] ss:$8 sps:$4 sm:$0xff]  }
  0x12   :  { %v1258_v49 = vld [vmem:[%s1748_s0 + $0x4] ss:$16 sps:$4 sm:$0xff]   ;;  %v1261_v51 = vld [vmem:[%s1748_s0 + $0xc] ss:$16 sps:$4 sm:$0xff]   ;;  %v1237_v53 = vld [vmem:[%s1747_s1 + $0x1b0] ss:$8 sps:$4 sm:$0xff]  }
  0x13   :  { %667 = vmatpush1.bf16.msra.mxu0 %v1188_v18  ;;  %v1234_v50 = vld [vmem:[%s1747_s1 + $0x1b4] ss:$8 sps:$4 sm:$0xff]   ;;  %690 = vmatprep.mubr.bf16.mxu0 %v1258_v49  ;;  %v1240_v55 = vld [vmem:[%s1747_s1 + $0x1a4] ss:$8 sps:$4 sm:$0xff]   ;;  %v1242_v56 = vld [vmem:[%s1747_s1 + $0xa0] ss:$8 sps:$4 sm:$0xff]  }
  0x14   :  { %780 = vmatpush1.bf16.msra.mxu1 %v1189_v19  ;;  %668 = vmatprep.subr.bf16.mxu0 %v1190_v20  ;;  %v1243_v57 = vld [vmem:[%s1747_s1 + $0x1a0] ss:$8 sps:$4 sm:$0xff]   ;;  %v1244_v58 = vld [vmem:[%s1747_s1 + $0x94] ss:$8 sps:$4 sm:$0xff]   ;;  %v1248_v60 = vld [vmem:[%s1747_s1 + $0x90] ss:$8 sps:$4 sm:$0xff]  }
  0x15   :  { %781 = vmatprep.subr.bf16.mxu1 %v1192_v21  ;;  %803 = vmatprep.mubr.bf16.mxu1 %v1261_v51  ;;  %v1246_v59 = vld [vmem:[%s1747_s1 + $0x194] ss:$8 sps:$4 sm:$0xff]   ;;  %v1249_v61 = vld [vmem:[%s1747_s1 + $0x190] ss:$8 sps:$4 sm:$0xff]   ;;  %v1250_v62 = vld [vmem:[%s1747_s1 + $0x84] ss:$8 sps:$4 sm:$0xff]  }
  0x16   :  { %v1252_v63 = vld [vmem:[%s1747_s1 + $0x184] ss:$8 sps:$4 sm:$0xff]   ;;  %v1254_v0 = vld [vmem:[%s1747_s1 + $0x80] ss:$8 sps:$4 sm:$0xff]  }
  0x17   :  { %669 = vmatpush1.bf16.msra.mxu0 %v1194_v22  ;;  %v1255_v1 = vld [vmem:[%s1747_s1 + $0x180] ss:$8 sps:$4 sm:$0xff]   ;;  %v1262_v4 = vld [vmem:[%s1748_s0 + $0x24] ss:$16 sps:$4 sm:$0xff]   ;;  %v1264_v5 = vld [vmem:[%s1748_s0 + $0x2c] ss:$16 sps:$4 sm:$0xff]  }
  0x18   :  { %782 = vmatpush1.bf16.msra.mxu1 %v1195_v23  ;;  %670 = vmatprep.subr.bf16.mxu0 %v1196_v24  ;;  %v1256_v2 = vld [vmem:[%s1748_s0] ss:$16 sps:$4 sm:$0xff]   ;;  %v1259_v3 = vld [vmem:[%s1748_s0 + $0x8] ss:$16 sps:$4 sm:$0xff]   ;;  %v1268_v8 = vld [vmem:[%s1748_s0 + $0x44] ss:$16 sps:$4 sm:$0xff]  }
  0x19   :  { %783 = vmatprep.subr.bf16.mxu1 %v1198_v25  ;;  %v1266_v6 = vld [vmem:[%s1748_s0 + $0x20] ss:$16 sps:$4 sm:$0xff]   ;;  %v1267_v7 = vld [vmem:[%s1748_s0 + $0x28] ss:$16 sps:$4 sm:$0xff]   ;;  %v1270_v9 = vld [vmem:[%s1748_s0 + $0x4c] ss:$16 sps:$4 sm:$0xff]  }
  0x1a   :  { %v1272_v10 = vld [vmem:[%s1748_s0 + $0x40] ss:$16 sps:$4 sm:$0xff]   ;;  %v1273_v11 = vld [vmem:[%s1748_s0 + $0x48] ss:$16 sps:$4 sm:$0xff]   ;;  %v1274_v12 = vld [vmem:[%s1748_s0 + $0x64] ss:$16 sps:$4 sm:$0xff]  }
  0x1b   :  { %671 = vmatpush1.bf16.msra.mxu0 %v1200_v26  ;;  %v1276_v13 = vld [vmem:[%s1748_s0 + $0x6c] ss:$16 sps:$4 sm:$0xff]   ;;  %v1278_v14 = vld [vmem:[%s1748_s0 + $0x60] ss:$16 sps:$4 sm:$0xff]   ;;  %v1279_v15 = vld [vmem:[%s1748_s0 + $0x68] ss:$16 sps:$4 sm:$0xff]  }
  0x1c   :  { %784 = vmatpush1.bf16.msra.mxu1 %v1201_v27  ;;  %672 = vmatprep.subr.bf16.mxu0 %v1202_v28  ;;  %v1280_v16 = vld [vmem:[%s1748_s0 + $0x84] ss:$16 sps:$4 sm:$0xff]   ;;  %v1282_v17 = vld [vmem:[%s1748_s0 + $0x8c] ss:$16 sps:$4 sm:$0xff]   ;;  %v1284_v18 = vld [vmem:[%s1748_s0 + $0x80] ss:$16 sps:$4 sm:$0xff]  }
  0x1d   :  { %785 = vmatprep.subr.bf16.mxu1 %v1204_v29  ;;  %v1285_v19 = vld [vmem:[%s1748_s0 + $0x88] ss:$16 sps:$4 sm:$0xff]   ;;  %v1286_v20 = vld [vmem:[%s1748_s0 + $0xa4] ss:$16 sps:$4 sm:$0xff]   ;;  %v1288_v21 = vld [vmem:[%s1748_s0 + $0xac] ss:$16 sps:$4 sm:$0xff]  }
  0x1e   :  { %v1290_v22 = vld [vmem:[%s1748_s0 + $0xa0] ss:$16 sps:$4 sm:$0xff]   ;;  %v1291_v23 = vld [vmem:[%s1748_s0 + $0xa8] ss:$16 sps:$4 sm:$0xff]   ;;  %v1292_v24 = vld [vmem:[%s1748_s0 + $0xc4] ss:$16 sps:$4 sm:$0xff]  }
  0x1f   :  { %673 = vmatpush1.bf16.msra.mxu0 %v1206_v30  ;;  %v1294_v25 = vld [vmem:[%s1748_s0 + $0xcc] ss:$16 sps:$4 sm:$0xff]   ;;  %v1296_v26 = vld [vmem:[%s1748_s0 + $0xc0] ss:$16 sps:$4 sm:$0xff]   ;;  %v1297_v27 = vld [vmem:[%s1748_s0 + $0xc8] ss:$16 sps:$4 sm:$0xff]  }
  0x20   :  { %786 = vmatpush1.bf16.msra.mxu1 %v1207_v31  ;;  %674 = vmatprep.subr.bf16.mxu0 %v1208_v32  ;;  %v1298_v28 = vld [vmem:[%s1748_s0 + $0xe4] ss:$16 sps:$4 sm:$0xff]   ;;  %v1300_v29 = vld [vmem:[%s1748_s0 + $0xec] ss:$16 sps:$4 sm:$0xff]   ;;  %v1302_v30 = vld [vmem:[%s1748_s0 + $0xe0] ss:$16 sps:$4 sm:$0xff]   ;;  %v985_v32 = vlaneseq }
  0x21   :  { %787 = vmatprep.subr.bf16.mxu1 %v1210_v33  ;;  %v1303_v31 = vld [vmem:[%s1748_s0 + $0xe8] ss:$16 sps:$4 sm:$0xff]  }
  0x22   :  { %v986_v33 = vshrl.u32 %v985_v32, 7 }
  0x23   :  { %675 = vmatpush2.bf16.msra.mxu0 %v1212_v34 }
  0x24   :  { %788 = vmatpush2.bf16.msra.mxu1 %v1213_v35  ;;  %676 = vmatprep.subr.bf16.mxu0 %v1214_v36  ;;  %v987_v34 = vsub.s32 0, %v986_v33  ;;  %v983_v35 = vld [vmem:[%s1749_s2] sm:$0x3]  ;;  %v991_v36 = vsub.s32 1, %v986_v33 }
  0x25   :  { %789 = vmatprep.subr.bf16.mxu1 %v1216_v37 }
  0x27   :  { %677 = vmatpush2.bf16.msra.mxu0 %v1218_v38 }
  0x28   :  { %790 = vmatpush2.bf16.msra.mxu1 %v1219_v39  ;;  %678 = vmatprep.subr.bf16.mxu0 %v1220_v40  ;;  %v1615_v40 = vrot.slane %v983_v35, %v987_v34 }
  0x29   :  { %791 = vmatprep.subr.bf16.mxu1 %v1222_v41 }
  0x2b   :  { %679 = vmatpush2.bf16.msra.mxu0 %v1224_v42 }
  0x2c   :  { %792 = vmatpush2.bf16.msra.mxu1 %v1225_v43  ;;  %680 = vmatprep.subr.bf16.mxu0 %v1226_v44  ;;  %v1617_v44 = vrot.slane %v983_v35, %v991_v36 }
  0x2d   :  { %793 = vmatprep.subr.bf16.mxu1 %v1228_v45 }
  0x2f   :  { %681 = vmatpush2.bf16.msra.mxu0 %v1230_v46 }
  0x30   :  { %794 = vmatpush2.bf16.msra.mxu1 %v1231_v47  ;;  %682 = vmatprep.subr.bf16.mxu0 %v1232_v48 }
  0x31   :  { %795 = vmatprep.subr.bf16.mxu1 %v1234_v50 }
  0x33   :  { %683 = vmatpush2.bf16.msra.mxu0 %v1236_v52 }
  0x34   :  { %796 = vmatpush2.bf16.msra.mxu1 %v1237_v53  ;;  %684 = vmatprep.subr.bf16.mxu0 %v1238_v54 }
  0x35   :  { %797 = vmatprep.subr.bf16.mxu1 %v1240_v55 }
  0x37   :  { %685 = vmatpush2.bf16.msra.mxu0 %v1242_v56 }
  0x38   :  { %798 = vmatpush2.bf16.msra.mxu1 %v1243_v57  ;;  %686 = vmatprep.subr.bf16.mxu0 %v1244_v58 }
  0x39   :  { %799 = vmatprep.subr.bf16.mxu1 %v1246_v59 }
  0x3b   :  { %687 = vmatpush2.bf16.msra.mxu0 %v1248_v60 }
  0x3c   :  { %800 = vmatpush2.bf16.msra.mxu1 %v1249_v61  ;;  %688 = vmatprep.subr.bf16.mxu0 %v1250_v62 }
  0x3d   :  { %801 = vmatprep.subr.bf16.mxu1 %v1252_v63 }
  0x3f   :  { %689 = vmatpush2.bf16.msra.mxu0 %v1254_v0 }
  0x40   :  { %802 = vmatpush2.bf16.msra.mxu1 %v1255_v1 }
  0x42   :  { %691 = vmatmul.mubr.bf16.vlgmr.msra.gmra.mxu0 %v1256_v2 }
  0x43   :  { %804 = vmatmul.mubr.bf16.vlgmr.msra.gmra.mxu1 %v1259_v3  ;;  %700 = vmatprep.mubr.bf16.mxu0 %v1262_v4 }
  0x44   :  { %813 = vmatprep.mubr.bf16.mxu1 %v1264_v5 }
  0x4a   :  { %701 = vmatmul.mubr.bf16.gmra.mxu0 %v1266_v6 }
  0x4b   :  { %814 = vmatmul.mubr.bf16.gmra.mxu1 %v1267_v7  ;;  %710 = vmatprep.mubr.bf16.mxu0 %v1268_v8 }
  0x4c   :  { %823 = vmatprep.mubr.bf16.mxu1 %v1270_v9 }
  0x52   :  { %711 = vmatmul.mubr.bf16.gmra.mxu0 %v1272_v10 }
  0x53   :  { %824 = vmatmul.mubr.bf16.gmra.mxu1 %v1273_v11  ;;  %720 = vmatprep.mubr.bf16.mxu0 %v1274_v12 }
  0x54   :  { %833 = vmatprep.mubr.bf16.mxu1 %v1276_v13 }
  0x5a   :  { %721 = vmatmul.mubr.bf16.gmra.mxu0 %v1278_v14 }
  0x5b   :  { %834 = vmatmul.mubr.bf16.gmra.mxu1 %v1279_v15  ;;  %730 = vmatprep.mubr.bf16.mxu0 %v1280_v16 }
  0x5c   :  { %843 = vmatprep.mubr.bf16.mxu1 %v1282_v17 }
  0x62   :  { %731 = vmatmul.mubr.bf16.gmra.mxu0 %v1284_v18 }
  0x63   :  { %844 = vmatmul.mubr.bf16.gmra.mxu1 %v1285_v19  ;;  %740 = vmatprep.mubr.bf16.mxu0 %v1286_v20 }
  0x64   :  { %853 = vmatprep.mubr.bf16.mxu1 %v1288_v21 }
  0x6a   :  { %741 = vmatmul.mubr.bf16.gmra.mxu0 %v1290_v22 }
  0x6b   :  { %854 = vmatmul.mubr.bf16.gmra.mxu1 %v1291_v23  ;;  %750 = vmatprep.mubr.bf16.mxu0 %v1292_v24 }
  0x6c   :  { %863 = vmatprep.mubr.bf16.mxu1 %v1294_v25 }
  0x72   :  { %751 = vmatmul.mubr.bf16.gmra.mxu0 %v1296_v26 }
  0x73   :  { %864 = vmatmul.mubr.bf16.gmra.mxu1 %v1297_v27  ;;  %760 = vmatprep.mubr.bf16.mxu0 %v1298_v28 }
  0x74   :  { %873 = vmatprep.mubr.bf16.mxu1 %v1300_v29 }
  0x7a   :  { %761 = vmatmul.mubr.bf16.gmra.mxu0 %v1302_v30 }
  0x7b   :  { %874 = vmatmul.mubr.bf16.gmra.mxu1 %v1303_v31 }
 0x102   :  { %v692_v37 = vpop.f32.mrf.mxu0 }
 0x103   :  { %v805_v38 = vpop.f32.mrf.mxu1 }
 0x104   :  { %v806_v39 = vadd.f32 %v805_v38, %v692_v37  ;;  %v694_v41 = vpop.f32.mrf.mxu0 }
 0x105   :  { %v807_v42 = vpop.f32.mrf.mxu1 }
 0x106   :  { %v808_v43 = vadd.f32 %v807_v42, %v694_v41  ;;  %v696_v45 = vpop.f32.mrf.mxu0  ;;  %v995_v47 = vadd.f32 %v1615_v40, %v806_v39 }
 0x107   :  { %v809_v46 = vpop.f32.mrf.mxu1 }
 0x108   :  { %v810_v48 = vadd.f32 %v809_v46, %v696_v45  ;;  %v698_v49 = vpop.f32.mrf.mxu0  ;;  %1027 = vst [vmem:[%s1750_s3] sm:$0xff] %v995_v47  ;;  %v996_v51 = vadd.f32 %v1617_v44, %v808_v43 }
 0x109   :  { %v811_v50 = vpop.f32.mrf.mxu1 }
 0x10a   :  { %v812_v52 = vadd.f32 %v811_v50, %v698_v49  ;;  %v702_v53 = vpop.f32.mrf.mxu0  ;;  %1028 = vst [vmem:[%s1750_s3 + $0x8] sm:$0xff] %v996_v51  ;;  %v997_v55 = vadd.f32 %v1615_v40, %v810_v48 }
 0x10b   :  { %v815_v54 = vpop.f32.mrf.mxu1 }
 0x10c   :  { %v816_v56 = vadd.f32 %v815_v54, %v702_v53  ;;  %v704_v57 = vpop.f32.mrf.mxu0  ;;  %1029 = vst [vmem:[%s1750_s3 + $0x10] sm:$0xff] %v997_v55  ;;  %v998_v59 = vadd.f32 %v1617_v44, %v812_v52 }
 0x10d   :  { %v817_v58 = vpop.f32.mrf.mxu1 }
 0x10e   :  { %v818_v60 = vadd.f32 %v817_v58, %v704_v57  ;;  %v706_v61 = vpop.f32.mrf.mxu0  ;;  %1030 = vst [vmem:[%s1750_s3 + $0x18] sm:$0xff] %v998_v59  ;;  %v999_v63 = vadd.f32 %v1615_v40, %v816_v56 }
 0x10f   :  { %v819_v62 = vpop.f32.mrf.mxu1 }
 0x110   :  { %v820_v0 = vadd.f32 %v819_v62, %v706_v61  ;;  %v708_v1 = vpop.f32.mrf.mxu0  ;;  %1031 = vst [vmem:[%s1750_s3 + $0x20] sm:$0xff] %v999_v63  ;;  %v1000_v3 = vadd.f32 %v1617_v44, %v818_v60 }
 0x111   :  { %v821_v2 = vpop.f32.mrf.mxu1 }
 0x112   :  { %v822_v4 = vadd.f32 %v821_v2, %v708_v1  ;;  %v712_v5 = vpop.f32.mrf.mxu0  ;;  %1032 = vst [vmem:[%s1750_s3 + $0x28] sm:$0xff] %v1000_v3  ;;  %v1001_v7 = vadd.f32 %v1615_v40, %v820_v0 }
 0x113   :  { %v825_v6 = vpop.f32.mrf.mxu1 }
 0x114   :  { %v826_v8 = vadd.f32 %v825_v6, %v712_v5  ;;  %v714_v9 = vpop.f32.mrf.mxu0  ;;  %1033 = vst [vmem:[%s1750_s3 + $0x30] sm:$0xff] %v1001_v7  ;;  %v1002_v11 = vadd.f32 %v1617_v44, %v822_v4 }
 0x115   :  { %v827_v10 = vpop.f32.mrf.mxu1 }
 0x116   :  { %v828_v12 = vadd.f32 %v827_v10, %v714_v9  ;;  %v716_v13 = vpop.f32.mrf.mxu0  ;;  %1034 = vst [vmem:[%s1750_s3 + $0x38] sm:$0xff] %v1002_v11  ;;  %v1003_v15 = vadd.f32 %v1615_v40, %v826_v8 }
 0x117   :  { %v829_v14 = vpop.f32.mrf.mxu1 }
 0x118   :  { %v830_v16 = vadd.f32 %v829_v14, %v716_v13  ;;  %v718_v17 = vpop.f32.mrf.mxu0  ;;  %1035 = vst [vmem:[%s1750_s3 + $0x40] sm:$0xff] %v1003_v15  ;;  %v1004_v19 = vadd.f32 %v1617_v44, %v828_v12 }
 0x119   :  { %v831_v18 = vpop.f32.mrf.mxu1 }
 0x11a   :  { %v832_v20 = vadd.f32 %v831_v18, %v718_v17  ;;  %v722_v21 = vpop.f32.mrf.mxu0  ;;  %1036 = vst [vmem:[%s1750_s3 + $0x48] sm:$0xff] %v1004_v19  ;;  %v1005_v23 = vadd.f32 %v1615_v40, %v830_v16 }
 0x11b   :  { %v835_v22 = vpop.f32.mrf.mxu1 }
 0x11c   :  { %v836_v24 = vadd.f32 %v835_v22, %v722_v21  ;;  %v724_v25 = vpop.f32.mrf.mxu0  ;;  %1037 = vst [vmem:[%s1750_s3 + $0x50] sm:$0xff] %v1005_v23  ;;  %v1006_v27 = vadd.f32 %v1617_v44, %v832_v20 }
 0x11d   :  { %v837_v26 = vpop.f32.mrf.mxu1 }
 0x11e   :  { %v838_v28 = vadd.f32 %v837_v26, %v724_v25  ;;  %v726_v29 = vpop.f32.mrf.mxu0  ;;  %1038 = vst [vmem:[%s1750_s3 + $0x58] sm:$0xff] %v1006_v27  ;;  %v1007_v31 = vadd.f32 %v1615_v40, %v836_v24 }
 0x11f   :  { %v839_v30 = vpop.f32.mrf.mxu1 }
 0x120   :  { %v840_v32 = vadd.f32 %v839_v30, %v726_v29  ;;  %v728_v33 = vpop.f32.mrf.mxu0  ;;  %1039 = vst [vmem:[%s1750_s3 + $0x60] sm:$0xff] %v1007_v31  ;;  %v1008_v35 = vadd.f32 %v1617_v44, %v838_v28 }
 0x121   :  { %v841_v34 = vpop.f32.mrf.mxu1 }
 0x122   :  { %v842_v36 = vadd.f32 %v841_v34, %v728_v33  ;;  %v732_v37 = vpop.f32.mrf.mxu0  ;;  %1040 = vst [vmem:[%s1750_s3 + $0x68] sm:$0xff] %v1008_v35  ;;  %v1009_v39 = vadd.f32 %v1615_v40, %v840_v32 }
 0x123   :  { %v845_v38 = vpop.f32.mrf.mxu1 }
 0x124   :  { %v846_v41 = vadd.f32 %v845_v38, %v732_v37  ;;  %v734_v42 = vpop.f32.mrf.mxu0  ;;  %1041 = vst [vmem:[%s1750_s3 + $0x70] sm:$0xff] %v1009_v39  ;;  %v1010_v45 = vadd.f32 %v1617_v44, %v842_v36 }
 0x125   :  { %v847_v43 = vpop.f32.mrf.mxu1 }
 0x126   :  { %v848_v46 = vadd.f32 %v847_v43, %v734_v42  ;;  %v736_v47 = vpop.f32.mrf.mxu0  ;;  %1042 = vst [vmem:[%s1750_s3 + $0x78] sm:$0xff] %v1010_v45  ;;  %v1011_v49 = vadd.f32 %v1615_v40, %v846_v41 }
 0x127   :  { %v849_v48 = vpop.f32.mrf.mxu1 }
 0x128   :  { %v850_v50 = vadd.f32 %v849_v48, %v736_v47  ;;  %v738_v51 = vpop.f32.mrf.mxu0  ;;  %1043 = vst [vmem:[%s1750_s3 + $0x80] sm:$0xff] %v1011_v49  ;;  %v1012_v53 = vadd.f32 %v1617_v44, %v848_v46 }
 0x129   :  { %v851_v52 = vpop.f32.mrf.mxu1 }
 0x12a   :  { %v852_v54 = vadd.f32 %v851_v52, %v738_v51  ;;  %v742_v55 = vpop.f32.mrf.mxu0  ;;  %1044 = vst [vmem:[%s1750_s3 + $0x88] sm:$0xff] %v1012_v53  ;;  %v1013_v57 = vadd.f32 %v1615_v40, %v850_v50 }
 0x12b   :  { %v855_v56 = vpop.f32.mrf.mxu1 }
 0x12c   :  { %v856_v58 = vadd.f32 %v855_v56, %v742_v55  ;;  %v744_v59 = vpop.f32.mrf.mxu0  ;;  %1045 = vst [vmem:[%s1750_s3 + $0x90] sm:$0xff] %v1013_v57  ;;  %v1014_v61 = vadd.f32 %v1617_v44, %v852_v54 }
 0x12d   :  { %v857_v60 = vpop.f32.mrf.mxu1 }
 0x12e   :  { %v858_v62 = vadd.f32 %v857_v60, %v744_v59  ;;  %v746_v63 = vpop.f32.mrf.mxu0  ;;  %1046 = vst [vmem:[%s1750_s3 + $0x98] sm:$0xff] %v1014_v61  ;;  %v1015_v1 = vadd.f32 %v1615_v40, %v856_v58 }
 0x12f   :  { %v859_v0 = vpop.f32.mrf.mxu1 }
 0x130   :  { %v860_v2 = vadd.f32 %v859_v0, %v746_v63  ;;  %v748_v3 = vpop.f32.mrf.mxu0  ;;  %1047 = vst [vmem:[%s1750_s3 + $0xa0] sm:$0xff] %v1015_v1  ;;  %v1016_v5 = vadd.f32 %v1617_v44, %v858_v62 }
 0x131   :  { %v861_v4 = vpop.f32.mrf.mxu1 }
 0x132   :  { %v862_v6 = vadd.f32 %v861_v4, %v748_v3  ;;  %v752_v7 = vpop.f32.mrf.mxu0  ;;  %1048 = vst [vmem:[%s1750_s3 + $0xa8] sm:$0xff] %v1016_v5  ;;  %v1017_v9 = vadd.f32 %v1615_v40, %v860_v2 }
 0x133   :  { %v865_v8 = vpop.f32.mrf.mxu1 }
 0x134   :  { %v866_v10 = vadd.f32 %v865_v8, %v752_v7  ;;  %v754_v11 = vpop.f32.mrf.mxu0  ;;  %1049 = vst [vmem:[%s1750_s3 + $0xb0] sm:$0xff] %v1017_v9  ;;  %v1018_v13 = vadd.f32 %v1617_v44, %v862_v6 }
 0x135   :  { %v867_v12 = vpop.f32.mrf.mxu1 }
 0x136   :  { %v868_v14 = vadd.f32 %v867_v12, %v754_v11  ;;  %v756_v15 = vpop.f32.mrf.mxu0  ;;  %1050 = vst [vmem:[%s1750_s3 + $0xb8] sm:$0xff] %v1018_v13  ;;  %v1019_v17 = vadd.f32 %v1615_v40, %v866_v10 }
 0x137   :  { %v869_v16 = vpop.f32.mrf.mxu1 }
 0x138   :  { %v870_v18 = vadd.f32 %v869_v16, %v756_v15  ;;  %v758_v19 = vpop.f32.mrf.mxu0  ;;  %1051 = vst [vmem:[%s1750_s3 + $0xc0] sm:$0xff] %v1019_v17  ;;  %v1020_v21 = vadd.f32 %v1617_v44, %v868_v14 }
 0x139   :  { %v871_v20 = vpop.f32.mrf.mxu1 }
 0x13a   :  { %v872_v22 = vadd.f32 %v871_v20, %v758_v19  ;;  %v762_v23 = vpop.f32.mrf.mxu0  ;;  %1052 = vst [vmem:[%s1750_s3 + $0xc8] sm:$0xff] %v1020_v21  ;;  %v1021_v25 = vadd.f32 %v1615_v40, %v870_v18 }
 0x13b   :  { %v875_v24 = vpop.f32.mrf.mxu1 }
 0x13c   :  { %v876_v26 = vadd.f32 %v875_v24, %v762_v23  ;;  %v764_v27 = vpop.f32.mrf.mxu0  ;;  %1053 = vst [vmem:[%s1750_s3 + $0xd0] sm:$0xff] %v1021_v25  ;;  %v1022_v29 = vadd.f32 %v1617_v44, %v872_v22 }
 0x13d   :  { %v877_v28 = vpop.f32.mrf.mxu1 }
 0x13e   :  { %v878_v30 = vadd.f32 %v877_v28, %v764_v27  ;;  %v766_v31 = vpop.f32.mrf.mxu0  ;;  %1054 = vst [vmem:[%s1750_s3 + $0xd8] sm:$0xff] %v1022_v29  ;;  %v1023_v33 = vadd.f32 %v1615_v40, %v876_v26 }
 0x13f   :  { %v879_v32 = vpop.f32.mrf.mxu1 }
 0x140   :  { %v880_v34 = vadd.f32 %v879_v32, %v766_v31  ;;  %v768_v35 = vpop.f32.mrf.mxu0  ;;  %1055 = vst [vmem:[%s1750_s3 + $0xe0] sm:$0xff] %v1023_v33  ;;  %v1024_v37 = vadd.f32 %v1617_v44, %v878_v30 }
 0x141   :  { %v881_v36 = vpop.f32.mrf.mxu1 }
 0x142   :  { %v882_v38 = vadd.f32 %v881_v36, %v768_v35  ;;  %1056 = vst [vmem:[%s1750_s3 + $0xe8] sm:$0xff] %v1024_v37  ;;  %v1025_v39 = vadd.f32 %v1615_v40, %v880_v34 }
 0x144   :  { %1057 = vst [vmem:[%s1750_s3 + $0xf0] sm:$0xff] %v1025_v39  ;;  %v1026_v41 = vadd.f32 %v1617_v44, %v882_v38 }
 0x146   :  { %1058 = vst [vmem:[%s1750_s3 + $0xf8] sm:$0xff] %v1026_v41 }

// kernel: generator_forward.37
= control target key start
LH: loop header
LB: loop body
LE: loop exit
PB: predicated region body
PF: predicated region fallthrough
CT: control target
= control target key end

     0   :  { %s1515_s12 = smov 0   ;;  %s1517_s13 = smov 0   ;;  %s1904_s0 = inlined_call_operand.vmem [shape: bf16[512,3200], index: 0, kind: input, shape index: {}]   ;;  %s1905_s1 = inlined_call_operand.vmem [shape: bf16[3200,128], index: 1, kind: input, shape index: {}]   ;;  %s1906_s2 = inlined_call_operand.vmem [shape: f32[1,128], index: 2, kind: input, shape index: {}]   ;;  %s1907_s3 = inlined_call_operand.vmem [shape: f32[512,128], index: 3, kind: output, shape index: {}]  }
   0x1   :  { %s1519_s14 = smov 0   ;;  %s1521_s15 = smov 0  }
   0x2   :  { %s1523_s16 = smov 0   ;;  %s1525_s17 = smov 0  }
   0x3   :  { %s1527_s18 = smov 0  }
   0x4 LB: > { %s25_s19 = sadd.s32 1, %s1484_s16  ;;  %s32_s20 = sadd.s32 1, %s1488_s17  ;;  %s1492_s18 = sphi %s1527_s18, %s13_s18   ;;  %s1488_s17 = sphi %s1525_s17, %s1913_s17   ;;  %s1484_s16 = sphi %s1523_s16, %s1912_s16   ;;  %s1480_s15 = sphi %s1521_s15, %s1911_s15   ;;  %s1476_s14 = sphi %s1519_s14, %s1910_s14   ;;  %s1472_s13 = sphi %s1517_s13, %s1909_s13   ;;  %s1468_s12 = sphi %s1515_s12, %s1908_s12  }
   0x5   : > { %p26_p0 = scmp.ge.s32.totalorder %s25_s19, 25  ;;  %p48_p1 = scmp.ne.s32.totalorder %s1472_s13, %s1468_s12 }
   0x6   : > { %p49_p2 = scmp.eq.s32.totalorder %s1492_s18, 0  ;;  %s41_s24 = sadd.s32 1, %s1472_s13 }
   0x7   : > { %s1915_s19 = smov (%p26_p0, %s25_s19), 0  ;;  %s1917_s20 = smov (!%p26_p0, %s32_s20), %s1488_s17 }
   0x8   : > { %p50_p3 = por %p49_p2, %p48_p1  ;;  %p34_p4 = scmp.ge.s32.totalorder %s1917_s20, 2 }
   0x9   : > { %s37_s21 = ssub.s32 %s1484_s16, %s1915_s19  ;;  %p1164_p6 = scmp.ge.s32.totalorder %s1492_s18, 50 }
   0xa   : > { %s1919_s20 = smov (%p34_p4, %s1917_s20), 0 }
   0xb   : > { %s36_s22 = ssub.s32 %s1488_s17, %s1919_s20  ;;  %162 = sbr.rel (%p1164_p6) target bundleno = 44 (0x2c), region = 20 }
   0xc   : > { %s38_s23 = sor.u32 %s37_s21, %s36_s22 }
   0xd   : > { %p39_p5 = scmp.eq.s32.totalorder %s38_s23, 0 }
   0xf   : > { %s1566_s25 = scalar_select %p39_p5, %s1472_s13, %s41_s24  }
  0x10   : > { %165 = sbr.rel (!%p50_p3) target bundleno = 44 (0x2c), region = 24  ;;  %s167_s26 = sand.u32 (%p50_p3), 1, %s1472_s13  }
  0x11   : > { %s1292_s27 = smul.u32 (%p50_p3), 800, %s1488_s17  ;;  %s1165_s28 = sshll.u32 (%p50_p3), %s167_s26, 7 }
  0x12   : > { %s1580_s7 = scalar_lea.vmem (%p50_p3), [#allocation2], %s1165_s28 }
  0x13   : > { %s172_s29 = sadd.s32 (%p50_p3), %s1484_s16, %s1292_s27 }
  0x14   : > { %s1168_s30 = sshll.u32 (%p50_p3), %s172_s29, 2 }
  0x15   : > { %s1575_s6 = scalar_lea.vmem %s1904_s0, %s1168_s30 }
  0x16   : > { %v191_v0 = vld [vmem:[%s1575_s6] sm:$0xf]  ;;  %v193_v1 = vld [vmem:[%s1575_s6 + $0x64] sm:$0xf]  ;;  %v195_v2 = vld [vmem:[%s1575_s6 + $0xc8] sm:$0xf] }
  0x17   : > { %192 = vst [vmem:[%s1580_s7] sm:$0xf] %v191_v0  ;;  %194 = vst [vmem:[%s1580_s7 + $0x4] sm:$0xf] %v193_v1  ;;  %v197_v3 = vld [vmem:[%s1575_s6 + $0x12c] sm:$0xf] }
  0x18   : > { %196 = vst [vmem:[%s1580_s7 + $0x8] sm:$0xf] %v195_v2  ;;  %v199_v4 = vld [vmem:[%s1575_s6 + $0x190] sm:$0xf]  ;;  %v201_v5 = vld [vmem:[%s1575_s6 + $0x1f4] sm:$0xf] }
  0x19   : > { %198 = vst [vmem:[%s1580_s7 + $0xc] sm:$0xf] %v197_v3  ;;  %200 = vst [vmem:[%s1580_s7 + $0x10] sm:$0xf] %v199_v4  ;;  %v203_v6 = vld [vmem:[%s1575_s6 + $0x258] sm:$0xf] }
  0x1a   : > { %202 = vst [vmem:[%s1580_s7 + $0x14] sm:$0xf] %v201_v5  ;;  %v205_v7 = vld [vmem:[%s1575_s6 + $0x2bc] sm:$0xf]  ;;  %v207_v8 = vld [vmem:[%s1575_s6 + $0x320] sm:$0xf] }
  0x1b   : > { %204 = vst [vmem:[%s1580_s7 + $0x18] sm:$0xf] %v203_v6  ;;  %206 = vst [vmem:[%s1580_s7 + $0x1c] sm:$0xf] %v205_v7  ;;  %v209_v9 = vld [vmem:[%s1575_s6 + $0x384] sm:$0xf] }
  0x1c   : > { %208 = vst [vmem:[%s1580_s7 + $0x20] sm:$0xf] %v207_v8  ;;  %v211_v10 = vld [vmem:[%s1575_s6 + $0x3e8] sm:$0xf]  ;;  %v213_v11 = vld [vmem:[%s1575_s6 + $0x44c] sm:$0xf] }
  0x1d   : > { %210 = vst [vmem:[%s1580_s7 + $0x24] sm:$0xf] %v209_v9  ;;  %212 = vst [vmem:[%s1580_s7 + $0x28] sm:$0xf] %v211_v10  ;;  %v215_v12 = vld [vmem:[%s1575_s6 + $0x4b0] sm:$0xf] }
  0x1e   : > { %214 = vst [vmem:[%s1580_s7 + $0x2c] sm:$0xf] %v213_v11  ;;  %v217_v13 = vld [vmem:[%s1575_s6 + $0x514] sm:$0xf]  ;;  %v219_v14 = vld [vmem:[%s1575_s6 + $0x578] sm:$0xf] }
  0x1f   : > { %216 = vst [vmem:[%s1580_s7 + $0x30] sm:$0xf] %v215_v12  ;;  %218 = vst [vmem:[%s1580_s7 + $0x34] sm:$0xf] %v217_v13  ;;  %v221_v15 = vld [vmem:[%s1575_s6 + $0x5dc] sm:$0xf] }
  0x20   : > { %220 = vst [vmem:[%s1580_s7 + $0x38] sm:$0xf] %v219_v14  ;;  %v223_v16 = vld [vmem:[%s1575_s6 + $0x640] sm:$0xf]  ;;  %v225_v17 = vld [vmem:[%s1575_s6 + $0x6a4] sm:$0xf] }
  0x21   : > { %222 = vst [vmem:[%s1580_s7 + $0x3c] sm:$0xf] %v221_v15  ;;  %224 = vst [vmem:[%s1580_s7 + $0x40] sm:$0xf] %v223_v16  ;;  %v227_v18 = vld [vmem:[%s1575_s6 + $0x708] sm:$0xf] }
  0x22   : > { %226 = vst [vmem:[%s1580_s7 + $0x44] sm:$0xf] %v225_v17  ;;  %v229_v19 = vld [vmem:[%s1575_s6 + $0x76c] sm:$0xf]  ;;  %v231_v20 = vld [vmem:[%s1575_s6 + $0x7d0] sm:$0xf] }
  0x23   : > { %228 = vst [vmem:[%s1580_s7 + $0x48] sm:$0xf] %v227_v18  ;;  %230 = vst [vmem:[%s1580_s7 + $0x4c] sm:$0xf] %v229_v19  ;;  %v233_v21 = vld [vmem:[%s1575_s6 + $0x834] sm:$0xf] }
  0x24   : > { %232 = vst [vmem:[%s1580_s7 + $0x50] sm:$0xf] %v231_v20  ;;  %v235_v22 = vld [vmem:[%s1575_s6 + $0x898] sm:$0xf]  ;;  %v237_v23 = vld [vmem:[%s1575_s6 + $0x8fc] sm:$0xf] }
  0x25   : > { %234 = vst [vmem:[%s1580_s7 + $0x54] sm:$0xf] %v233_v21  ;;  %236 = vst [vmem:[%s1580_s7 + $0x58] sm:$0xf] %v235_v22  ;;  %v239_v24 = vld [vmem:[%s1575_s6 + $0x960] sm:$0xf] }
  0x26   : > { %238 = vst [vmem:[%s1580_s7 + $0x5c] sm:$0xf] %v237_v23  ;;  %v241_v25 = vld [vmem:[%s1575_s6 + $0x9c4] sm:$0xf]  ;;  %v243_v26 = vld [vmem:[%s1575_s6 + $0xa28] sm:$0xf] }
  0x27   : > { %240 = vst [vmem:[%s1580_s7 + $0x60] sm:$0xf] %v239_v24  ;;  %242 = vst [vmem:[%s1580_s7 + $0x64] sm:$0xf] %v241_v25  ;;  %v245_v27 = vld [vmem:[%s1575_s6 + $0xa8c] sm:$0xf] }
  0x28   : > { %244 = vst [vmem:[%s1580_s7 + $0x68] sm:$0xf] %v243_v26  ;;  %v247_v28 = vld [vmem:[%s1575_s6 + $0xaf0] sm:$0xf]  ;;  %v249_v29 = vld [vmem:[%s1575_s6 + $0xb54] sm:$0xf] }
  0x29   : > { %246 = vst [vmem:[%s1580_s7 + $0x6c] sm:$0xf] %v245_v27  ;;  %248 = vst [vmem:[%s1580_s7 + $0x70] sm:$0xf] %v247_v28  ;;  %v251_v30 = vld [vmem:[%s1575_s6 + $0xbb8] sm:$0xf] }
  0x2a   : > { %250 = vst [vmem:[%s1580_s7 + $0x74] sm:$0xf] %v249_v29  ;;  %v253_v31 = vld [vmem:[%s1575_s6 + $0xc1c] sm:$0xf]  ;;  %252 = vst [vmem:[%s1580_s7 + $0x78] sm:$0xf] %v251_v30 }
  0x2b   : > { %254 = vst [vmem:[%s1580_s7 + $0x7c] sm:$0xf] %v253_v31 }
  0x2c PF: > { %p1169_p7 = scmp.ge.s32.totalorder %s1492_s18, 1  ;;  %p353_p8 = scmp.lt.s32.totalorder %s1492_s18, 51 }
  0x2e   : > { %p354_p9 = pnand %p1169_p7, %p353_p8 }
  0x2f   : > { %s360_s8 = sand.u32 (!%p354_p9), 1, %s1468_s12   ;;  %s1171_s9 = sshll.u32 (!%p354_p9), %s1476_s14, 4 }
  0x30   : > { %357 = sbr.rel (%p354_p9) target bundleno = 387 (0x183), region = 69  ;;  %s1170_s10 = sshll.u32 (!%p354_p9), %s360_s8, 7 }
  0x31   : > { %p399_p10 = scmp.lt.s32.totalorder (!%p354_p9), %s1171_s9, 399  ;;  %s1173_s11 = sshll.u32 (!%p354_p9), %s1480_s15, 5 }
  0x32   : > { %p411_p11 = scmp.lt.s32.totalorder (!%p354_p9), %s1173_s11, 63  ;;  %s1658_s12 = scalar_lea.vmem (!%p354_p9), [#allocation2], %s1170_s10 }
  0x33   : > { %p1175_p12 = scmp.ne.s32.totalorder (!%p354_p9), %s1476_s14, 0 }
  0x35   : > { %s1921_s9 = smov (!%p399_p10, %s1171_s9), 399  ;;  %s1923_s11 = smov (!%p411_p11, %s1173_s11), 63 }
  0x36   : > { %s1172_s21 = sshll.u32 %s1921_s9, 2  ;;  %s1174_s26 = sshll.u32 %s1923_s11, 3 }
  0x37   : > { %s1651_s24 = scalar_lea.vmem %s1905_s1, %s1172_s21  ;;  %s1656_s29 = scalar_lea.vmem %s1907_s3, %s1174_s26 }
  0x38   : > { %423 = sbr.rel (%p1175_p12) target bundleno = 78 (0x4e), region = 77 }
  0x3d   : > { %v1494_v32 = vmov 0.0  }
  0x3e   : > { %424 = vst [vmem:[%s1656_s29] sm:$0xff] %v1494_v32  ;;  %425 = vst [vmem:[%s1656_s29 + $0x8] sm:$0xff] %v1494_v32 }
  0x3f   : > { %426 = vst [vmem:[%s1656_s29 + $0x10] sm:$0xff] %v1494_v32  ;;  %427 = vst [vmem:[%s1656_s29 + $0x18] sm:$0xff] %v1494_v32 }
  0x40   : > { %428 = vst [vmem:[%s1656_s29 + $0x20] sm:$0xff] %v1494_v32  ;;  %429 = vst [vmem:[%s1656_s29 + $0x28] sm:$0xff] %v1494_v32 }
  0x41   : > { %430 = vst [vmem:[%s1656_s29 + $0x30] sm:$0xff] %v1494_v32  ;;  %431 = vst [vmem:[%s1656_s29 + $0x38] sm:$0xff] %v1494_v32 }
  0x42   : > { %432 = vst [vmem:[%s1656_s29 + $0x40] sm:$0xff] %v1494_v32  ;;  %433 = vst [vmem:[%s1656_s29 + $0x48] sm:$0xff] %v1494_v32 }
  0x43   : > { %434 = vst [vmem:[%s1656_s29 + $0x50] sm:$0xff] %v1494_v32  ;;  %435 = vst [vmem:[%s1656_s29 + $0x58] sm:$0xff] %v1494_v32 }
  0x44   : > { %436 = vst [vmem:[%s1656_s29 + $0x60] sm:$0xff] %v1494_v32  ;;  %437 = vst [vmem:[%s1656_s29 + $0x68] sm:$0xff] %v1494_v32 }
  0x45   : > { %438 = vst [vmem:[%s1656_s29 + $0x70] sm:$0xff] %v1494_v32  ;;  %439 = vst [vmem:[%s1656_s29 + $0x78] sm:$0xff] %v1494_v32 }
  0x46   : > { %440 = vst [vmem:[%s1656_s29 + $0x80] sm:$0xff] %v1494_v32  ;;  %441 = vst [vmem:[%s1656_s29 + $0x88] sm:$0xff] %v1494_v32 }
  0x47   : > { %442 = vst [vmem:[%s1656_s29 + $0x90] sm:$0xff] %v1494_v32  ;;  %443 = vst [vmem:[%s1656_s29 + $0x98] sm:$0xff] %v1494_v32 }
  0x48   : > { %444 = vst [vmem:[%s1656_s29 + $0xa0] sm:$0xff] %v1494_v32  ;;  %445 = vst [vmem:[%s1656_s29 + $0xa8] sm:$0xff] %v1494_v32 }
  0x49   : > { %446 = vst [vmem:[%s1656_s29 + $0xb0] sm:$0xff] %v1494_v32  ;;  %447 = vst [vmem:[%s1656_s29 + $0xb8] sm:$0xff] %v1494_v32 }
  0x4a   : > { %448 = vst [vmem:[%s1656_s29 + $0xc0] sm:$0xff] %v1494_v32  ;;  %449 = vst [vmem:[%s1656_s29 + $0xc8] sm:$0xff] %v1494_v32 }
  0x4b   : > { %450 = vst [vmem:[%s1656_s29 + $0xd0] sm:$0xff] %v1494_v32  ;;  %451 = vst [vmem:[%s1656_s29 + $0xd8] sm:$0xff] %v1494_v32 }
  0x4c   : > { %452 = vst [vmem:[%s1656_s29 + $0xe0] sm:$0xff] %v1494_v32  ;;  %453 = vst [vmem:[%s1656_s29 + $0xe8] sm:$0xff] %v1494_v32 }
  0x4d   : > { %454 = vst [vmem:[%s1656_s29 + $0xf0] sm:$0xff] %v1494_v32  ;;  %455 = vst [vmem:[%s1656_s29 + $0xf8] sm:$0xff] %v1494_v32 }
  0x4e PF: > { %v1350_v33 = vld [vmem:[%s1651_s24 + $0x38] sm:$0xff]   ;;  %v1351_v34 = vld [vmem:[%s1651_s24 + $0x30] sm:$0xff]   ;;  %v1352_v35 = vld [vmem:[%s1651_s24 + $0x28] sm:$0xff]   ;;  %p1200_p13 = scmp.ne.s32.totalorder %s1476_s14, 24 }
  0x4f   : > { %1228 = vmatprep.subr.bf16.mxu0 %v1350_v33  ;;  %1276 = vmatprep.subr.bf16.mxu1 %v1350_v33  ;;  %v1353_v36 = vld [vmem:[%s1651_s24 + $0x20] sm:$0xff]   ;;  %v1354_v39 = vld [vmem:[%s1651_s24 + $0x18] sm:$0xff]   ;;  %v1355_v40 = vld [vmem:[%s1651_s24 + $0x10] sm:$0xff]  }
  0x50   : > { %1229 = vmatpush3.bf16.msra.mxu0 %v1350_v33  ;;  %1284 = vmatpush3.bf16.msra.mxu1 %v1350_v33  ;;  %v1358_v37 = vld [vmem:[%s1658_s12] sm:$0xff]   ;;  %v1356_v41 = vld [vmem:[%s1651_s24 + $0x8] sm:$0xff]   ;;  %v1362_v45 = vld [vmem:[%s1658_s12 + $0x10] sm:$0xff]  }
  0x51   : > { %1230 = vmatprep.subr.bf16.mxu0 %v1351_v34  ;;  %1277 = vmatprep.subr.bf16.mxu1 %v1351_v34  ;;  %v1359_v38 = vld [vmem:[%s1658_s12 + $0x40] sm:$0xff]   ;;  %v1360_v43 = vld [vmem:[%s1658_s12 + $0x8] sm:$0xff]   ;;  %v1363_v46 = vld [vmem:[%s1658_s12 + $0x50] sm:$0xff]  }
  0x52   : > { %1244 = vmatprep.mubr.bf16.mxu0 %v1358_v37  ;;  %1260 = vmatprep.mubr.bf16.mxu1 %v1359_v38  ;;  %v1357_v42 = vld [vmem:[%s1651_s24] sm:$0xff]   ;;  %v1361_v44 = vld [vmem:[%s1658_s12 + $0x48] sm:$0xff]   ;;  %v1364_v47 = vld [vmem:[%s1658_s12 + $0x18] sm:$0xff]  }
  0x53   : > { %v1365_v48 = vld [vmem:[%s1658_s12 + $0x58] sm:$0xff]   ;;  %v1366_v49 = vld [vmem:[%s1658_s12 + $0x20] sm:$0xff]   ;;  %v1368_v51 = vld [vmem:[%s1658_s12 + $0x28] sm:$0xff]  }
  0x54   : > { %1231 = vmatpush3.bf16.msra.mxu0 %v1351_v34  ;;  %1285 = vmatpush3.bf16.msra.mxu1 %v1351_v34  ;;  %v1367_v50 = vld [vmem:[%s1658_s12 + $0x60] sm:$0xff]   ;;  %v1369_v52 = vld [vmem:[%s1658_s12 + $0x68] sm:$0xff]   ;;  %v1370_v53 = vld [vmem:[%s1658_s12 + $0x30] sm:$0xff]  }
  0x55   : > { %1232 = vmatprep.subr.bf16.mxu0 %v1352_v35  ;;  %1278 = vmatprep.subr.bf16.mxu1 %v1352_v35  ;;  %v1371_v54 = vld [vmem:[%s1658_s12 + $0x70] sm:$0xff]   ;;  %v1372_v55 = vld [vmem:[%s1658_s12 + $0x38] sm:$0xff]   ;;  %v456_v61 = vld [vmem:[%s1656_s29] sm:$0xff] }
  0x56   : > { %v1373_v56 = vld [vmem:[%s1658_s12 + $0x78] sm:$0xff]   ;;  %v458_v57 = vld [vmem:[%s1656_s29 + $0x10] sm:$0xff]  ;;  %v472_v62 = vld [vmem:[%s1656_s29 + $0x80] sm:$0xff] }
  0x57   : > { %v474_v58 = vld [vmem:[%s1656_s29 + $0x90] sm:$0xff]  ;;  %v459_v3 = vld [vmem:[%s1656_s29 + $0x18] sm:$0xff]  ;;  %v457_v9 = vld [vmem:[%s1656_s29 + $0x8] sm:$0xff] }
  0x58   : > { %1233 = vmatpush3.bf16.msra.mxu0 %v1352_v35  ;;  %1286 = vmatpush3.bf16.msra.mxu1 %v1352_v35  ;;  %v475_v4 = vld [vmem:[%s1656_s29 + $0x98] sm:$0xff]  ;;  %v473_v10 = vld [vmem:[%s1656_s29 + $0x88] sm:$0xff]  ;;  %v462_v15 = vld [vmem:[%s1656_s29 + $0x30] sm:$0xff] }
  0x59   : > { %1234 = vmatprep.subr.bf16.mxu0 %v1353_v36  ;;  %1279 = vmatprep.subr.bf16.mxu1 %v1353_v36  ;;  %v478_v16 = vld [vmem:[%s1656_s29 + $0xb0] sm:$0xff]  ;;  %v460_v21 = vld [vmem:[%s1656_s29 + $0x20] sm:$0xff]  ;;  %v463_v27 = vld [vmem:[%s1656_s29 + $0x38] sm:$0xff] }
  0x5a   : > { %v476_v22 = vld [vmem:[%s1656_s29 + $0xa0] sm:$0xff]  ;;  %v479_v28 = vld [vmem:[%s1656_s29 + $0xb8] sm:$0xff]  ;;  %v461_v33 = vld [vmem:[%s1656_s29 + $0x28] sm:$0xff] }
  0x5b   : > { %v477_v34 = vld [vmem:[%s1656_s29 + $0xa8] sm:$0xff] }
  0x5c   : > { %1235 = vmatpush3.bf16.msra.mxu0 %v1353_v36  ;;  %1287 = vmatpush3.bf16.msra.mxu1 %v1353_v36 }
  0x5d   : > { %1236 = vmatprep.subr.bf16.mxu0 %v1354_v39  ;;  %1280 = vmatprep.subr.bf16.mxu1 %v1354_v39 }
  0x60   : > { %1237 = vmatpush3.bf16.msra.mxu0 %v1354_v39  ;;  %1288 = vmatpush3.bf16.msra.mxu1 %v1354_v39  ;;  %v466_v39 = vld [vmem:[%s1656_s29 + $0x50] sm:$0xff] }
  0x61   : > { %1238 = vmatprep.subr.bf16.mxu0 %v1355_v40  ;;  %1281 = vmatprep.subr.bf16.mxu1 %v1355_v40 }
  0x64   : > { %1239 = vmatpush3.bf16.msra.mxu0 %v1355_v40  ;;  %1289 = vmatpush3.bf16.msra.mxu1 %v1355_v40  ;;  %v482_v40 = vld [vmem:[%s1656_s29 + $0xd0] sm:$0xff] }
  0x65   : > { %1240 = vmatprep.subr.bf16.mxu0 %v1356_v41  ;;  %1282 = vmatprep.subr.bf16.mxu1 %v1356_v41 }
  0x68   : > { %1241 = vmatpush3.bf16.msra.mxu0 %v1356_v41  ;;  %1290 = vmatpush3.bf16.msra.mxu1 %v1356_v41 }
  0x69   : > { %1242 = vmatprep.subr.bf16.mxu0 %v1357_v42  ;;  %1283 = vmatprep.subr.bf16.mxu1 %v1357_v42 }
  0x6c   : > { %1243 = vmatpush3.bf16.msra.mxu0 %v1357_v42  ;;  %1291 = vmatpush3.bf16.msra.mxu1 %v1357_v42 }
  0x6f   : > { %1245 = vmatmul.mubr.bf16.vlgmr.msra.gmra.mxu0 %v1360_v43  ;;  %1261 = vmatmul.mubr.bf16.vlgmr.msra.gmra.mxu1 %v1361_v44 }
  0x70   : > { %1248 = vmatprep.mubr.bf16.mxu0 %v1362_v45  ;;  %1264 = vmatprep.mubr.bf16.mxu1 %v1363_v46  ;;  %v464_v45 = vld [vmem:[%s1656_s29 + $0x40] sm:$0xff] }
  0x71   : > { %v480_v46 = vld [vmem:[%s1656_s29 + $0xc0] sm:$0xff] }
  0x77   : > { %1249 = vmatmul.mubr.bf16.gmra.mxu0 %v1364_v47  ;;  %1265 = vmatmul.mubr.bf16.gmra.mxu1 %v1365_v48 }
  0x78   : > { %1252 = vmatprep.mubr.bf16.mxu0 %v1366_v49  ;;  %1268 = vmatprep.mubr.bf16.mxu1 %v1367_v50 }
  0x7f   : > { %1253 = vmatmul.mubr.bf16.gmra.mxu0 %v1368_v51  ;;  %1269 = vmatmul.mubr.bf16.gmra.mxu1 %v1369_v52  ;;  %v467_v51 = vld [vmem:[%s1656_s29 + $0x58] sm:$0xff] }
  0x80   : > { %1256 = vmatprep.mubr.bf16.mxu0 %v1370_v53  ;;  %1272 = vmatprep.mubr.bf16.mxu1 %v1371_v54  ;;  %v483_v52 = vld [vmem:[%s1656_s29 + $0xd8] sm:$0xff] }
  0x87   : > { %1257 = vmatmul.mubr.bf16.gmra.mxu0 %v1372_v55  ;;  %1273 = vmatmul.mubr.bf16.gmra.mxu1 %v1373_v56 }
 0x12f   : > { %v1246_v59 = vpop.f32.mrf.mxu0  ;;  %v1262_v60 = vpop.f32.mrf.mxu1 }
 0x130   : > { %v843_v63 = vadd.f32 %v1246_v59, %v458_v57  ;;  %v859_v0 = vadd.f32 %v1262_v60, %v474_v58  ;;  %v465_v57 = vld [vmem:[%s1656_s29 + $0x48] sm:$0xff] }
 0x131   : > { %v714_v1 = vpop.f32.mrf.mxu0  ;;  %v778_v2 = vpop.f32.mrf.mxu1  ;;  %v481_v58 = vld [vmem:[%s1656_s29 + $0xc8] sm:$0xff] }
 0x132   : > { %875 = vst [vmem:[%s1656_s29 + $0x10] sm:$0xff] %v843_v63  ;;  %891 = vst [vmem:[%s1656_s29 + $0x90] sm:$0xff] %v859_v0  ;;  %v841_v5 = vadd.f32 %v714_v1, %v456_v61  ;;  %v857_v6 = vadd.f32 %v778_v2, %v472_v62  ;;  %v470_v63 = vld [vmem:[%s1656_s29 + $0x70] sm:$0xff] }
 0x133   : > { %v1247_v7 = vpop.f32.mrf.mxu0  ;;  %v1263_v8 = vpop.f32.mrf.mxu1  ;;  %v486_v0 = vld [vmem:[%s1656_s29 + $0xf0] sm:$0xff] }
 0x134   : > { %873 = vst [vmem:[%s1656_s29] sm:$0xff] %v841_v5  ;;  %889 = vst [vmem:[%s1656_s29 + $0x80] sm:$0xff] %v857_v6  ;;  %v844_v11 = vadd.f32 %v1247_v7, %v459_v3  ;;  %v860_v12 = vadd.f32 %v1263_v8, %v475_v4  ;;  %v468_v5 = vld [vmem:[%s1656_s29 + $0x60] sm:$0xff] }
 0x135   : > { %v717_v13 = vpop.f32.mrf.mxu0  ;;  %v781_v14 = vpop.f32.mrf.mxu1  ;;  %v484_v6 = vld [vmem:[%s1656_s29 + $0xe0] sm:$0xff] }
 0x136   : > { %876 = vst [vmem:[%s1656_s29 + $0x18] sm:$0xff] %v844_v11  ;;  %892 = vst [vmem:[%s1656_s29 + $0x98] sm:$0xff] %v860_v12  ;;  %v842_v17 = vadd.f32 %v717_v13, %v457_v9  ;;  %v858_v18 = vadd.f32 %v781_v14, %v473_v10  ;;  %v471_v11 = vld [vmem:[%s1656_s29 + $0x78] sm:$0xff] }
 0x137   : > { %v1250_v19 = vpop.f32.mrf.mxu0  ;;  %v1266_v20 = vpop.f32.mrf.mxu1  ;;  %v487_v12 = vld [vmem:[%s1656_s29 + $0xf8] sm:$0xff] }
 0x138   : > { %874 = vst [vmem:[%s1656_s29 + $0x8] sm:$0xff] %v842_v17  ;;  %890 = vst [vmem:[%s1656_s29 + $0x88] sm:$0xff] %v858_v18  ;;  %v847_v23 = vadd.f32 %v1250_v19, %v462_v15  ;;  %v863_v24 = vadd.f32 %v1266_v20, %v478_v16  ;;  %v469_v17 = vld [vmem:[%s1656_s29 + $0x68] sm:$0xff] }
 0x139   : > { %v730_v25 = vpop.f32.mrf.mxu0  ;;  %v794_v26 = vpop.f32.mrf.mxu1  ;;  %v485_v18 = vld [vmem:[%s1656_s29 + $0xe8] sm:$0xff] }
 0x13a   : > { %879 = vst [vmem:[%s1656_s29 + $0x30] sm:$0xff] %v847_v23  ;;  %895 = vst [vmem:[%s1656_s29 + $0xb0] sm:$0xff] %v863_v24  ;;  %v845_v29 = vadd.f32 %v730_v25, %v460_v21  ;;  %v861_v30 = vadd.f32 %v794_v26, %v476_v22 }
 0x13b   : > { %v1251_v31 = vpop.f32.mrf.mxu0  ;;  %v1267_v32 = vpop.f32.mrf.mxu1 }
 0x13c   : > { %877 = vst [vmem:[%s1656_s29 + $0x20] sm:$0xff] %v845_v29  ;;  %893 = vst [vmem:[%s1656_s29 + $0xa0] sm:$0xff] %v861_v30  ;;  %v848_v35 = vadd.f32 %v1251_v31, %v463_v27  ;;  %v864_v36 = vadd.f32 %v1267_v32, %v479_v28 }
 0x13d   : > { %v733_v37 = vpop.f32.mrf.mxu0  ;;  %v797_v38 = vpop.f32.mrf.mxu1 }
 0x13e   : > { %880 = vst [vmem:[%s1656_s29 + $0x38] sm:$0xff] %v848_v35  ;;  %896 = vst [vmem:[%s1656_s29 + $0xb8] sm:$0xff] %v864_v36  ;;  %v846_v41 = vadd.f32 %v733_v37, %v461_v33  ;;  %v862_v42 = vadd.f32 %v797_v38, %v477_v34 }
 0x13f   : > { %v1254_v43 = vpop.f32.mrf.mxu0  ;;  %v1270_v44 = vpop.f32.mrf.mxu1 }
 0x140   : > { %878 = vst [vmem:[%s1656_s29 + $0x28] sm:$0xff] %v846_v41  ;;  %894 = vst [vmem:[%s1656_s29 + $0xa8] sm:$0xff] %v862_v42  ;;  %v851_v47 = vadd.f32 %v1254_v43, %v466_v39  ;;  %v867_v48 = vadd.f32 %v1270_v44, %v482_v40 }
 0x141   : > { %v746_v49 = vpop.f32.mrf.mxu0  ;;  %v810_v50 = vpop.f32.mrf.mxu1 }
 0x142   : > { %883 = vst [vmem:[%s1656_s29 + $0x50] sm:$0xff] %v851_v47  ;;  %899 = vst [vmem:[%s1656_s29 + $0xd0] sm:$0xff] %v867_v48  ;;  %v849_v53 = vadd.f32 %v746_v49, %v464_v45  ;;  %v865_v54 = vadd.f32 %v810_v50, %v480_v46 }
 0x143   : > { %v1255_v55 = vpop.f32.mrf.mxu0  ;;  %v1271_v56 = vpop.f32.mrf.mxu1 }
 0x144   : > { %881 = vst [vmem:[%s1656_s29 + $0x40] sm:$0xff] %v849_v53  ;;  %897 = vst [vmem:[%s1656_s29 + $0xc0] sm:$0xff] %v865_v54  ;;  %v852_v59 = vadd.f32 %v1255_v55, %v467_v51  ;;  %v868_v60 = vadd.f32 %v1271_v56, %v483_v52 }
 0x145   : > { %v749_v61 = vpop.f32.mrf.mxu0  ;;  %v813_v62 = vpop.f32.mrf.mxu1 }
 0x146   : > { %884 = vst [vmem:[%s1656_s29 + $0x58] sm:$0xff] %v852_v59  ;;  %900 = vst [vmem:[%s1656_s29 + $0xd8] sm:$0xff] %v868_v60  ;;  %v850_v1 = vadd.f32 %v749_v61, %v465_v57  ;;  %v866_v2 = vadd.f32 %v813_v62, %v481_v58 }
 0x147   : > { %v1258_v3 = vpop.f32.mrf.mxu0  ;;  %v1274_v4 = vpop.f32.mrf.mxu1 }
 0x148   : > { %882 = vst [vmem:[%s1656_s29 + $0x48] sm:$0xff] %v850_v1  ;;  %898 = vst [vmem:[%s1656_s29 + $0xc8] sm:$0xff] %v866_v2  ;;  %v855_v7 = vadd.f32 %v1258_v3, %v470_v63  ;;  %v871_v8 = vadd.f32 %v1274_v4, %v486_v0 }
 0x149   : > { %v762_v9 = vpop.f32.mrf.mxu0  ;;  %v826_v10 = vpop.f32.mrf.mxu1 }
 0x14a   : > { %887 = vst [vmem:[%s1656_s29 + $0x70] sm:$0xff] %v855_v7  ;;  %903 = vst [vmem:[%s1656_s29 + $0xf0] sm:$0xff] %v871_v8  ;;  %v853_v13 = vadd.f32 %v762_v9, %v468_v5  ;;  %v869_v14 = vadd.f32 %v826_v10, %v484_v6 }
 0x14b   : > { %v1259_v15 = vpop.f32.mrf.mxu0  ;;  %v1275_v16 = vpop.f32.mrf.mxu1 }
 0x14c   : > { %885 = vst [vmem:[%s1656_s29 + $0x60] sm:$0xff] %v853_v13  ;;  %901 = vst [vmem:[%s1656_s29 + $0xe0] sm:$0xff] %v869_v14  ;;  %v856_v19 = vadd.f32 %v1259_v15, %v471_v11  ;;  %v872_v20 = vadd.f32 %v1275_v16, %v487_v12  ;;  %908 = sbr.rel (%p1200_p13) target bundleno = 387 (0x183), region = 81 }
 0x14d   : > { %v765_v21 = vpop.f32.mrf.mxu0  ;;  %v829_v22 = vpop.f32.mrf.mxu1 }
 0x14e   : > { %888 = vst [vmem:[%s1656_s29 + $0x78] sm:$0xff] %v856_v19  ;;  %904 = vst [vmem:[%s1656_s29 + $0xf8] sm:$0xff] %v872_v20  ;;  %v854_v23 = vadd.f32 %v765_v21, %v469_v17  ;;  %v870_v24 = vadd.f32 %v829_v22, %v485_v18 }
 0x150   : > { %886 = vst [vmem:[%s1656_s29 + $0x68] sm:$0xff] %v854_v23  ;;  %902 = vst [vmem:[%s1656_s29 + $0xe8] sm:$0xff] %v870_v24 }
 0x151   : > { %v909_v25 = vld [vmem:[%s1656_s29] sm:$0xff]  ;;  %v910_v27 = vld [vmem:[%s1656_s29 + $0x8] sm:$0xff]  ;;  %v911_v30 = vld [vmem:[%s1656_s29 + $0x10] sm:$0xff] }
 0x152   : > { %v1786_v26 = vld [vmem:[%s1906_s2] ss:$0 sm:$0xff]  ;;  %v912_v31 = vld [vmem:[%s1656_s29 + $0x18] sm:$0xff]  ;;  %v914_v35 = vld [vmem:[%s1656_s29 + $0x28] sm:$0xff] }
 0x153   : > { %v948_v28 = vadd.f32 %v1786_v26, %v909_v25  ;;  %v949_v29 = vadd.f32 %v1786_v26, %v910_v27  ;;  %v913_v32 = vld [vmem:[%s1656_s29 + $0x20] sm:$0xff]  ;;  %v950_v33 = vadd.f32 %v1786_v26, %v911_v30  ;;  %v951_v34 = vadd.f32 %v1786_v26, %v912_v31  ;;  %v915_v36 = vld [vmem:[%s1656_s29 + $0x30] sm:$0xff]  ;;  %v916_v38 = vld [vmem:[%s1656_s29 + $0x38] sm:$0xff] }
 0x154   : > { %v952_v37 = vadd.f32 %v1786_v26, %v913_v32  ;;  %v953_v39 = vadd.f32 %v1786_v26, %v914_v35  ;;  %v917_v40 = vld [vmem:[%s1656_s29 + $0x40] sm:$0xff]  ;;  %v954_v41 = vadd.f32 %v1786_v26, %v915_v36  ;;  %v918_v42 = vld [vmem:[%s1656_s29 + $0x48] sm:$0xff]  ;;  %v955_v43 = vadd.f32 %v1786_v26, %v916_v38  ;;  %v919_v44 = vld [vmem:[%s1656_s29 + $0x50] sm:$0xff] }
 0x155   : > { %1374 = vtanh.f32 %v948_v28  ;;  %v956_v45 = vadd.f32 %v1786_v26, %v917_v40  ;;  %v920_v46 = vld [vmem:[%s1656_s29 + $0x58] sm:$0xff]  ;;  %v957_v47 = vadd.f32 %v1786_v26, %v918_v42  ;;  %v921_v48 = vld [vmem:[%s1656_s29 + $0x60] sm:$0xff]  ;;  %v958_v49 = vadd.f32 %v1786_v26, %v919_v44  ;;  %v923_v52 = vld [vmem:[%s1656_s29 + $0x70] sm:$0xff] }
 0x156   : > { %1376 = vtanh.f32 %v949_v29  ;;  %v959_v51 = vadd.f32 %v1786_v26, %v920_v46  ;;  %v960_v53 = vadd.f32 %v1786_v26, %v921_v48  ;;  %v924_v54 = vld [vmem:[%s1656_s29 + $0x78] sm:$0xff]  ;;  %v925_v56 = vld [vmem:[%s1656_s29 + $0x80] sm:$0xff]  ;;  %v962_v57 = vadd.f32 %v1786_v26, %v923_v52  ;;  %v926_v58 = vld [vmem:[%s1656_s29 + $0x88] sm:$0xff] }
 0x157   : > { %1378 = vtanh.f32 %v950_v33  ;;  %v922_v50 = vld [vmem:[%s1656_s29 + $0x68] sm:$0xff]  ;;  %v963_v59 = vadd.f32 %v1786_v26, %v924_v54  ;;  %v927_v60 = vld [vmem:[%s1656_s29 + $0x90] sm:$0xff]  ;;  %v964_v61 = vadd.f32 %v1786_v26, %v925_v56  ;;  %v928_v62 = vld [vmem:[%s1656_s29 + $0x98] sm:$0xff]  ;;  %v965_v0 = vadd.f32 %v1786_v26, %v926_v58 }
 0x158   : > { %1380 = vtanh.f32 %v951_v34  ;;  %v961_v55 = vadd.f32 %v1786_v26, %v922_v50  ;;  %v929_v1 = vld [vmem:[%s1656_s29 + $0xa0] sm:$0xff]  ;;  %v966_v3 = vadd.f32 %v1786_v26, %v927_v60  ;;  %v930_v4 = vld [vmem:[%s1656_s29 + $0xa8] sm:$0xff]  ;;  %v967_v6 = vadd.f32 %v1786_v26, %v928_v62  ;;  %v931_v7 = vld [vmem:[%s1656_s29 + $0xb0] sm:$0xff] }
 0x159   : > { %1382 = vtanh.f32 %v952_v37  ;;  %v968_v9 = vadd.f32 %v1786_v26, %v929_v1  ;;  %v932_v10 = vld [vmem:[%s1656_s29 + $0xb8] sm:$0xff]  ;;  %v969_v12 = vadd.f32 %v1786_v26, %v930_v4  ;;  %v933_v13 = vld [vmem:[%s1656_s29 + $0xc0] sm:$0xff]  ;;  %v970_v15 = vadd.f32 %v1786_v26, %v931_v7  ;;  %v934_v16 = vld [vmem:[%s1656_s29 + $0xc8] sm:$0xff] }
 0x15a   : > { %1384 = vtanh.f32 %v953_v39  ;;  %v971_v18 = vadd.f32 %v1786_v26, %v932_v10  ;;  %v935_v19 = vld [vmem:[%s1656_s29 + $0xd0] sm:$0xff]  ;;  %v972_v21 = vadd.f32 %v1786_v26, %v933_v13  ;;  %v936_v22 = vld [vmem:[%s1656_s29 + $0xd8] sm:$0xff]  ;;  %v973_v24 = vadd.f32 %v1786_v26, %v934_v16  ;;  %v937_v25 = vld [vmem:[%s1656_s29 + $0xe0] sm:$0xff] }
 0x15b   : > { %1386 = vtanh.f32 %v954_v41  ;;  %v974_v28 = vadd.f32 %v1786_v26, %v935_v19  ;;  %v938_v29 = vld [vmem:[%s1656_s29 + $0xe8] sm:$0xff]  ;;  %v975_v31 = vadd.f32 %v1786_v26, %v936_v22  ;;  %v939_v32 = vld [vmem:[%s1656_s29 + $0xf0] sm:$0xff]  ;;  %v976_v34 = vadd.f32 %v1786_v26, %v937_v25  ;;  %v940_v35 = vld [vmem:[%s1656_s29 + $0xf8] sm:$0xff] }
 0x15c   : > { %1388 = vtanh.f32 %v955_v43  ;;  %v977_v37 = vadd.f32 %v1786_v26, %v938_v29  ;;  %v978_v39 = vadd.f32 %v1786_v26, %v939_v32  ;;  %v979_v41 = vadd.f32 %v1786_v26, %v940_v35 }
 0x15d   : > { %1390 = vtanh.f32 %v956_v45 }
 0x15e   : > { %1392 = vtanh.f32 %v957_v47 }
 0x15f   : > { %1394 = vtanh.f32 %v958_v49 }
 0x160   : > { %1396 = vtanh.f32 %v959_v51 }
 0x161   : > { %1398 = vtanh.f32 %v960_v53 }
 0x162   : > { %v1375_v63 = vpop.eup %1374  ;;  %1400 = vtanh.f32 %v961_v55 }
 0x163   : > { %v1377_v2 = vpop.eup %1376  ;;  %1012 = vst [vmem:[%s1656_s29] sm:$0xff] %v1375_v63  ;;  %1402 = vtanh.f32 %v962_v57 }
 0x164   : > { %v1379_v5 = vpop.eup %1378  ;;  %1013 = vst [vmem:[%s1656_s29 + $0x8] sm:$0xff] %v1377_v2  ;;  %1404 = vtanh.f32 %v963_v59 }
 0x165   : > { %v1381_v8 = vpop.eup %1380  ;;  %1014 = vst [vmem:[%s1656_s29 + $0x10] sm:$0xff] %v1379_v5  ;;  %1406 = vtanh.f32 %v964_v61 }
 0x166   : > { %v1383_v11 = vpop.eup %1382  ;;  %1015 = vst [vmem:[%s1656_s29 + $0x18] sm:$0xff] %v1381_v8  ;;  %1408 = vtanh.f32 %v965_v0 }
 0x167   : > { %v1385_v14 = vpop.eup %1384  ;;  %1016 = vst [vmem:[%s1656_s29 + $0x20] sm:$0xff] %v1383_v11  ;;  %1410 = vtanh.f32 %v966_v3 }
 0x168   : > { %v1387_v17 = vpop.eup %1386  ;;  %1017 = vst [vmem:[%s1656_s29 + $0x28] sm:$0xff] %v1385_v14  ;;  %1412 = vtanh.f32 %v967_v6 }
 0x169   : > { %v1389_v20 = vpop.eup %1388  ;;  %1018 = vst [vmem:[%s1656_s29 + $0x30] sm:$0xff] %v1387_v17  ;;  %1414 = vtanh.f32 %v968_v9 }
 0x16a   : > { %v1391_v23 = vpop.eup %1390  ;;  %1019 = vst [vmem:[%s1656_s29 + $0x38] sm:$0xff] %v1389_v20  ;;  %1416 = vtanh.f32 %v969_v12 }
 0x16b   : > { %v1393_v27 = vpop.eup %1392  ;;  %1020 = vst [vmem:[%s1656_s29 + $0x40] sm:$0xff] %v1391_v23  ;;  %1418 = vtanh.f32 %v970_v15 }
 0x16c   : > { %v1395_v30 = vpop.eup %1394  ;;  %1021 = vst [vmem:[%s1656_s29 + $0x48] sm:$0xff] %v1393_v27  ;;  %1420 = vtanh.f32 %v971_v18 }
 0x16d   : > { %v1397_v33 = vpop.eup %1396  ;;  %1022 = vst [vmem:[%s1656_s29 + $0x50] sm:$0xff] %v1395_v30  ;;  %1422 = vtanh.f32 %v972_v21 }
 0x16e   : > { %v1399_v36 = vpop.eup %1398  ;;  %1023 = vst [vmem:[%s1656_s29 + $0x58] sm:$0xff] %v1397_v33  ;;  %1424 = vtanh.f32 %v973_v24 }
 0x16f   : > { %v1401_v38 = vpop.eup %1400  ;;  %1024 = vst [vmem:[%s1656_s29 + $0x60] sm:$0xff] %v1399_v36  ;;  %1426 = vtanh.f32 %v974_v28 }
 0x170   : > { %v1403_v40 = vpop.eup %1402  ;;  %1025 = vst [vmem:[%s1656_s29 + $0x68] sm:$0xff] %v1401_v38  ;;  %1428 = vtanh.f32 %v975_v31 }
 0x171   : > { %v1405_v42 = vpop.eup %1404  ;;  %1026 = vst [vmem:[%s1656_s29 + $0x70] sm:$0xff] %v1403_v40  ;;  %1430 = vtanh.f32 %v976_v34 }
 0x172   : > { %v1407_v43 = vpop.eup %1406  ;;  %1027 = vst [vmem:[%s1656_s29 + $0x78] sm:$0xff] %v1405_v42  ;;  %1432 = vtanh.f32 %v977_v37 }
 0x173   : > { %v1409_v44 = vpop.eup %1408  ;;  %1028 = vst [vmem:[%s1656_s29 + $0x80] sm:$0xff] %v1407_v43  ;;  %1434 = vtanh.f32 %v978_v39 }
 0x174   : > { %v1411_v45 = vpop.eup %1410  ;;  %1029 = vst [vmem:[%s1656_s29 + $0x88] sm:$0xff] %v1409_v44  ;;  %1436 = vtanh.f32 %v979_v41 }
 0x175   : > { %v1413_v26 = vpop.eup %1412  ;;  %1030 = vst [vmem:[%s1656_s29 + $0x90] sm:$0xff] %v1411_v45 }
 0x176   : > { %v1415_v46 = vpop.eup %1414  ;;  %1031 = vst [vmem:[%s1656_s29 + $0x98] sm:$0xff] %v1413_v26 }
 0x177   : > { %v1417_v47 = vpop.eup %1416  ;;  %1032 = vst [vmem:[%s1656_s29 + $0xa0] sm:$0xff] %v1415_v46 }
 0x178   : > { %v1419_v48 = vpop.eup %1418  ;;  %1033 = vst [vmem:[%s1656_s29 + $0xa8] sm:$0xff] %v1417_v47 }
 0x179   : > { %v1421_v49 = vpop.eup %1420  ;;  %1034 = vst [vmem:[%s1656_s29 + $0xb0] sm:$0xff] %v1419_v48 }
 0x17a   : > { %v1423_v50 = vpop.eup %1422  ;;  %1035 = vst [vmem:[%s1656_s29 + $0xb8] sm:$0xff] %v1421_v49 }
 0x17b   : > { %v1425_v51 = vpop.eup %1424  ;;  %1036 = vst [vmem:[%s1656_s29 + $0xc0] sm:$0xff] %v1423_v50 }
 0x17c   : > { %v1427_v52 = vpop.eup %1426  ;;  %1037 = vst [vmem:[%s1656_s29 + $0xc8] sm:$0xff] %v1425_v51 }
 0x17d   : > { %v1429_v53 = vpop.eup %1428  ;;  %1038 = vst [vmem:[%s1656_s29 + $0xd0] sm:$0xff] %v1427_v52 }
 0x17e   : > { %v1431_v54 = vpop.eup %1430  ;;  %1039 = vst [vmem:[%s1656_s29 + $0xd8] sm:$0xff] %v1429_v53 }
 0x17f   : > { %v1433_v55 = vpop.eup %1432  ;;  %1040 = vst [vmem:[%s1656_s29 + $0xe0] sm:$0xff] %v1431_v54 }
 0x180   : > { %v1435_v56 = vpop.eup %1434  ;;  %1041 = vst [vmem:[%s1656_s29 + $0xe8] sm:$0xff] %v1433_v55 }
 0x181   : > { %v1437_v57 = vpop.eup %1436  ;;  %1042 = vst [vmem:[%s1656_s29 + $0xf0] sm:$0xff] %v1435_v56 }
 0x182   : > { %1043 = vst [vmem:[%s1656_s29 + $0xf8] sm:$0xff] %v1437_v57 }
 0x183 PF: > { %s13_s18 = sadd.s32 1, %s1492_s18   ;;  %s1908_s12 = smov %s1472_s13 }
 0x184   : > { %p10_p0 = scmp.ge.s32.totalorder %s13_s18, 52   ;;  %s1909_s13 = smov %s1566_s25 }
 0x185   : > { %s1910_s14 = smov %s1484_s16  ;;  %s1911_s15 = smov %s1488_s17 }
 0x186   : > { %s1912_s16 = smov %s1915_s19  ;;  %s1913_s17 = smov %s1919_s20 }
 0x187   :  { %12 = sbr.rel (!%p10_p0) target bundleno = 4 (0x4), region = 122 }

</bundles_post_ra>
